<compile_context>
chip_gen: v7x
topology: tpu7x:2x2x1
jax: 0.10.0
libtpu: 0.0.40
codegen_flags: <defaults>
</compile_context>

<pallas_src>
import functools

import jax
import jax.numpy as jnp
from jax import lax
from jax.experimental import pallas as pl
from jax.experimental.pallas import tpu as pltpu


def _select_rows(x, fi, k):
    """Hard selection on one (rows, D) f32 chunk; returns the output chunk."""
    fw = x * fi                                   # weighted features (f32)
    # Canonicalize -0.0 -> +0.0 so the bit-level ordering treats them as equal
    # (torch.topk compares values, not bit patterns).
    fw = jnp.where(fw == 0.0, 0.0, fw)

    # Order-preserving map f32 -> int32 whose bit pattern, read as unsigned,
    # is monotone in the float value:
    #   positive floats:  bits ^ 0x80000000   (set the sign bit)
    #   negative floats:  ~bits               (flip all bits)
    bits = lax.bitcast_convert_type(fw, jnp.int32)
    key = bits ^ ((bits >> 31) | jnp.int32(-(2 ** 31)))

    rows = x.shape[0]
    active = jnp.ones(key.shape, jnp.int32)       # still matches the k-th value's prefix
    greater = jnp.zeros(key.shape, jnp.int32)     # strictly greater than the k-th value
    k_rem = jnp.full((rows, 1), k, jnp.int32)     # rank of the k-th value within `active`

    # 32 radix passes, MSB -> LSB, static bit positions (fully unrolled).
    # Per pass: 2 bit-ops + 1 int lane-sum (XLU) + a handful of VALU selects.
    for b in range(31, -1, -1):
        bit1 = (key >> b) & 1                     # this bit of every element
        inbit = active & bit1                     # active elements with bit == 1
        c_hi = jnp.sum(inbit, axis=-1, keepdims=True)          # (rows, 1) int32
        d = c_hi - k_rem                          # >= 0  <=>  k-th value has bit == 1
        ge = jnp.broadcast_to(d, key.shape) >= 0  # i32 lane-broadcast, then compare
        # bit of the k-th value is 1: survivors are the bit==1 subset of `active`.
        # bit is 0: every bit==1 active element is strictly greater than the k-th.
        active = jnp.where(ge, inbit, active - inbit)
        greater = jnp.where(ge, greater, greater + inbit)
        k_rem = jnp.where(d >= 0, k_rem, k_rem - c_hi)

    # NOTE: NaN ordering differs from recent torch.topk (which sorts NaN as
    # largest); irrelevant for finite inputs.
    return jnp.where(greater != 0, x, jnp.zeros_like(x))


def _hard_selector_kernel(x_ref, fi_ref, o_ref, *, k: int, row_chunk: int):
    fi = fi_ref[...]                              # (1, D) f32, broadcasts over rows
    n_chunks = x_ref.shape[0] // row_chunk

    if n_chunks == 1:
        o_ref[...] = _select_rows(x_ref[...], fi, k)
    else:
        # Row-chunked loop: the radix-select carries stay register-resident per
        # chunk; fori_loop (not a Python for) bounds the live ranges.
        def body(c, carry):
            r0 = pl.multiple_of(c * row_chunk, row_chunk)
            x = x_ref[pl.ds(r0, row_chunk), :]
            o_ref[pl.ds(r0, row_chunk), :] = _select_rows(x, fi, k)
            return carry

        lax.fori_loop(0, n_chunks, body, jnp.int32(0))


def _choose_block_b(B: int, D: int, *, max_rows: int = 512,
                    vmem_budget_bytes: int = 8 * 1024 * 1024) -> int:
    """Largest multiple-of-8 divisor of B such that the double-buffered input
    and output tiles (plus slack) stay under a conservative VMEM budget
    (safe for v5e's 16 MiB default scoped limit and v7x's smaller VMEM).
    Falls back to a single full-B block (always a legal BlockSpec)."""
    cap = max(8, vmem_budget_bytes // (6 * D * 4))
    cap = min(cap, max_rows, B)
    best = 0
    for d in range(8, cap + 1, 8):
        if B % d == 0:
            best = d
    return best if best else B


def _choose_row_chunk(block_b: int, D: int, *, slab_bytes: int = 32 * 1024) -> int:
    """Largest multiple-of-8 divisor of block_b whose (rows, D) f32 slab is at
    most ~8 vregs, so key/active/greater stay in the 64-vreg register file
    through the 32 radix passes instead of round-tripping through VMEM."""
    if block_b % 8 != 0:
        return block_b
    target = max(8, slab_bytes // (D * 4))
    best = 8
    for d in range(8, min(block_b, target) + 1, 8):
        if block_b % d == 0:
            best = d
    return best


def hard_selector(x: jax.Array, feature_importance: jax.Array,
                  selection_part: float) -> jax.Array:
    B, D = x.shape
    assert x.dtype == jnp.float32, "HardSelector kernel expects float32 inputs"
    k = int(selection_part * D)
    assert 1 <= k <= D, "selection_part * input_shape must be in [1, D]"

    fi2d = feature_importance.reshape(1, D).astype(jnp.float32)

    # Keep the feature axis lane-dense (multiple of 128).  Padded entries are
    # (-inf) * 1.0 = -inf, whose keys sit below every finite value, so they can
    # never enter the top-k or the output; padded columns are sliced off.
    D_pad = ((D + 127) // 128) * 128
    if D_pad != D:
        x_in = jnp.pad(x, ((0, 0), (0, D_pad - D)), constant_values=-jnp.inf)
        fi_in = jnp.pad(fi2d, ((0, 0), (0, D_pad - D)), constant_values=1.0)
    else:
        x_in, fi_in = x, fi2d

    block_b = _choose_block_b(B, D_pad)
    row_chunk = _choose_row_chunk(block_b, D_pad)
    assert B % block_b == 0 and block_b % row_chunk == 0

    kernel = functools.partial(_hard_selector_kernel, k=k, row_chunk=row_chunk)

    out = pl.pallas_call(
        kernel,
        out_shape=jax.ShapeDtypeStruct((B, D_pad), x.dtype),
        grid_spec=pltpu.PrefetchScalarGridSpec(
            num_scalar_prefetch=0,
            grid=(B // block_b,),
            in_specs=[
                pl.BlockSpec((block_b, D_pad), lambda i: (i, 0)),
                pl.BlockSpec((1, D_pad), lambda i: (0, 0)),
            ],
            out_specs=pl.BlockSpec((block_b, D_pad), lambda i: (i, 0)),
        ),
        compiler_params=pltpu.CompilerParams(
            dimension_semantics=("parallel",)),
    )(x_in, fi_in)

    return out[:, :D] if D_pad != D else out


def _reference(x, fi, selection_part):
    B, D = x.shape
    k = int(selection_part * D)
    fw = x * fi[None, :]
    topk = jax.lax.top_k(fw, k)[0]                # (B, k), descending
    thr = topk[:, -1:]                            # k-th largest
    return jnp.where(fw > thr, x, jnp.zeros_like(x))


if __name__ == "__main__":
    key = jax.random.PRNGKey(0)
    kx, kf = jax.random.split(key)

    B, D = 16, 128                 # input_shape = 128 (feature dim)
    selection_part = 0.25          # -> k = 32

    x = jax.random.normal(kx, (B, D), dtype=jnp.float32)

    # Case 1: module __init__ value — feature_importance = ones(input_shape).
    fi_ones = jnp.ones((D,), dtype=jnp.float32)
    out = jax.block_until_ready(hard_selector(x, fi_ones, selection_part))
    ref = _reference(x, fi_ones, selection_part)
    assert out.shape == (B, D) and out.dtype == jnp.float32
    assert jnp.allclose(out, ref), "Pallas output mismatch vs reference (ones fi)"

    # Case 2: a "trained" (non-trivial) feature_importance vector.
    fi_rand = jax.random.normal(kf, (D,), dtype=jnp.float32)
    out2 = jax.block_until_ready(hard_selector(x, fi_rand, selection_part))
    ref2 = _reference(x, fi_rand, selection_part)
    assert jnp.allclose(out2, ref2), "Pallas output mismatch vs reference (rand fi)"

    print("KERNEL_OK")
</pallas_src>

<mosaic_0001>
module attributes {stable_mosaic.version = 11 : i64} {
  func.func @_hard_selector_kernel(%arg0: i32, %arg1: memref<16x128xf32, #tpu.memory_space<vmem>>, %arg2: memref<1x128xf32, #tpu.memory_space<vmem>>, %arg3: memref<16x128xf32, #tpu.memory_space<vmem>>) attributes {dimension_semantics = [#tpu.dimension_semantics<parallel>], iteration_bounds = array<i64: 1>, scalar_prefetch = 0 : i64, scratch_operands = 0 : i64, tpu.core_type = #tpu.core_type<tc>, window_params = [{transform_indices = @transform_0, window_bounds = array<i64: 16, 128>}, {pipeline_mode = #tpu.pipeline_mode<synchronous>, transform_indices = @transform_1, window_bounds = array<i64: 1, 128>}, {transform_indices = @transform_2, window_bounds = array<i64: 16, 128>}]} {
    %c0 = arith.constant 0 : index
    %c0_0 = arith.constant 0 : index
    %0 = vector.load %arg2[%c0, %c0_0] : memref<1x128xf32, #tpu.memory_space<vmem>>, vector<1x128xf32>
    %c0_1 = arith.constant 0 : index
    %c0_2 = arith.constant 0 : index
    %1 = vector.load %arg1[%c0_1, %c0_2] : memref<16x128xf32, #tpu.memory_space<vmem>>, vector<16x128xf32>
    %2 = vector.broadcast %0 : vector<1x128xf32> to vector<16x128xf32>
    %3 = arith.mulf %1, %2 : vector<16x128xf32>
    %cst = arith.constant 0.000000e+00 : f32
    %4 = vector.broadcast %cst : f32 to vector<16x128xf32>
    %5 = arith.cmpf oeq, %3, %4 : vector<16x128xf32>
    %cst_3 = arith.constant 0.000000e+00 : f32
    %6 = vector.broadcast %cst_3 : f32 to vector<16x128xf32>
    %7 = arith.select %5, %6, %3 : vector<16x128xi1>, vector<16x128xf32>
    %8 = tpu.bitcast %7 : vector<16x128xf32> -> vector<16x128xi32>
    %c31_i32 = arith.constant 31 : i32
    %9 = vector.broadcast %c31_i32 : i32 to vector<16x128xi32>
    %10 = arith.shrsi %8, %9 : vector<16x128xi32>
    %c-2147483648_i32 = arith.constant -2147483648 : i32
    %11 = vector.broadcast %c-2147483648_i32 : i32 to vector<16x128xi32>
    %12 = arith.ori %10, %11 : vector<16x128xi32>
    %13 = arith.xori %8, %12 : vector<16x128xi32>
    %c1_i32 = arith.constant 1 : i32
    %14 = vector.broadcast %c1_i32 : i32 to vector<16x128xi32>
    %c0_i32 = arith.constant 0 : i32
    %15 = vector.broadcast %c0_i32 : i32 to vector<16x128xi32>
    %c32_i32 = arith.constant 32 : i32
    %16 = vector.broadcast %c32_i32 : i32 to vector<16x1xi32>
    %c31_i32_4 = arith.constant 31 : i32
    %17 = vector.broadcast %c31_i32_4 : i32 to vector<16x128xi32>
    %18 = arith.shrsi %13, %17 : vector<16x128xi32>
    %c1_i32_5 = arith.constant 1 : i32
    %19 = vector.broadcast %c1_i32_5 : i32 to vector<16x128xi32>
    %20 = arith.andi %18, %19 : vector<16x128xi32>
    %21 = arith.andi %14, %20 : vector<16x128xi32>
    %cst_6 = arith.constant dense<0> : vector<16xi32>
    %22 = vector.multi_reduction <add>, %21, %cst_6 [1] : vector<16x128xi32> to vector<16xi32>
    %23 = vector.shape_cast %22 : vector<16xi32> to vector<16x1xi32>
    %24 = arith.subi %23, %16 : vector<16x1xi32>
    %25 = vector.shape_cast %24 : vector<16x1xi32> to vector<16x1xi32>
    %26 = vector.broadcast %25 : vector<16x1xi32> to vector<16x128xi32>
    %c0_i32_7 = arith.constant 0 : i32
    %27 = vector.broadcast %c0_i32_7 : i32 to vector<16x128xi32>
    %28 = arith.cmpi sge, %26, %27 : vector<16x128xi32>
    %29 = arith.subi %14, %21 : vector<16x128xi32>
    %30 = arith.select %28, %21, %29 : vector<16x128xi1>, vector<16x128xi32>
    %31 = arith.addi %15, %21 : vector<16x128xi32>
    %32 = arith.select %28, %15, %31 : vector<16x128xi1>, vector<16x128xi32>
    %c0_i32_8 = arith.constant 0 : i32
    %33 = vector.broadcast %c0_i32_8 : i32 to vector<16x1xi32>
    %34 = arith.cmpi sge, %24, %33 : vector<16x1xi32>
    %35 = arith.subi %16, %23 : vector<16x1xi32>
    %36 = arith.select %34, %16, %35 : vector<16x1xi1>, vector<16x1xi32>
    %c30_i32 = arith.constant 30 : i32
    %37 = vector.broadcast %c30_i32 : i32 to vector<16x128xi32>
    %38 = arith.shrsi %13, %37 : vector<16x128xi32>
    %c1_i32_9 = arith.constant 1 : i32
    %39 = vector.broadcast %c1_i32_9 : i32 to vector<16x128xi32>
    %40 = arith.andi %38, %39 : vector<16x128xi32>
    %41 = arith.andi %30, %40 : vector<16x128xi32>
    %cst_10 = arith.constant dense<0> : vector<16xi32>
    %42 = vector.multi_reduction <add>, %41, %cst_10 [1] : vector<16x128xi32> to vector<16xi32>
    %43 = vector.shape_cast %42 : vector<16xi32> to vector<16x1xi32>
    %44 = arith.subi %43, %36 : vector<16x1xi32>
    %45 = vector.shape_cast %44 : vector<16x1xi32> to vector<16x1xi32>
    %46 = vector.broadcast %45 : vector<16x1xi32> to vector<16x128xi32>
    %c0_i32_11 = arith.constant 0 : i32
    %47 = vector.broadcast %c0_i32_11 : i32 to vector<16x128xi32>
    %48 = arith.cmpi sge, %46, %47 : vector<16x128xi32>
    %49 = arith.subi %30, %41 : vector<16x128xi32>
    %50 = arith.select %48, %41, %49 : vector<16x128xi1>, vector<16x128xi32>
    %51 = arith.addi %32, %41 : vector<16x128xi32>
    %52 = arith.select %48, %32, %51 : vector<16x128xi1>, vector<16x128xi32>
    %c0_i32_12 = arith.constant 0 : i32
    %53 = vector.broadcast %c0_i32_12 : i32 to vector<16x1xi32>
    %54 = arith.cmpi sge, %44, %53 : vector<16x1xi32>
    %55 = arith.subi %36, %43 : vector<16x1xi32>
    %56 = arith.select %54, %36, %55 : vector<16x1xi1>, vector<16x1xi32>
    %c29_i32 = arith.constant 29 : i32
    %57 = vector.broadcast %c29_i32 : i32 to vector<16x128xi32>
    %58 = arith.shrsi %13, %57 : vector<16x128xi32>
    %c1_i32_13 = arith.constant 1 : i32
    %59 = vector.broadcast %c1_i32_13 : i32 to vector<16x128xi32>
    %60 = arith.andi %58, %59 : vector<16x128xi32>
    %61 = arith.andi %50, %60 : vector<16x128xi32>
    %cst_14 = arith.constant dense<0> : vector<16xi32>
    %62 = vector.multi_reduction <add>, %61, %cst_14 [1] : vector<16x128xi32> to vector<16xi32>
    %63 = vector.shape_cast %62 : vector<16xi32> to vector<16x1xi32>
    %64 = arith.subi %63, %56 : vector<16x1xi32>
    %65 = vector.shape_cast %64 : vector<16x1xi32> to vector<16x1xi32>
    %66 = vector.broadcast %65 : vector<16x1xi32> to vector<16x128xi32>
    %c0_i32_15 = arith.constant 0 : i32
    %67 = vector.broadcast %c0_i32_15 : i32 to vector<16x128xi32>
    %68 = arith.cmpi sge, %66, %67 : vector<16x128xi32>
    %69 = arith.subi %50, %61 : vector<16x128xi32>
    %70 = arith.select %68, %61, %69 : vector<16x128xi1>, vector<16x128xi32>
    %71 = arith.addi %52, %61 : vector<16x128xi32>
    %72 = arith.select %68, %52, %71 : vector<16x128xi1>, vector<16x128xi32>
    %c0_i32_16 = arith.constant 0 : i32
    %73 = vector.broadcast %c0_i32_16 : i32 to vector<16x1xi32>
    %74 = arith.cmpi sge, %64, %73 : vector<16x1xi32>
    %75 = arith.subi %56, %63 : vector<16x1xi32>
    %76 = arith.select %74, %56, %75 : vector<16x1xi1>, vector<16x1xi32>
    %c28_i32 = arith.constant 28 : i32
    %77 = vector.broadcast %c28_i32 : i32 to vector<16x128xi32>
    %78 = arith.shrsi %13, %77 : vector<16x128xi32>
    %c1_i32_17 = arith.constant 1 : i32
    %79 = vector.broadcast %c1_i32_17 : i32 to vector<16x128xi32>
    %80 = arith.andi %78, %79 : vector<16x128xi32>
    %81 = arith.andi %70, %80 : vector<16x128xi32>
    %cst_18 = arith.constant dense<0> : vector<16xi32>
    %82 = vector.multi_reduction <add>, %81, %cst_18 [1] : vector<16x128xi32> to vector<16xi32>
    %83 = vector.shape_cast %82 : vector<16xi32> to vector<16x1xi32>
    %84 = arith.subi %83, %76 : vector<16x1xi32>
    %85 = vector.shape_cast %84 : vector<16x1xi32> to vector<16x1xi32>
    %86 = vector.broadcast %85 : vector<16x1xi32> to vector<16x128xi32>
    %c0_i32_19 = arith.constant 0 : i32
    %87 = vector.broadcast %c0_i32_19 : i32 to vector<16x128xi32>
    %88 = arith.cmpi sge, %86, %87 : vector<16x128xi32>
    %89 = arith.subi %70, %81 : vector<16x128xi32>
    %90 = arith.select %88, %81, %89 : vector<16x128xi1>, vector<16x128xi32>
    %91 = arith.addi %72, %81 : vector<16x128xi32>
    %92 = arith.select %88, %72, %91 : vector<16x128xi1>, vector<16x128xi32>
    %c0_i32_20 = arith.constant 0 : i32
    %93 = vector.broadcast %c0_i32_20 : i32 to vector<16x1xi32>
    %94 = arith.cmpi sge, %84, %93 : vector<16x1xi32>
    %95 = arith.subi %76, %83 : vector<16x1xi32>
    %96 = arith.select %94, %76, %95 : vector<16x1xi1>, vector<16x1xi32>
    %c27_i32 = arith.constant 27 : i32
    %97 = vector.broadcast %c27_i32 : i32 to vector<16x128xi32>
    %98 = arith.shrsi %13, %97 : vector<16x128xi32>
    %c1_i32_21 = arith.constant 1 : i32
    %99 = vector.broadcast %c1_i32_21 : i32 to vector<16x128xi32>
    %100 = arith.andi %98, %99 : vector<16x128xi32>
    %101 = arith.andi %90, %100 : vector<16x128xi32>
    %cst_22 = arith.constant dense<0> : vector<16xi32>
    %102 = vector.multi_reduction <add>, %101, %cst_22 [1] : vector<16x128xi32> to vector<16xi32>
    %103 = vector.shape_cast %102 : vector<16xi32> to vector<16x1xi32>
    %104 = arith.subi %103, %96 : vector<16x1xi32>
    %105 = vector.shape_cast %104 : vector<16x1xi32> to vector<16x1xi32>
    %106 = vector.broadcast %105 : vector<16x1xi32> to vector<16x128xi32>
    %c0_i32_23 = arith.constant 0 : i32
    %107 = vector.broadcast %c0_i32_23 : i32 to vector<16x128xi32>
    %108 = arith.cmpi sge, %106, %107 : vector<16x128xi32>
    %109 = arith.subi %90, %101 : vector<16x128xi32>
    %110 = arith.select %108, %101, %109 : vector<16x128xi1>, vector<16x128xi32>
    %111 = arith.addi %92, %101 : vector<16x128xi32>
    %112 = arith.select %108, %92, %111 : vector<16x128xi1>, vector<16x128xi32>
    %c0_i32_24 = arith.constant 0 : i32
    %113 = vector.broadcast %c0_i32_24 : i32 to vector<16x1xi32>
    %114 = arith.cmpi sge, %104, %113 : vector<16x1xi32>
    %115 = arith.subi %96, %103 : vector<16x1xi32>
    %116 = arith.select %114, %96, %115 : vector<16x1xi1>, vector<16x1xi32>
    %c26_i32 = arith.constant 26 : i32
    %117 = vector.broadcast %c26_i32 : i32 to vector<16x128xi32>
    %118 = arith.shrsi %13, %117 : vector<16x128xi32>
    %c1_i32_25 = arith.constant 1 : i32
    %119 = vector.broadcast %c1_i32_25 : i32 to vector<16x128xi32>
    %120 = arith.andi %118, %119 : vector<16x128xi32>
    %121 = arith.andi %110, %120 : vector<16x128xi32>
    %cst_26 = arith.constant dense<0> : vector<16xi32>
    %122 = vector.multi_reduction <add>, %121, %cst_26 [1] : vector<16x128xi32> to vector<16xi32>
    %123 = vector.shape_cast %122 : vector<16xi32> to vector<16x1xi32>
    %124 = arith.subi %123, %116 : vector<16x1xi32>
    %125 = vector.shape_cast %124 : vector<16x1xi32> to vector<16x1xi32>
    %126 = vector.broadcast %125 : vector<16x1xi32> to vector<16x128xi32>
    %c0_i32_27 = arith.constant 0 : i32
    %127 = vector.broadcast %c0_i32_27 : i32 to vector<16x128xi32>
    %128 = arith.cmpi sge, %126, %127 : vector<16x128xi32>
    %129 = arith.subi %110, %121 : vector<16x128xi32>
    %130 = arith.select %128, %121, %129 : vector<16x128xi1>, vector<16x128xi32>
    %131 = arith.addi %112, %121 : vector<16x128xi32>
    %132 = arith.select %128, %112, %131 : vector<16x128xi1>, vector<16x128xi32>
    %c0_i32_28 = arith.constant 0 : i32
    %133 = vector.broadcast %c0_i32_28 : i32 to vector<16x1xi32>
    %134 = arith.cmpi sge, %124, %133 : vector<16x1xi32>
    %135 = arith.subi %116, %123 : vector<16x1xi32>
    %136 = arith.select %134, %116, %135 : vector<16x1xi1>, vector<16x1xi32>
    %c25_i32 = arith.constant 25 : i32
    %137 = vector.broadcast %c25_i32 : i32 to vector<16x128xi32>
    %138 = arith.shrsi %13, %137 : vector<16x128xi32>
    %c1_i32_29 = arith.constant 1 : i32
    %139 = vector.broadcast %c1_i32_29 : i32 to vector<16x128xi32>
    %140 = arith.andi %138, %139 : vector<16x128xi32>
    %141 = arith.andi %130, %140 : vector<16x128xi32>
    %cst_30 = arith.constant dense<0> : vector<16xi32>
    %142 = vector.multi_reduction <add>, %141, %cst_30 [1] : vector<16x128xi32> to vector<16xi32>
    %143 = vector.shape_cast %142 : vector<16xi32> to vector<16x1xi32>
    %144 = arith.subi %143, %136 : vector<16x1xi32>
    %145 = vector.shape_cast %144 : vector<16x1xi32> to vector<16x1xi32>
    %146 = vector.broadcast %145 : vector<16x1xi32> to vector<16x128xi32>
    %c0_i32_31 = arith.constant 0 : i32
    %147 = vector.broadcast %c0_i32_31 : i32 to vector<16x128xi32>
    %148 = arith.cmpi sge, %146, %147 : vector<16x128xi32>
    %149 = arith.subi %130, %141 : vector<16x128xi32>
    %150 = arith.select %148, %141, %149 : vector<16x128xi1>, vector<16x128xi32>
    %151 = arith.addi %132, %141 : vector<16x128xi32>
    %152 = arith.select %148, %132, %151 : vector<16x128xi1>, vector<16x128xi32>
    %c0_i32_32 = arith.constant 0 : i32
    %153 = vector.broadcast %c0_i32_32 : i32 to vector<16x1xi32>
    %154 = arith.cmpi sge, %144, %153 : vector<16x1xi32>
    %155 = arith.subi %136, %143 : vector<16x1xi32>
    %156 = arith.select %154, %136, %155 : vector<16x1xi1>, vector<16x1xi32>
    %c24_i32 = arith.constant 24 : i32
    %157 = vector.broadcast %c24_i32 : i32 to vector<16x128xi32>
    %158 = arith.shrsi %13, %157 : vector<16x128xi32>
    %c1_i32_33 = arith.constant 1 : i32
    %159 = vector.broadcast %c1_i32_33 : i32 to vector<16x128xi32>
    %160 = arith.andi %158, %159 : vector<16x128xi32>
    %161 = arith.andi %150, %160 : vector<16x128xi32>
    %cst_34 = arith.constant dense<0> : vector<16xi32>
    %162 = vector.multi_reduction <add>, %161, %cst_34 [1] : vector<16x128xi32> to vector<16xi32>
    %163 = vector.shape_cast %162 : vector<16xi32> to vector<16x1xi32>
    %164 = arith.subi %163, %156 : vector<16x1xi32>
    %165 = vector.shape_cast %164 : vector<16x1xi32> to vector<16x1xi32>
    %166 = vector.broadcast %165 : vector<16x1xi32> to vector<16x128xi32>
    %c0_i32_35 = arith.constant 0 : i32
    %167 = vector.broadcast %c0_i32_35 : i32 to vector<16x128xi32>
    %168 = arith.cmpi sge, %166, %167 : vector<16x128xi32>
    %169 = arith.subi %150, %161 : vector<16x128xi32>
    %170 = arith.select %168, %161, %169 : vector<16x128xi1>, vector<16x128xi32>
    %171 = arith.addi %152, %161 : vector<16x128xi32>
    %172 = arith.select %168, %152, %171 : vector<16x128xi1>, vector<16x128xi32>
    %c0_i32_36 = arith.constant 0 : i32
    %173 = vector.broadcast %c0_i32_36 : i32 to vector<16x1xi32>
    %174 = arith.cmpi sge, %164, %173 : vector<16x1xi32>
    %175 = arith.subi %156, %163 : vector<16x1xi32>
    %176 = arith.select %174, %156, %175 : vector<16x1xi1>, vector<16x1xi32>
    %c23_i32 = arith.constant 23 : i32
    %177 = vector.broadcast %c23_i32 : i32 to vector<16x128xi32>
    %178 = arith.shrsi %13, %177 : vector<16x128xi32>
    %c1_i32_37 = arith.constant 1 : i32
    %179 = vector.broadcast %c1_i32_37 : i32 to vector<16x128xi32>
    %180 = arith.andi %178, %179 : vector<16x128xi32>
    %181 = arith.andi %170, %180 : vector<16x128xi32>
    %cst_38 = arith.constant dense<0> : vector<16xi32>
    %182 = vector.multi_reduction <add>, %181, %cst_38 [1] : vector<16x128xi32> to vector<16xi32>
    %183 = vector.shape_cast %182 : vector<16xi32> to vector<16x1xi32>
    %184 = arith.subi %183, %176 : vector<16x1xi32>
    %185 = vector.shape_cast %184 : vector<16x1xi32> to vector<16x1xi32>
    %186 = vector.broadcast %185 : vector<16x1xi32> to vector<16x128xi32>
    %c0_i32_39 = arith.constant 0 : i32
    %187 = vector.broadcast %c0_i32_39 : i32 to vector<16x128xi32>
    %188 = arith.cmpi sge, %186, %187 : vector<16x128xi32>
    %189 = arith.subi %170, %181 : vector<16x128xi32>
    %190 = arith.select %188, %181, %189 : vector<16x128xi1>, vector<16x128xi32>
    %191 = arith.addi %172, %181 : vector<16x128xi32>
    %192 = arith.select %188, %172, %191 : vector<16x128xi1>, vector<16x128xi32>
    %c0_i32_40 = arith.constant 0 : i32
    %193 = vector.broadcast %c0_i32_40 : i32 to vector<16x1xi32>
    %194 = arith.cmpi sge, %184, %193 : vector<16x1xi32>
    %195 = arith.subi %176, %183 : vector<16x1xi32>
    %196 = arith.select %194, %176, %195 : vector<16x1xi1>, vector<16x1xi32>
    %c22_i32 = arith.constant 22 : i32
    %197 = vector.broadcast %c22_i32 : i32 to vector<16x128xi32>
    %198 = arith.shrsi %13, %197 : vector<16x128xi32>
    %c1_i32_41 = arith.constant 1 : i32
    %199 = vector.broadcast %c1_i32_41 : i32 to vector<16x128xi32>
    %200 = arith.andi %198, %199 : vector<16x128xi32>
    %201 = arith.andi %190, %200 : vector<16x128xi32>
    %cst_42 = arith.constant dense<0> : vector<16xi32>
    %202 = vector.multi_reduction <add>, %201, %cst_42 [1] : vector<16x128xi32> to vector<16xi32>
    %203 = vector.shape_cast %202 : vector<16xi32> to vector<16x1xi32>
    %204 = arith.subi %203, %196 : vector<16x1xi32>
    %205 = vector.shape_cast %204 : vector<16x1xi32> to vector<16x1xi32>
    %206 = vector.broadcast %205 : vector<16x1xi32> to vector<16x128xi32>
    %c0_i32_43 = arith.constant 0 : i32
    %207 = vector.broadcast %c0_i32_43 : i32 to vector<16x128xi32>
    %208 = arith.cmpi sge, %206, %207 : vector<16x128xi32>
    %209 = arith.subi %190, %201 : vector<16x128xi32>
    %210 = arith.select %208, %201, %209 : vector<16x128xi1>, vector<16x128xi32>
    %211 = arith.addi %192, %201 : vector<16x128xi32>
    %212 = arith.select %208, %192, %211 : vector<16x128xi1>, vector<16x128xi32>
    %c0_i32_44 = arith.constant 0 : i32
    %213 = vector.broadcast %c0_i32_44 : i32 to vector<16x1xi32>
    %214 = arith.cmpi sge, %204, %213 : vector<16x1xi32>
    %215 = arith.subi %196, %203 : vector<16x1xi32>
    %216 = arith.select %214, %196, %215 : vector<16x1xi1>, vector<16x1xi32>
    %c21_i32 = arith.constant 21 : i32
    %217 = vector.broadcast %c21_i32 : i32 to vector<16x128xi32>
    %218 = arith.shrsi %13, %217 : vector<16x128xi32>
    %c1_i32_45 = arith.constant 1 : i32
    %219 = vector.broadcast %c1_i32_45 : i32 to vector<16x128xi32>
    %220 = arith.andi %218, %219 : vector<16x128xi32>
    %221 = arith.andi %210, %220 : vector<16x128xi32>
    %cst_46 = arith.constant dense<0> : vector<16xi32>
    %222 = vector.multi_reduction <add>, %221, %cst_46 [1] : vector<16x128xi32> to vector<16xi32>
    %223 = vector.shape_cast %222 : vector<16xi32> to vector<16x1xi32>
    %224 = arith.subi %223, %216 : vector<16x1xi32>
    %225 = vector.shape_cast %224 : vector<16x1xi32> to vector<16x1xi32>
    %226 = vector.broadcast %225 : vector<16x1xi32> to vector<16x128xi32>
    %c0_i32_47 = arith.constant 0 : i32
    %227 = vector.broadcast %c0_i32_47 : i32 to vector<16x128xi32>
    %228 = arith.cmpi sge, %226, %227 : vector<16x128xi32>
    %229 = arith.subi %210, %221 : vector<16x128xi32>
    %230 = arith.select %228, %221, %229 : vector<16x128xi1>, vector<16x128xi32>
    %231 = arith.addi %212, %221 : vector<16x128xi32>
    %232 = arith.select %228, %212, %231 : vector<16x128xi1>, vector<16x128xi32>
    %c0_i32_48 = arith.constant 0 : i32
    %233 = vector.broadcast %c0_i32_48 : i32 to vector<16x1xi32>
    %234 = arith.cmpi sge, %224, %233 : vector<16x1xi32>
    %235 = arith.subi %216, %223 : vector<16x1xi32>
    %236 = arith.select %234, %216, %235 : vector<16x1xi1>, vector<16x1xi32>
    %c20_i32 = arith.constant 20 : i32
    %237 = vector.broadcast %c20_i32 : i32 to vector<16x128xi32>
    %238 = arith.shrsi %13, %237 : vector<16x128xi32>
    %c1_i32_49 = arith.constant 1 : i32
    %239 = vector.broadcast %c1_i32_49 : i32 to vector<16x128xi32>
    %240 = arith.andi %238, %239 : vector<16x128xi32>
    %241 = arith.andi %230, %240 : vector<16x128xi32>
    %cst_50 = arith.constant dense<0> : vector<16xi32>
    %242 = vector.multi_reduction <add>, %241, %cst_50 [1] : vector<16x128xi32> to vector<16xi32>
    %243 = vector.shape_cast %242 : vector<16xi32> to vector<16x1xi32>
    %244 = arith.subi %243, %236 : vector<16x1xi32>
    %245 = vector.shape_cast %244 : vector<16x1xi32> to vector<16x1xi32>
    %246 = vector.broadcast %245 : vector<16x1xi32> to vector<16x128xi32>
    %c0_i32_51 = arith.constant 0 : i32
    %247 = vector.broadcast %c0_i32_51 : i32 to vector<16x128xi32>
    %248 = arith.cmpi sge, %246, %247 : vector<16x128xi32>
    %249 = arith.subi %230, %241 : vector<16x128xi32>
    %250 = arith.select %248, %241, %249 : vector<16x128xi1>, vector<16x128xi32>
    %251 = arith.addi %232, %241 : vector<16x128xi32>
    %252 = arith.select %248, %232, %251 : vector<16x128xi1>, vector<16x128xi32>
    %c0_i32_52 = arith.constant 0 : i32
    %253 = vector.broadcast %c0_i32_52 : i32 to vector<16x1xi32>
    %254 = arith.cmpi sge, %244, %253 : vector<16x1xi32>
    %255 = arith.subi %236, %243 : vector<16x1xi32>
    %256 = arith.select %254, %236, %255 : vector<16x1xi1>, vector<16x1xi32>
    %c19_i32 = arith.constant 19 : i32
    %257 = vector.broadcast %c19_i32 : i32 to vector<16x128xi32>
    %258 = arith.shrsi %13, %257 : vector<16x128xi32>
    %c1_i32_53 = arith.constant 1 : i32
    %259 = vector.broadcast %c1_i32_53 : i32 to vector<16x128xi32>
    %260 = arith.andi %258, %259 : vector<16x128xi32>
    %261 = arith.andi %250, %260 : vector<16x128xi32>
    %cst_54 = arith.constant dense<0> : vector<16xi32>
    %262 = vector.multi_reduction <add>, %261, %cst_54 [1] : vector<16x128xi32> to vector<16xi32>
    %263 = vector.shape_cast %262 : vector<16xi32> to vector<16x1xi32>
    %264 = arith.subi %263, %256 : vector<16x1xi32>
    %265 = vector.shape_cast %264 : vector<16x1xi32> to vector<16x1xi32>
    %266 = vector.broadcast %265 : vector<16x1xi32> to vector<16x128xi32>
    %c0_i32_55 = arith.constant 0 : i32
    %267 = vector.broadcast %c0_i32_55 : i32 to vector<16x128xi32>
    %268 = arith.cmpi sge, %266, %267 : vector<16x128xi32>
    %269 = arith.subi %250, %261 : vector<16x128xi32>
    %270 = arith.select %268, %261, %269 : vector<16x128xi1>, vector<16x128xi32>
    %271 = arith.addi %252, %261 : vector<16x128xi32>
    %272 = arith.select %268, %252, %271 : vector<16x128xi1>, vector<16x128xi32>
    %c0_i32_56 = arith.constant 0 : i32
    %273 = vector.broadcast %c0_i32_56 : i32 to vector<16x1xi32>
    %274 = arith.cmpi sge, %264, %273 : vector<16x1xi32>
    %275 = arith.subi %256, %263 : vector<16x1xi32>
    %276 = arith.select %274, %256, %275 : vector<16x1xi1>, vector<16x1xi32>
    %c18_i32 = arith.constant 18 : i32
    %277 = vector.broadcast %c18_i32 : i32 to vector<16x128xi32>
    %278 = arith.shrsi %13, %277 : vector<16x128xi32>
    %c1_i32_57 = arith.constant 1 : i32
    %279 = vector.broadcast %c1_i32_57 : i32 to vector<16x128xi32>
    %280 = arith.andi %278, %279 : vector<16x128xi32>
    %281 = arith.andi %270, %280 : vector<16x128xi32>
    %cst_58 = arith.constant dense<0> : vector<16xi32>
    %282 = vector.multi_reduction <add>, %281, %cst_58 [1] : vector<16x128xi32> to vector<16xi32>
    %283 = vector.shape_cast %282 : vector<16xi32> to vector<16x1xi32>
    %284 = arith.subi %283, %276 : vector<16x1xi32>
    %285 = vector.shape_cast %284 : vector<16x1xi32> to vector<16x1xi32>
    %286 = vector.broadcast %285 : vector<16x1xi32> to vector<16x128xi32>
    %c0_i32_59 = arith.constant 0 : i32
    %287 = vector.broadcast %c0_i32_59 : i32 to vector<16x128xi32>
    %288 = arith.cmpi sge, %286, %287 : vector<16x128xi32>
    %289 = arith.subi %270, %281 : vector<16x128xi32>
    %290 = arith.select %288, %281, %289 : vector<16x128xi1>, vector<16x128xi32>
    %291 = arith.addi %272, %281 : vector<16x128xi32>
    %292 = arith.select %288, %272, %291 : vector<16x128xi1>, vector<16x128xi32>
    %c0_i32_60 = arith.constant 0 : i32
    %293 = vector.broadcast %c0_i32_60 : i32 to vector<16x1xi32>
    %294 = arith.cmpi sge, %284, %293 : vector<16x1xi32>
    %295 = arith.subi %276, %283 : vector<16x1xi32>
    %296 = arith.select %294, %276, %295 : vector<16x1xi1>, vector<16x1xi32>
    %c17_i32 = arith.constant 17 : i32
    %297 = vector.broadcast %c17_i32 : i32 to vector<16x128xi32>
    %298 = arith.shrsi %13, %297 : vector<16x128xi32>
    %c1_i32_61 = arith.constant 1 : i32
    %299 = vector.broadcast %c1_i32_61 : i32 to vector<16x128xi32>
    %300 = arith.andi %298, %299 : vector<16x128xi32>
    %301 = arith.andi %290, %300 : vector<16x128xi32>
    %cst_62 = arith.constant dense<0> : vector<16xi32>
    %302 = vector.multi_reduction <add>, %301, %cst_62 [1] : vector<16x128xi32> to vector<16xi32>
    %303 = vector.shape_cast %302 : vector<16xi32> to vector<16x1xi32>
    %304 = arith.subi %303, %296 : vector<16x1xi32>
    %305 = vector.shape_cast %304 : vector<16x1xi32> to vector<16x1xi32>
    %306 = vector.broadcast %305 : vector<16x1xi32> to vector<16x128xi32>
    %c0_i32_63 = arith.constant 0 : i32
    %307 = vector.broadcast %c0_i32_63 : i32 to vector<16x128xi32>
    %308 = arith.cmpi sge, %306, %307 : vector<16x128xi32>
    %309 = arith.subi %290, %301 : vector<16x128xi32>
    %310 = arith.select %308, %301, %309 : vector<16x128xi1>, vector<16x128xi32>
    %311 = arith.addi %292, %301 : vector<16x128xi32>
    %312 = arith.select %308, %292, %311 : vector<16x128xi1>, vector<16x128xi32>
    %c0_i32_64 = arith.constant 0 : i32
    %313 = vector.broadcast %c0_i32_64 : i32 to vector<16x1xi32>
    %314 = arith.cmpi sge, %304, %313 : vector<16x1xi32>
    %315 = arith.subi %296, %303 : vector<16x1xi32>
    %316 = arith.select %314, %296, %315 : vector<16x1xi1>, vector<16x1xi32>
    %c16_i32 = arith.constant 16 : i32
    %317 = vector.broadcast %c16_i32 : i32 to vector<16x128xi32>
    %318 = arith.shrsi %13, %317 : vector<16x128xi32>
    %c1_i32_65 = arith.constant 1 : i32
    %319 = vector.broadcast %c1_i32_65 : i32 to vector<16x128xi32>
    %320 = arith.andi %318, %319 : vector<16x128xi32>
    %321 = arith.andi %310, %320 : vector<16x128xi32>
    %cst_66 = arith.constant dense<0> : vector<16xi32>
    %322 = vector.multi_reduction <add>, %321, %cst_66 [1] : vector<16x128xi32> to vector<16xi32>
    %323 = vector.shape_cast %322 : vector<16xi32> to vector<16x1xi32>
    %324 = arith.subi %323, %316 : vector<16x1xi32>
    %325 = vector.shape_cast %324 : vector<16x1xi32> to vector<16x1xi32>
    %326 = vector.broadcast %325 : vector<16x1xi32> to vector<16x128xi32>
    %c0_i32_67 = arith.constant 0 : i32
    %327 = vector.broadcast %c0_i32_67 : i32 to vector<16x128xi32>
    %328 = arith.cmpi sge, %326, %327 : vector<16x128xi32>
    %329 = arith.subi %310, %321 : vector<16x128xi32>
    %330 = arith.select %328, %321, %329 : vector<16x128xi1>, vector<16x128xi32>
    %331 = arith.addi %312, %321 : vector<16x128xi32>
    %332 = arith.select %328, %312, %331 : vector<16x128xi1>, vector<16x128xi32>
    %c0_i32_68 = arith.constant 0 : i32
    %333 = vector.broadcast %c0_i32_68 : i32 to vector<16x1xi32>
    %334 = arith.cmpi sge, %324, %333 : vector<16x1xi32>
    %335 = arith.subi %316, %323 : vector<16x1xi32>
    %336 = arith.select %334, %316, %335 : vector<16x1xi1>, vector<16x1xi32>
    %c15_i32 = arith.constant 15 : i32
    %337 = vector.broadcast %c15_i32 : i32 to vector<16x128xi32>
    %338 = arith.shrsi %13, %337 : vector<16x128xi32>
    %c1_i32_69 = arith.constant 1 : i32
    %339 = vector.broadcast %c1_i32_69 : i32 to vector<16x128xi32>
    %340 = arith.andi %338, %339 : vector<16x128xi32>
    %341 = arith.andi %330, %340 : vector<16x128xi32>
    %cst_70 = arith.constant dense<0> : vector<16xi32>
    %342 = vector.multi_reduction <add>, %341, %cst_70 [1] : vector<16x128xi32> to vector<16xi32>
    %343 = vector.shape_cast %342 : vector<16xi32> to vector<16x1xi32>
    %344 = arith.subi %343, %336 : vector<16x1xi32>
    %345 = vector.shape_cast %344 : vector<16x1xi32> to vector<16x1xi32>
    %346 = vector.broadcast %345 : vector<16x1xi32> to vector<16x128xi32>
    %c0_i32_71 = arith.constant 0 : i32
    %347 = vector.broadcast %c0_i32_71 : i32 to vector<16x128xi32>
    %348 = arith.cmpi sge, %346, %347 : vector<16x128xi32>
    %349 = arith.subi %330, %341 : vector<16x128xi32>
    %350 = arith.select %348, %341, %349 : vector<16x128xi1>, vector<16x128xi32>
    %351 = arith.addi %332, %341 : vector<16x128xi32>
    %352 = arith.select %348, %332, %351 : vector<16x128xi1>, vector<16x128xi32>
    %c0_i32_72 = arith.constant 0 : i32
    %353 = vector.broadcast %c0_i32_72 : i32 to vector<16x1xi32>
    %354 = arith.cmpi sge, %344, %353 : vector<16x1xi32>
    %355 = arith.subi %336, %343 : vector<16x1xi32>
    %356 = arith.select %354, %336, %355 : vector<16x1xi1>, vector<16x1xi32>
    %c14_i32 = arith.constant 14 : i32
    %357 = vector.broadcast %c14_i32 : i32 to vector<16x128xi32>
    %358 = arith.shrsi %13, %357 : vector<16x128xi32>
    %c1_i32_73 = arith.constant 1 : i32
    %359 = vector.broadcast %c1_i32_73 : i32 to vector<16x128xi32>
    %360 = arith.andi %358, %359 : vector<16x128xi32>
    %361 = arith.andi %350, %360 : vector<16x128xi32>
    %cst_74 = arith.constant dense<0> : vector<16xi32>
    %362 = vector.multi_reduction <add>, %361, %cst_74 [1] : vector<16x128xi32> to vector<16xi32>
    %363 = vector.shape_cast %362 : vector<16xi32> to vector<16x1xi32>
    %364 = arith.subi %363, %356 : vector<16x1xi32>
    %365 = vector.shape_cast %364 : vector<16x1xi32> to vector<16x1xi32>
    %366 = vector.broadcast %365 : vector<16x1xi32> to vector<16x128xi32>
    %c0_i32_75 = arith.constant 0 : i32
    %367 = vector.broadcast %c0_i32_75 : i32 to vector<16x128xi32>
    %368 = arith.cmpi sge, %366, %367 : vector<16x128xi32>
    %369 = arith.subi %350, %361 : vector<16x128xi32>
    %370 = arith.select %368, %361, %369 : vector<16x128xi1>, vector<16x128xi32>
    %371 = arith.addi %352, %361 : vector<16x128xi32>
    %372 = arith.select %368, %352, %371 : vector<16x128xi1>, vector<16x128xi32>
    %c0_i32_76 = arith.constant 0 : i32
    %373 = vector.broadcast %c0_i32_76 : i32 to vector<16x1xi32>
    %374 = arith.cmpi sge, %364, %373 : vector<16x1xi32>
    %375 = arith.subi %356, %363 : vector<16x1xi32>
    %376 = arith.select %374, %356, %375 : vector<16x1xi1>, vector<16x1xi32>
    %c13_i32 = arith.constant 13 : i32
    %377 = vector.broadcast %c13_i32 : i32 to vector<16x128xi32>
    %378 = arith.shrsi %13, %377 : vector<16x128xi32>
    %c1_i32_77 = arith.constant 1 : i32
    %379 = vector.broadcast %c1_i32_77 : i32 to vector<16x128xi32>
    %380 = arith.andi %378, %379 : vector<16x128xi32>
    %381 = arith.andi %370, %380 : vector<16x128xi32>
    %cst_78 = arith.constant dense<0> : vector<16xi32>
    %382 = vector.multi_reduction <add>, %381, %cst_78 [1] : vector<16x128xi32> to vector<16xi32>
    %383 = vector.shape_cast %382 : vector<16xi32> to vector<16x1xi32>
    %384 = arith.subi %383, %376 : vector<16x1xi32>
    %385 = vector.shape_cast %384 : vector<16x1xi32> to vector<16x1xi32>
    %386 = vector.broadcast %385 : vector<16x1xi32> to vector<16x128xi32>
    %c0_i32_79 = arith.constant 0 : i32
    %387 = vector.broadcast %c0_i32_79 : i32 to vector<16x128xi32>
    %388 = arith.cmpi sge, %386, %387 : vector<16x128xi32>
    %389 = arith.subi %370, %381 : vector<16x128xi32>
    %390 = arith.select %388, %381, %389 : vector<16x128xi1>, vector<16x128xi32>
    %391 = arith.addi %372, %381 : vector<16x128xi32>
    %392 = arith.select %388, %372, %391 : vector<16x128xi1>, vector<16x128xi32>
    %c0_i32_80 = arith.constant 0 : i32
    %393 = vector.broadcast %c0_i32_80 : i32 to vector<16x1xi32>
    %394 = arith.cmpi sge, %384, %393 : vector<16x1xi32>
    %395 = arith.subi %376, %383 : vector<16x1xi32>
    %396 = arith.select %394, %376, %395 : vector<16x1xi1>, vector<16x1xi32>
    %c12_i32 = arith.constant 12 : i32
    %397 = vector.broadcast %c12_i32 : i32 to vector<16x128xi32>
    %398 = arith.shrsi %13, %397 : vector<16x128xi32>
    %c1_i32_81 = arith.constant 1 : i32
    %399 = vector.broadcast %c1_i32_81 : i32 to vector<16x128xi32>
    %400 = arith.andi %398, %399 : vector<16x128xi32>
    %401 = arith.andi %390, %400 : vector<16x128xi32>
    %cst_82 = arith.constant dense<0> : vector<16xi32>
    %402 = vector.multi_reduction <add>, %401, %cst_82 [1] : vector<16x128xi32> to vector<16xi32>
    %403 = vector.shape_cast %402 : vector<16xi32> to vector<16x1xi32>
    %404 = arith.subi %403, %396 : vector<16x1xi32>
    %405 = vector.shape_cast %404 : vector<16x1xi32> to vector<16x1xi32>
    %406 = vector.broadcast %405 : vector<16x1xi32> to vector<16x128xi32>
    %c0_i32_83 = arith.constant 0 : i32
    %407 = vector.broadcast %c0_i32_83 : i32 to vector<16x128xi32>
    %408 = arith.cmpi sge, %406, %407 : vector<16x128xi32>
    %409 = arith.subi %390, %401 : vector<16x128xi32>
    %410 = arith.select %408, %401, %409 : vector<16x128xi1>, vector<16x128xi32>
    %411 = arith.addi %392, %401 : vector<16x128xi32>
    %412 = arith.select %408, %392, %411 : vector<16x128xi1>, vector<16x128xi32>
    %c0_i32_84 = arith.constant 0 : i32
    %413 = vector.broadcast %c0_i32_84 : i32 to vector<16x1xi32>
    %414 = arith.cmpi sge, %404, %413 : vector<16x1xi32>
    %415 = arith.subi %396, %403 : vector<16x1xi32>
    %416 = arith.select %414, %396, %415 : vector<16x1xi1>, vector<16x1xi32>
    %c11_i32 = arith.constant 11 : i32
    %417 = vector.broadcast %c11_i32 : i32 to vector<16x128xi32>
    %418 = arith.shrsi %13, %417 : vector<16x128xi32>
    %c1_i32_85 = arith.constant 1 : i32
    %419 = vector.broadcast %c1_i32_85 : i32 to vector<16x128xi32>
    %420 = arith.andi %418, %419 : vector<16x128xi32>
    %421 = arith.andi %410, %420 : vector<16x128xi32>
    %cst_86 = arith.constant dense<0> : vector<16xi32>
    %422 = vector.multi_reduction <add>, %421, %cst_86 [1] : vector<16x128xi32> to vector<16xi32>
    %423 = vector.shape_cast %422 : vector<16xi32> to vector<16x1xi32>
    %424 = arith.subi %423, %416 : vector<16x1xi32>
    %425 = vector.shape_cast %424 : vector<16x1xi32> to vector<16x1xi32>
    %426 = vector.broadcast %425 : vector<16x1xi32> to vector<16x128xi32>
    %c0_i32_87 = arith.constant 0 : i32
    %427 = vector.broadcast %c0_i32_87 : i32 to vector<16x128xi32>
    %428 = arith.cmpi sge, %426, %427 : vector<16x128xi32>
    %429 = arith.subi %410, %421 : vector<16x128xi32>
    %430 = arith.select %428, %421, %429 : vector<16x128xi1>, vector<16x128xi32>
    %431 = arith.addi %412, %421 : vector<16x128xi32>
    %432 = arith.select %428, %412, %431 : vector<16x128xi1>, vector<16x128xi32>
    %c0_i32_88 = arith.constant 0 : i32
    %433 = vector.broadcast %c0_i32_88 : i32 to vector<16x1xi32>
    %434 = arith.cmpi sge, %424, %433 : vector<16x1xi32>
    %435 = arith.subi %416, %423 : vector<16x1xi32>
    %436 = arith.select %434, %416, %435 : vector<16x1xi1>, vector<16x1xi32>
    %c10_i32 = arith.constant 10 : i32
    %437 = vector.broadcast %c10_i32 : i32 to vector<16x128xi32>
    %438 = arith.shrsi %13, %437 : vector<16x128xi32>
    %c1_i32_89 = arith.constant 1 : i32
    %439 = vector.broadcast %c1_i32_89 : i32 to vector<16x128xi32>
    %440 = arith.andi %438, %439 : vector<16x128xi32>
    %441 = arith.andi %430, %440 : vector<16x128xi32>
    %cst_90 = arith.constant dense<0> : vector<16xi32>
    %442 = vector.multi_reduction <add>, %441, %cst_90 [1] : vector<16x128xi32> to vector<16xi32>
    %443 = vector.shape_cast %442 : vector<16xi32> to vector<16x1xi32>
    %444 = arith.subi %443, %436 : vector<16x1xi32>
    %445 = vector.shape_cast %444 : vector<16x1xi32> to vector<16x1xi32>
    %446 = vector.broadcast %445 : vector<16x1xi32> to vector<16x128xi32>
    %c0_i32_91 = arith.constant 0 : i32
    %447 = vector.broadcast %c0_i32_91 : i32 to vector<16x128xi32>
    %448 = arith.cmpi sge, %446, %447 : vector<16x128xi32>
    %449 = arith.subi %430, %441 : vector<16x128xi32>
    %450 = arith.select %448, %441, %449 : vector<16x128xi1>, vector<16x128xi32>
    %451 = arith.addi %432, %441 : vector<16x128xi32>
    %452 = arith.select %448, %432, %451 : vector<16x128xi1>, vector<16x128xi32>
    %c0_i32_92 = arith.constant 0 : i32
    %453 = vector.broadcast %c0_i32_92 : i32 to vector<16x1xi32>
    %454 = arith.cmpi sge, %444, %453 : vector<16x1xi32>
    %455 = arith.subi %436, %443 : vector<16x1xi32>
    %456 = arith.select %454, %436, %455 : vector<16x1xi1>, vector<16x1xi32>
    %c9_i32 = arith.constant 9 : i32
    %457 = vector.broadcast %c9_i32 : i32 to vector<16x128xi32>
    %458 = arith.shrsi %13, %457 : vector<16x128xi32>
    %c1_i32_93 = arith.constant 1 : i32
    %459 = vector.broadcast %c1_i32_93 : i32 to vector<16x128xi32>
    %460 = arith.andi %458, %459 : vector<16x128xi32>
    %461 = arith.andi %450, %460 : vector<16x128xi32>
    %cst_94 = arith.constant dense<0> : vector<16xi32>
    %462 = vector.multi_reduction <add>, %461, %cst_94 [1] : vector<16x128xi32> to vector<16xi32>
    %463 = vector.shape_cast %462 : vector<16xi32> to vector<16x1xi32>
    %464 = arith.subi %463, %456 : vector<16x1xi32>
    %465 = vector.shape_cast %464 : vector<16x1xi32> to vector<16x1xi32>
    %466 = vector.broadcast %465 : vector<16x1xi32> to vector<16x128xi32>
    %c0_i32_95 = arith.constant 0 : i32
    %467 = vector.broadcast %c0_i32_95 : i32 to vector<16x128xi32>
    %468 = arith.cmpi sge, %466, %467 : vector<16x128xi32>
    %469 = arith.subi %450, %461 : vector<16x128xi32>
    %470 = arith.select %468, %461, %469 : vector<16x128xi1>, vector<16x128xi32>
    %471 = arith.addi %452, %461 : vector<16x128xi32>
    %472 = arith.select %468, %452, %471 : vector<16x128xi1>, vector<16x128xi32>
    %c0_i32_96 = arith.constant 0 : i32
    %473 = vector.broadcast %c0_i32_96 : i32 to vector<16x1xi32>
    %474 = arith.cmpi sge, %464, %473 : vector<16x1xi32>
    %475 = arith.subi %456, %463 : vector<16x1xi32>
    %476 = arith.select %474, %456, %475 : vector<16x1xi1>, vector<16x1xi32>
    %c8_i32 = arith.constant 8 : i32
    %477 = vector.broadcast %c8_i32 : i32 to vector<16x128xi32>
    %478 = arith.shrsi %13, %477 : vector<16x128xi32>
    %c1_i32_97 = arith.constant 1 : i32
    %479 = vector.broadcast %c1_i32_97 : i32 to vector<16x128xi32>
    %480 = arith.andi %478, %479 : vector<16x128xi32>
    %481 = arith.andi %470, %480 : vector<16x128xi32>
    %cst_98 = arith.constant dense<0> : vector<16xi32>
    %482 = vector.multi_reduction <add>, %481, %cst_98 [1] : vector<16x128xi32> to vector<16xi32>
    %483 = vector.shape_cast %482 : vector<16xi32> to vector<16x1xi32>
    %484 = arith.subi %483, %476 : vector<16x1xi32>
    %485 = vector.shape_cast %484 : vector<16x1xi32> to vector<16x1xi32>
    %486 = vector.broadcast %485 : vector<16x1xi32> to vector<16x128xi32>
    %c0_i32_99 = arith.constant 0 : i32
    %487 = vector.broadcast %c0_i32_99 : i32 to vector<16x128xi32>
    %488 = arith.cmpi sge, %486, %487 : vector<16x128xi32>
    %489 = arith.subi %470, %481 : vector<16x128xi32>
    %490 = arith.select %488, %481, %489 : vector<16x128xi1>, vector<16x128xi32>
    %491 = arith.addi %472, %481 : vector<16x128xi32>
    %492 = arith.select %488, %472, %491 : vector<16x128xi1>, vector<16x128xi32>
    %c0_i32_100 = arith.constant 0 : i32
    %493 = vector.broadcast %c0_i32_100 : i32 to vector<16x1xi32>
    %494 = arith.cmpi sge, %484, %493 : vector<16x1xi32>
    %495 = arith.subi %476, %483 : vector<16x1xi32>
    %496 = arith.select %494, %476, %495 : vector<16x1xi1>, vector<16x1xi32>
    %c7_i32 = arith.constant 7 : i32
    %497 = vector.broadcast %c7_i32 : i32 to vector<16x128xi32>
    %498 = arith.shrsi %13, %497 : vector<16x128xi32>
    %c1_i32_101 = arith.constant 1 : i32
    %499 = vector.broadcast %c1_i32_101 : i32 to vector<16x128xi32>
    %500 = arith.andi %498, %499 : vector<16x128xi32>
    %501 = arith.andi %490, %500 : vector<16x128xi32>
    %cst_102 = arith.constant dense<0> : vector<16xi32>
    %502 = vector.multi_reduction <add>, %501, %cst_102 [1] : vector<16x128xi32> to vector<16xi32>
    %503 = vector.shape_cast %502 : vector<16xi32> to vector<16x1xi32>
    %504 = arith.subi %503, %496 : vector<16x1xi32>
    %505 = vector.shape_cast %504 : vector<16x1xi32> to vector<16x1xi32>
    %506 = vector.broadcast %505 : vector<16x1xi32> to vector<16x128xi32>
    %c0_i32_103 = arith.constant 0 : i32
    %507 = vector.broadcast %c0_i32_103 : i32 to vector<16x128xi32>
    %508 = arith.cmpi sge, %506, %507 : vector<16x128xi32>
    %509 = arith.subi %490, %501 : vector<16x128xi32>
    %510 = arith.select %508, %501, %509 : vector<16x128xi1>, vector<16x128xi32>
    %511 = arith.addi %492, %501 : vector<16x128xi32>
    %512 = arith.select %508, %492, %511 : vector<16x128xi1>, vector<16x128xi32>
    %c0_i32_104 = arith.constant 0 : i32
    %513 = vector.broadcast %c0_i32_104 : i32 to vector<16x1xi32>
    %514 = arith.cmpi sge, %504, %513 : vector<16x1xi32>
    %515 = arith.subi %496, %503 : vector<16x1xi32>
    %516 = arith.select %514, %496, %515 : vector<16x1xi1>, vector<16x1xi32>
    %c6_i32 = arith.constant 6 : i32
    %517 = vector.broadcast %c6_i32 : i32 to vector<16x128xi32>
    %518 = arith.shrsi %13, %517 : vector<16x128xi32>
    %c1_i32_105 = arith.constant 1 : i32
    %519 = vector.broadcast %c1_i32_105 : i32 to vector<16x128xi32>
    %520 = arith.andi %518, %519 : vector<16x128xi32>
    %521 = arith.andi %510, %520 : vector<16x128xi32>
    %cst_106 = arith.constant dense<0> : vector<16xi32>
    %522 = vector.multi_reduction <add>, %521, %cst_106 [1] : vector<16x128xi32> to vector<16xi32>
    %523 = vector.shape_cast %522 : vector<16xi32> to vector<16x1xi32>
    %524 = arith.subi %523, %516 : vector<16x1xi32>
    %525 = vector.shape_cast %524 : vector<16x1xi32> to vector<16x1xi32>
    %526 = vector.broadcast %525 : vector<16x1xi32> to vector<16x128xi32>
    %c0_i32_107 = arith.constant 0 : i32
    %527 = vector.broadcast %c0_i32_107 : i32 to vector<16x128xi32>
    %528 = arith.cmpi sge, %526, %527 : vector<16x128xi32>
    %529 = arith.subi %510, %521 : vector<16x128xi32>
    %530 = arith.select %528, %521, %529 : vector<16x128xi1>, vector<16x128xi32>
    %531 = arith.addi %512, %521 : vector<16x128xi32>
    %532 = arith.select %528, %512, %531 : vector<16x128xi1>, vector<16x128xi32>
    %c0_i32_108 = arith.constant 0 : i32
    %533 = vector.broadcast %c0_i32_108 : i32 to vector<16x1xi32>
    %534 = arith.cmpi sge, %524, %533 : vector<16x1xi32>
    %535 = arith.subi %516, %523 : vector<16x1xi32>
    %536 = arith.select %534, %516, %535 : vector<16x1xi1>, vector<16x1xi32>
    %c5_i32 = arith.constant 5 : i32
    %537 = vector.broadcast %c5_i32 : i32 to vector<16x128xi32>
    %538 = arith.shrsi %13, %537 : vector<16x128xi32>
    %c1_i32_109 = arith.constant 1 : i32
    %539 = vector.broadcast %c1_i32_109 : i32 to vector<16x128xi32>
    %540 = arith.andi %538, %539 : vector<16x128xi32>
    %541 = arith.andi %530, %540 : vector<16x128xi32>
    %cst_110 = arith.constant dense<0> : vector<16xi32>
    %542 = vector.multi_reduction <add>, %541, %cst_110 [1] : vector<16x128xi32> to vector<16xi32>
    %543 = vector.shape_cast %542 : vector<16xi32> to vector<16x1xi32>
    %544 = arith.subi %543, %536 : vector<16x1xi32>
    %545 = vector.shape_cast %544 : vector<16x1xi32> to vector<16x1xi32>
    %546 = vector.broadcast %545 : vector<16x1xi32> to vector<16x128xi32>
    %c0_i32_111 = arith.constant 0 : i32
    %547 = vector.broadcast %c0_i32_111 : i32 to vector<16x128xi32>
    %548 = arith.cmpi sge, %546, %547 : vector<16x128xi32>
    %549 = arith.subi %530, %541 : vector<16x128xi32>
    %550 = arith.select %548, %541, %549 : vector<16x128xi1>, vector<16x128xi32>
    %551 = arith.addi %532, %541 : vector<16x128xi32>
    %552 = arith.select %548, %532, %551 : vector<16x128xi1>, vector<16x128xi32>
    %c0_i32_112 = arith.constant 0 : i32
    %553 = vector.broadcast %c0_i32_112 : i32 to vector<16x1xi32>
    %554 = arith.cmpi sge, %544, %553 : vector<16x1xi32>
    %555 = arith.subi %536, %543 : vector<16x1xi32>
    %556 = arith.select %554, %536, %555 : vector<16x1xi1>, vector<16x1xi32>
    %c4_i32 = arith.constant 4 : i32
    %557 = vector.broadcast %c4_i32 : i32 to vector<16x128xi32>
    %558 = arith.shrsi %13, %557 : vector<16x128xi32>
    %c1_i32_113 = arith.constant 1 : i32
    %559 = vector.broadcast %c1_i32_113 : i32 to vector<16x128xi32>
    %560 = arith.andi %558, %559 : vector<16x128xi32>
    %561 = arith.andi %550, %560 : vector<16x128xi32>
    %cst_114 = arith.constant dense<0> : vector<16xi32>
    %562 = vector.multi_reduction <add>, %561, %cst_114 [1] : vector<16x128xi32> to vector<16xi32>
    %563 = vector.shape_cast %562 : vector<16xi32> to vector<16x1xi32>
    %564 = arith.subi %563, %556 : vector<16x1xi32>
    %565 = vector.shape_cast %564 : vector<16x1xi32> to vector<16x1xi32>
    %566 = vector.broadcast %565 : vector<16x1xi32> to vector<16x128xi32>
    %c0_i32_115 = arith.constant 0 : i32
    %567 = vector.broadcast %c0_i32_115 : i32 to vector<16x128xi32>
    %568 = arith.cmpi sge, %566, %567 : vector<16x128xi32>
    %569 = arith.subi %550, %561 : vector<16x128xi32>
    %570 = arith.select %568, %561, %569 : vector<16x128xi1>, vector<16x128xi32>
    %571 = arith.addi %552, %561 : vector<16x128xi32>
    %572 = arith.select %568, %552, %571 : vector<16x128xi1>, vector<16x128xi32>
    %c0_i32_116 = arith.constant 0 : i32
    %573 = vector.broadcast %c0_i32_116 : i32 to vector<16x1xi32>
    %574 = arith.cmpi sge, %564, %573 : vector<16x1xi32>
    %575 = arith.subi %556, %563 : vector<16x1xi32>
    %576 = arith.select %574, %556, %575 : vector<16x1xi1>, vector<16x1xi32>
    %c3_i32 = arith.constant 3 : i32
    %577 = vector.broadcast %c3_i32 : i32 to vector<16x128xi32>
    %578 = arith.shrsi %13, %577 : vector<16x128xi32>
    %c1_i32_117 = arith.constant 1 : i32
    %579 = vector.broadcast %c1_i32_117 : i32 to vector<16x128xi32>
    %580 = arith.andi %578, %579 : vector<16x128xi32>
    %581 = arith.andi %570, %580 : vector<16x128xi32>
    %cst_118 = arith.constant dense<0> : vector<16xi32>
    %582 = vector.multi_reduction <add>, %581, %cst_118 [1] : vector<16x128xi32> to vector<16xi32>
    %583 = vector.shape_cast %582 : vector<16xi32> to vector<16x1xi32>
    %584 = arith.subi %583, %576 : vector<16x1xi32>
    %585 = vector.shape_cast %584 : vector<16x1xi32> to vector<16x1xi32>
    %586 = vector.broadcast %585 : vector<16x1xi32> to vector<16x128xi32>
    %c0_i32_119 = arith.constant 0 : i32
    %587 = vector.broadcast %c0_i32_119 : i32 to vector<16x128xi32>
    %588 = arith.cmpi sge, %586, %587 : vector<16x128xi32>
    %589 = arith.subi %570, %581 : vector<16x128xi32>
    %590 = arith.select %588, %581, %589 : vector<16x128xi1>, vector<16x128xi32>
    %591 = arith.addi %572, %581 : vector<16x128xi32>
    %592 = arith.select %588, %572, %591 : vector<16x128xi1>, vector<16x128xi32>
    %c0_i32_120 = arith.constant 0 : i32
    %593 = vector.broadcast %c0_i32_120 : i32 to vector<16x1xi32>
    %594 = arith.cmpi sge, %584, %593 : vector<16x1xi32>
    %595 = arith.subi %576, %583 : vector<16x1xi32>
    %596 = arith.select %594, %576, %595 : vector<16x1xi1>, vector<16x1xi32>
    %c2_i32 = arith.constant 2 : i32
    %597 = vector.broadcast %c2_i32 : i32 to vector<16x128xi32>
    %598 = arith.shrsi %13, %597 : vector<16x128xi32>
    %c1_i32_121 = arith.constant 1 : i32
    %599 = vector.broadcast %c1_i32_121 : i32 to vector<16x128xi32>
    %600 = arith.andi %598, %599 : vector<16x128xi32>
    %601 = arith.andi %590, %600 : vector<16x128xi32>
    %cst_122 = arith.constant dense<0> : vector<16xi32>
    %602 = vector.multi_reduction <add>, %601, %cst_122 [1] : vector<16x128xi32> to vector<16xi32>
    %603 = vector.shape_cast %602 : vector<16xi32> to vector<16x1xi32>
    %604 = arith.subi %603, %596 : vector<16x1xi32>
    %605 = vector.shape_cast %604 : vector<16x1xi32> to vector<16x1xi32>
    %606 = vector.broadcast %605 : vector<16x1xi32> to vector<16x128xi32>
    %c0_i32_123 = arith.constant 0 : i32
    %607 = vector.broadcast %c0_i32_123 : i32 to vector<16x128xi32>
    %608 = arith.cmpi sge, %606, %607 : vector<16x128xi32>
    %609 = arith.subi %590, %601 : vector<16x128xi32>
    %610 = arith.select %608, %601, %609 : vector<16x128xi1>, vector<16x128xi32>
    %611 = arith.addi %592, %601 : vector<16x128xi32>
    %612 = arith.select %608, %592, %611 : vector<16x128xi1>, vector<16x128xi32>
    %c0_i32_124 = arith.constant 0 : i32
    %613 = vector.broadcast %c0_i32_124 : i32 to vector<16x1xi32>
    %614 = arith.cmpi sge, %604, %613 : vector<16x1xi32>
    %615 = arith.subi %596, %603 : vector<16x1xi32>
    %616 = arith.select %614, %596, %615 : vector<16x1xi1>, vector<16x1xi32>
    %c1_i32_125 = arith.constant 1 : i32
    %617 = vector.broadcast %c1_i32_125 : i32 to vector<16x128xi32>
    %618 = arith.shrsi %13, %617 : vector<16x128xi32>
    %c1_i32_126 = arith.constant 1 : i32
    %619 = vector.broadcast %c1_i32_126 : i32 to vector<16x128xi32>
    %620 = arith.andi %618, %619 : vector<16x128xi32>
    %621 = arith.andi %610, %620 : vector<16x128xi32>
    %cst_127 = arith.constant dense<0> : vector<16xi32>
    %622 = vector.multi_reduction <add>, %621, %cst_127 [1] : vector<16x128xi32> to vector<16xi32>
    %623 = vector.shape_cast %622 : vector<16xi32> to vector<16x1xi32>
    %624 = arith.subi %623, %616 : vector<16x1xi32>
    %625 = vector.shape_cast %624 : vector<16x1xi32> to vector<16x1xi32>
    %626 = vector.broadcast %625 : vector<16x1xi32> to vector<16x128xi32>
    %c0_i32_128 = arith.constant 0 : i32
    %627 = vector.broadcast %c0_i32_128 : i32 to vector<16x128xi32>
    %628 = arith.cmpi sge, %626, %627 : vector<16x128xi32>
    %629 = arith.subi %610, %621 : vector<16x128xi32>
    %630 = arith.select %628, %621, %629 : vector<16x128xi1>, vector<16x128xi32>
    %631 = arith.addi %612, %621 : vector<16x128xi32>
    %632 = arith.select %628, %612, %631 : vector<16x128xi1>, vector<16x128xi32>
    %c0_i32_129 = arith.constant 0 : i32
    %633 = vector.broadcast %c0_i32_129 : i32 to vector<16x1xi32>
    %634 = arith.cmpi sge, %624, %633 : vector<16x1xi32>
    %635 = arith.subi %616, %623 : vector<16x1xi32>
    %636 = arith.select %634, %616, %635 : vector<16x1xi1>, vector<16x1xi32>
    %c0_i32_130 = arith.constant 0 : i32
    %637 = vector.broadcast %c0_i32_130 : i32 to vector<16x128xi32>
    %638 = arith.shrsi %13, %637 : vector<16x128xi32>
    %c1_i32_131 = arith.constant 1 : i32
    %639 = vector.broadcast %c1_i32_131 : i32 to vector<16x128xi32>
    %640 = arith.andi %638, %639 : vector<16x128xi32>
    %641 = arith.andi %630, %640 : vector<16x128xi32>
    %cst_132 = arith.constant dense<0> : vector<16xi32>
    %642 = vector.multi_reduction <add>, %641, %cst_132 [1] : vector<16x128xi32> to vector<16xi32>
    %643 = vector.shape_cast %642 : vector<16xi32> to vector<16x1xi32>
    %644 = arith.subi %643, %636 : vector<16x1xi32>
    %645 = vector.shape_cast %644 : vector<16x1xi32> to vector<16x1xi32>
    %646 = vector.broadcast %645 : vector<16x1xi32> to vector<16x128xi32>
    %c0_i32_133 = arith.constant 0 : i32
    %647 = vector.broadcast %c0_i32_133 : i32 to vector<16x128xi32>
    %648 = arith.cmpi sge, %646, %647 : vector<16x128xi32>
    %649 = arith.addi %632, %641 : vector<16x128xi32>
    %650 = arith.select %648, %632, %649 : vector<16x128xi1>, vector<16x128xi32>
    %c0_i32_134 = arith.constant 0 : i32
    %651 = vector.broadcast %c0_i32_134 : i32 to vector<16x128xi32>
    %652 = arith.cmpi ne, %650, %651 : vector<16x128xi32>
    %cst_135 = arith.constant 0.000000e+00 : f32
    %653 = vector.broadcast %cst_135 : f32 to vector<16x128xf32>
    %654 = arith.select %652, %1, %653 : vector<16x128xi1>, vector<16x128xf32>
    %c0_136 = arith.constant 0 : index
    %c0_137 = arith.constant 0 : index
    %655 = vector.load %arg3[%c0_136, %c0_137] : memref<16x128xf32, #tpu.memory_space<vmem>>, vector<16x128xf32>
    tpu.vector_store %arg3[%c0_136, %c0_137], %654 {strides = array<i32>} : memref<16x128xf32, #tpu.memory_space<vmem>>, vector<16x128xf32>,
    return
  }
  func.func @transform_0(%arg0: i32) -> (i32, i32) {
    %c0_i32 = arith.constant 0 : i32
    %c0_i32_0 = arith.constant 0 : i32
    return %arg0, %c0_i32 : i32, i32
  }
  func.func @transform_1(%arg0: i32) -> (i32, i32) {
    %c0_i32 = arith.constant 0 : i32
    %c0_i32_0 = arith.constant 0 : i32
    %c0_i32_1 = arith.constant 0 : i32
    return %c0_i32, %c0_i32_0 : i32, i32
  }
  func.func @transform_2(%arg0: i32) -> (i32, i32) {
    %c0_i32 = arith.constant 0 : i32
    %c0_i32_0 = arith.constant 0 : i32
    return %arg0, %c0_i32 : i32, i32
  }
}

</mosaic_0001>

<bundles_post_ra>
// kernel: tpu_custom_call.1
= control target key start
LH: loop header
LB: loop body
LE: loop exit
PB: predicated region body
PF: predicated region fallthrough
CT: control target
= control target key end

     0   :  { %7 = vsyncpa [#allocation3], 0  ;;  %s1729_s0 = inlined_call_operand.hbm [shape: f32[16,128], index: 0, kind: input, shape index: {}]   ;;  %s1730_s1 = inlined_call_operand.vmem [shape: f32[1,128], index: 1, kind: input, shape index: {}]   ;;  %s1731_s2 = inlined_call_operand.hbm [shape: f32[16,128], index: 2, kind: output, shape index: {}]  }
   0x1   :  { %8 = vsyncpa [#allocation4], 0  ;;  %s1589_s9 = smov [#allocation2]   ;;  %s1541_s13 = scalar_lea.hbm %s1729_s0, 256 }
   0x2   :  { %s14_s10 = sshll.u32 %s1589_s9, 4  ;;  %p1542_p0 = scmp.ne.s32.totalorder %s1729_s0, %s1541_s13  ;;  %s15_s10 = int_to_ptr.vmem [resolvable:$true] %s14_s10 }
   0x3   :  { %p1545_p1 = scmp.lt.u32.totalorder %s1541_s13, %s1729_s0 }
   0x5   :  { %p1547_p2 = pnand %p1545_p1, %p1542_p0 }
   0x7   :  { %1550 = shalt.err (!%p1547_p2)
}
   0x8   :  { %s1551_s18 = scalar_lea.vmem %s15_s10, 256  ;;  %p1556_p4 = scmp.lt.s32.totalorder %s15_s10, %s15_s10 }
   0x9   :  { %p1552_p3 = scmp.ne.s32.totalorder %s15_s10, %s1551_s18  ;;  %p1557_p5 = scmp.lt.s32.totalorder %s1551_s18, %s1551_s18 }
   0xb   :  { %p1558_p6 = por %p1557_p5, %p1556_p4 }
   0xd   :  { %p1559_p7 = pnand %p1558_p6, %p1552_p3 }
   0xf   :  { %1562 = shalt.err (!%p1559_p7)
}
  0x10   :  { %s1590_s19 = smov 128   ;;  %s1591_s20 = smov 8  }
  0x11   :  { %20 = dma.hbm_to_vmem [thread:$0]  %s1729_s0, 256, %s15_s10, [#allocation3], %s1590_s19, %s1590_s19, %s1591_s20  }
  0x12   :  { %1585 = dma.done.wait [#allocation3], 256  }
  0x13   :  { %1586 = vsyncadd [#allocation3], 4294967040  ;;  %v1530_v0 = vld [vmem:[%s1730_s1] ss:$0 sm:$0xff]  ;;  %v28_v2 = vld [vmem:[#allocation2 + $0x8] sm:$0xff]  ;;  %s1592_s0 = smov [#allocation5]  }
  0x14   :  { %v27_v1 = vld [vmem:[#allocation2] sm:$0xff]  ;;  %v36_v4 = vmul.f32 %v1530_v0, %v28_v2  ;;  %s1518_s1 = sshll.u32 %s1592_s0, 4  ;;  %s1519_s1 = int_to_ptr.vmem [resolvable:$true] %s1518_s1 }
  0x15   :  { %v35_v3 = vmul.f32 %v1530_v0, %v27_v1  ;;  %s1563_s25 = scalar_lea.vmem %s1519_s1, 256  ;;  %p1568_p9 = scmp.lt.s32.totalorder %s1519_s1, %s1519_s1 }
  0x16   :  { %vm38_vm1 = vcmp.eq.f32.partialorder %v36_v4, 0.0  ;;  %p1564_p8 = scmp.ne.s32.totalorder %s1519_s1, %s1563_s25  ;;  %p1569_p10 = scmp.lt.s32.totalorder %s1563_s25, %s1563_s25 }
  0x17   :  { %vm37_vm0 = vcmp.eq.f32.partialorder %v35_v3, 0.0  ;;  %v40_v6 = vsel %vm38_vm1, 0.0, %v36_v4 }
  0x18   :  { %v39_v5 = vsel %vm37_vm0, 0.0, %v35_v3  ;;  %v44_v8 = vshra.s32 %v40_v6, 31  ;;  %p1570_p11 = por %p1569_p10, %p1568_p9 }
  0x19   :  { %v43_v7 = vshra.s32 %v39_v5, 31 }
  0x1a   :  { %v46_v10 = vor.u32 2147483648, %v44_v8  ;;  %p1571_p12 = pnand %p1570_p11, %p1564_p8 }
  0x1b   :  { %v45_v9 = vor.u32 2147483648, %v43_v7 }
  0x1c   :  { %v1628_v12 = vxor.u32 %v46_v10, %v40_v6 }
  0x1d   :  { %v1626_v11 = vxor.u32 %v45_v9, %v39_v5 }
  0x1e   :  { %v1634_v14 = vshrl.u32 %v1628_v12, 31  ;;  %v92_v39 = vshra.s32 %v1628_v12, 30  ;;  %v138_v6 = vshra.s32 %v1628_v12, 29 }
  0x1f   :  { %v1631_v13 = vshrl.u32 %v1626_v11, 31  ;;  %v91_v27 = vshra.s32 %v1626_v11, 30  ;;  %v137_v61 = vshra.s32 %v1626_v11, 29 }
  0x20   :  { %v66_v17 = vshrl.u32 %v1634_v14, 16  ;;  %v65_v18 = vand.u32 65535, %v1634_v14  ;;  %v82_v43 = vsub.s32 1, %v1634_v14  ;;  %v94_v45 = vand.u32 1, %v92_v39 }
  0x21   :  { %v54_v15 = vshrl.u32 %v1631_v13, 16  ;;  %v53_v16 = vand.u32 65535, %v1631_v13  ;;  %v81_v34 = vsub.s32 1, %v1631_v13  ;;  %v93_v35 = vand.u32 1, %v91_v27 }
  0x22   :  { %v68_v21 = vcvt.s32.f32 %v66_v17  ;;  %v67_v22 = vcvt.s32.f32 %v65_v18  ;;  %v139_v5 = vand.u32 1, %v137_v61 }
  0x23   :  { %v56_v19 = vcvt.s32.f32 %v54_v15  ;;  %v55_v20 = vcvt.s32.f32 %v53_v16 }
  0x25   :  { %59 = vadd.xlane.f32.xlu0 %v56_v19  ;;  %57 = vadd.xlane.f32.xlu1 %v55_v20 }
  0x29   :  { %71 = vadd.xlane.f32.xlu0 %v68_v21  ;;  %69 = vadd.xlane.f32.xlu1 %v67_v22 }
  0xb2   :  { %v60_v23 = vpop.xlane.xlu0 %59  ;;  %v58_v24 = vpop.xlane.xlu1 %57 }
  0xb3   :  { %v62_v25 = vcvt.f32.s32 %v60_v23  ;;  %v61_v26 = vcvt.f32.s32 %v58_v24 }
  0xb5   :  { %v63_v28 = vshll.u32 %v62_v25, 16 }
  0xb6   :  { %v72_v29 = vpop.xlane.xlu0 %71  ;;  %v70_v30 = vpop.xlane.xlu1 %69 }
  0xb7   :  { %v64_v31 = vadd.s32 %v63_v28, %v61_v26  ;;  %v74_v32 = vcvt.f32.s32 %v72_v29  ;;  %v73_v33 = vcvt.f32.s32 %v70_v30 }
  0xb9   :  { %v1533_v36 = vadd.s32 4294967264, %v64_v31  ;;  %v87_v37 = vsub.s32 32, %v64_v31  ;;  %v75_v38 = vshll.u32 %v74_v32, 16 }
  0xbb   :  { %vm79_vm2 = vcmp.ge.s32.totalorder %v1533_v36, 0  ;;  %v76_v40 = vadd.s32 %v75_v38, %v73_v33 }
  0xbc   :  { %v83_v41 = vsel %vm79_vm2, %v1631_v13, %v81_v34  ;;  %v89_v42 = vsel %vm79_vm2, 32, %v87_v37  ;;  %v85_v4 = vsel %vm79_vm2, 0, %v1631_v13  ;;  %v140_v13 = vand.u32 1, %v138_v6 }
  0xbd   :  { %v95_v44 = vand.u32 %v93_v35, %v83_v41  ;;  %v1534_v46 = vadd.s32 4294967264, %v76_v40  ;;  %v88_v47 = vsub.s32 32, %v76_v40 }
  0xbf   :  { %vm80_vm3 = vcmp.ge.s32.totalorder %v1534_v46, 0  ;;  %v98_v48 = vshrl.u32 %v95_v44, 16  ;;  %v97_v53 = vand.u32 65535, %v95_v44  ;;  %v125_v16 = vsub.s32 %v83_v41, %v95_v44 }
  0xc0   :  { %v84_v49 = vsel %vm80_vm3, %v1634_v14, %v82_v43  ;;  %v90_v50 = vsel %vm80_vm3, 32, %v88_v47  ;;  %v129_v17 = vadd.s32 %v95_v44, %v85_v4  ;;  %v86_v19 = vsel %vm80_vm3, 0, %v1634_v14 }
  0xc1   :  { %v96_v51 = vand.u32 %v94_v45, %v84_v49  ;;  %v100_v52 = vcvt.s32.f32 %v98_v48  ;;  %v99_v55 = vcvt.s32.f32 %v97_v53  ;;  %v183_v41 = vshra.s32 %v1626_v11, 28 }
  0xc3   :  { %103 = vadd.xlane.f32.xlu0 %v100_v52  ;;  %v110_v54 = vshrl.u32 %v96_v51, 16  ;;  %v109_v57 = vand.u32 65535, %v96_v51  ;;  %v126_v26 = vsub.s32 %v84_v49, %v96_v51  ;;  %v130_v27 = vadd.s32 %v96_v51, %v86_v19 }
  0xc4   :  { %v185_v48 = vand.u32 1, %v183_v41  ;;  %v184_v49 = vshra.s32 %v1628_v12, 28 }
  0xc5   :  { %v112_v56 = vcvt.s32.f32 %v110_v54  ;;  %v111_v58 = vcvt.s32.f32 %v109_v57 }
  0xc7   :  { %101 = vadd.xlane.f32.xlu0 %v99_v55  ;;  %115 = vadd.xlane.f32.xlu1 %v112_v56 }
  0xcb   :  { %113 = vadd.xlane.f32.xlu1 %v111_v58 }
 0x150   :  { %v104_v59 = vpop.xlane.xlu0 %103 }
 0x151   :  { %v106_v60 = vcvt.f32.s32 %v104_v59 }
 0x153   :  { %v107_v0 = vshll.u32 %v106_v60, 16 }
 0x154   :  { %v102_v62 = vpop.xlane.xlu0 %101  ;;  %v116_v63 = vpop.xlane.xlu1 %115 }
 0x155   :  { %v105_v1 = vcvt.f32.s32 %v102_v62  ;;  %v118_v2 = vcvt.f32.s32 %v116_v63  ;;  %v186_v62 = vand.u32 1, %v184_v49 }
 0x157   :  { %v108_v3 = vadd.s32 %v107_v0, %v105_v1  ;;  %v119_v10 = vshll.u32 %v118_v2, 16 }
 0x158   :  { %v114_v7 = vpop.xlane.xlu1 %113 }
 0x159   :  { %v121_v8 = vsub.s32 %v108_v3, %v89_v42  ;;  %v133_v9 = vsub.s32 %v89_v42, %v108_v3  ;;  %v117_v15 = vcvt.f32.s32 %v114_v7 }
 0x15b   :  { %vm123_vm4 = vcmp.ge.s32.totalorder %v121_v8, 0  ;;  %v120_v18 = vadd.s32 %v119_v10, %v117_v15 }
 0x15c   :  { %v127_v20 = vsel %vm123_vm4, %v95_v44, %v125_v16  ;;  %v131_v21 = vsel %vm123_vm4, %v85_v4, %v129_v17  ;;  %v135_v22 = vsel %vm123_vm4, %v89_v42, %v133_v9 }
 0x15d   :  { %v141_v23 = vand.u32 %v139_v5, %v127_v20  ;;  %v122_v24 = vsub.s32 %v120_v18, %v90_v50  ;;  %v134_v25 = vsub.s32 %v90_v50, %v120_v18 }
 0x15f   :  { %vm124_vm5 = vcmp.ge.s32.totalorder %v122_v24, 0  ;;  %v144_v28 = vshrl.u32 %v141_v23, 16  ;;  %v143_v34 = vand.u32 65535, %v141_v23  ;;  %v171_v55 = vsub.s32 %v127_v20, %v141_v23 }
 0x160   :  { %v128_v29 = vsel %vm124_vm5, %v96_v51, %v126_v26  ;;  %v132_v30 = vsel %vm124_vm5, %v86_v19, %v130_v27  ;;  %v136_v31 = vsel %vm124_vm5, %v90_v50, %v134_v25  ;;  %v175_v56 = vadd.s32 %v141_v23, %v131_v21 }
 0x161   :  { %v142_v32 = vand.u32 %v140_v13, %v128_v29  ;;  %v146_v33 = vcvt.s32.f32 %v144_v28  ;;  %v145_v14 = vcvt.s32.f32 %v143_v34  ;;  %v230_v28 = vshra.s32 %v1628_v12, 27 }
 0x163   :  { %149 = vadd.xlane.f32.xlu0 %v146_v33  ;;  %v156_v35 = vshrl.u32 %v142_v32, 16  ;;  %v155_v37 = vand.u32 65535, %v142_v32  ;;  %v172_v1 = vsub.s32 %v128_v29, %v142_v32  ;;  %v176_v2 = vadd.s32 %v142_v32, %v132_v30 }
 0x165   :  { %v158_v36 = vcvt.s32.f32 %v156_v35  ;;  %v157_v38 = vcvt.s32.f32 %v155_v37 }
 0x167   :  { %147 = vadd.xlane.f32.xlu0 %v145_v14  ;;  %161 = vadd.xlane.f32.xlu1 %v158_v36 }
 0x16b   :  { %159 = vadd.xlane.f32.xlu1 %v157_v38 }
 0x1f0   :  { %v150_v39 = vpop.xlane.xlu0 %149 }
 0x1f1   :  { %v152_v40 = vcvt.f32.s32 %v150_v39 }
 0x1f3   :  { %v153_v44 = vshll.u32 %v152_v40, 16  ;;  %v232_v40 = vand.u32 1, %v230_v28 }
 0x1f4   :  { %v148_v42 = vpop.xlane.xlu0 %147  ;;  %v162_v43 = vpop.xlane.xlu1 %161 }
 0x1f5   :  { %v151_v45 = vcvt.f32.s32 %v148_v42  ;;  %v164_v46 = vcvt.f32.s32 %v162_v43 }
 0x1f7   :  { %v154_v47 = vadd.s32 %v153_v44, %v151_v45  ;;  %v165_v53 = vshll.u32 %v164_v46, 16 }
 0x1f8   :  { %v160_v50 = vpop.xlane.xlu1 %159 }
 0x1f9   :  { %v167_v51 = vsub.s32 %v154_v47, %v135_v22  ;;  %v179_v52 = vsub.s32 %v135_v22, %v154_v47  ;;  %v163_v54 = vcvt.f32.s32 %v160_v50 }
 0x1fb   :  { %vm169_vm6 = vcmp.ge.s32.totalorder %v167_v51, 0  ;;  %v166_v57 = vadd.s32 %v165_v53, %v163_v54 }
 0x1fc   :  { %v173_v58 = vsel %vm169_vm6, %v141_v23, %v171_v55  ;;  %v177_v59 = vsel %vm169_vm6, %v131_v21, %v175_v56  ;;  %v181_v60 = vsel %vm169_vm6, %v135_v22, %v179_v52  ;;  %v229_v21 = vshra.s32 %v1626_v11, 27 }
 0x1fd   :  { %v187_v61 = vand.u32 %v185_v48, %v173_v58  ;;  %v168_v63 = vsub.s32 %v166_v57, %v136_v31  ;;  %v180_v0 = vsub.s32 %v136_v31, %v166_v57 }
 0x1fe   :  { %v231_v27 = vand.u32 1, %v229_v21 }
 0x1ff   :  { %vm170_vm7 = vcmp.ge.s32.totalorder %v168_v63, 0  ;;  %v190_v3 = vshrl.u32 %v187_v61, 16  ;;  %v189_v9 = vand.u32 65535, %v187_v61  ;;  %v217_v34 = vsub.s32 %v173_v58, %v187_v61 }
 0x200   :  { %v174_v4 = vsel %vm170_vm7, %v142_v32, %v172_v1  ;;  %v178_v5 = vsel %vm170_vm7, %v132_v30, %v176_v2  ;;  %v182_v6 = vsel %vm170_vm7, %v136_v31, %v180_v0  ;;  %v221_v35 = vadd.s32 %v187_v61, %v177_v59 }
 0x201   :  { %v188_v7 = vand.u32 %v186_v62, %v174_v4  ;;  %v192_v8 = vcvt.s32.f32 %v190_v3  ;;  %v191_v15 = vcvt.s32.f32 %v189_v9  ;;  %v276_v3 = vshra.s32 %v1628_v12, 26 }
 0x203   :  { %195 = vadd.xlane.f32.xlu0 %v192_v8  ;;  %v202_v10 = vshrl.u32 %v188_v7, 16  ;;  %v201_v17 = vand.u32 65535, %v188_v7  ;;  %v218_v43 = vsub.s32 %v174_v4, %v188_v7  ;;  %v222_v44 = vadd.s32 %v188_v7, %v178_v5 }
 0x205   :  { %v204_v16 = vcvt.s32.f32 %v202_v10  ;;  %v203_v18 = vcvt.s32.f32 %v201_v17 }
 0x207   :  { %193 = vadd.xlane.f32.xlu0 %v191_v15  ;;  %207 = vadd.xlane.f32.xlu1 %v204_v16 }
 0x20b   :  { %205 = vadd.xlane.f32.xlu1 %v203_v18 }
 0x290   :  { %v196_v19 = vpop.xlane.xlu0 %195 }
 0x291   :  { %v198_v20 = vcvt.f32.s32 %v196_v19 }
 0x293   :  { %v199_v13 = vshll.u32 %v198_v20, 16  ;;  %v278_v20 = vand.u32 1, %v276_v3 }
 0x294   :  { %v194_v22 = vpop.xlane.xlu0 %193  ;;  %v208_v23 = vpop.xlane.xlu1 %207 }
 0x295   :  { %v197_v24 = vcvt.f32.s32 %v194_v22  ;;  %v210_v25 = vcvt.f32.s32 %v208_v23 }
 0x297   :  { %v200_v26 = vadd.s32 %v199_v13, %v197_v24  ;;  %v211_v32 = vshll.u32 %v210_v25, 16 }
 0x298   :  { %v206_v29 = vpop.xlane.xlu1 %205 }
 0x299   :  { %v213_v30 = vsub.s32 %v200_v26, %v181_v60  ;;  %v225_v31 = vsub.s32 %v181_v60, %v200_v26  ;;  %v209_v33 = vcvt.f32.s32 %v206_v29 }
 0x29b   :  { %vm215_vm8 = vcmp.ge.s32.totalorder %v213_v30, 0  ;;  %v212_v14 = vadd.s32 %v211_v32, %v209_v33 }
 0x29c   :  { %v219_v36 = vsel %vm215_vm8, %v187_v61, %v217_v34  ;;  %v223_v37 = vsel %vm215_vm8, %v177_v59, %v221_v35  ;;  %v227_v38 = vsel %vm215_vm8, %v181_v60, %v225_v31  ;;  %v275_v59 = vshra.s32 %v1626_v11, 26 }
 0x29d   :  { %v233_v39 = vand.u32 %v231_v27, %v219_v36  ;;  %v214_v41 = vsub.s32 %v212_v14, %v182_v6  ;;  %v226_v42 = vsub.s32 %v182_v6, %v212_v14 }
 0x29e   :  { %v277_v2 = vand.u32 1, %v275_v59 }
 0x29f   :  { %vm216_vm9 = vcmp.ge.s32.totalorder %v214_v41, 0  ;;  %v236_v45 = vshrl.u32 %v233_v39, 16  ;;  %v235_v51 = vand.u32 65535, %v233_v39  ;;  %v263_v9 = vsub.s32 %v219_v36, %v233_v39 }
 0x2a0   :  { %v220_v46 = vsel %vm216_vm9, %v188_v7, %v218_v43  ;;  %v224_v47 = vsel %vm216_vm9, %v178_v5, %v222_v44  ;;  %v228_v48 = vsel %vm216_vm9, %v182_v6, %v226_v42  ;;  %v267_v10 = vadd.s32 %v233_v39, %v223_v37 }
 0x2a1   :  { %v234_v49 = vand.u32 %v232_v40, %v220_v46  ;;  %v238_v50 = vcvt.s32.f32 %v236_v45  ;;  %v237_v53 = vcvt.s32.f32 %v235_v51  ;;  %v322_v45 = vshra.s32 %v1628_v12, 25 }
 0x2a3   :  { %241 = vadd.xlane.f32.xlu0 %v238_v50  ;;  %v248_v52 = vshrl.u32 %v234_v49, 16  ;;  %v247_v55 = vand.u32 65535, %v234_v49  ;;  %v264_v23 = vsub.s32 %v220_v46, %v234_v49  ;;  %v268_v13 = vadd.s32 %v234_v49, %v224_v47 }
 0x2a5   :  { %v250_v54 = vcvt.s32.f32 %v248_v52  ;;  %v249_v56 = vcvt.s32.f32 %v247_v55 }
 0x2a7   :  { %239 = vadd.xlane.f32.xlu0 %v237_v53  ;;  %253 = vadd.xlane.f32.xlu1 %v250_v54 }
 0x2ab   :  { %251 = vadd.xlane.f32.xlu1 %v249_v56 }
 0x330   :  { %v242_v57 = vpop.xlane.xlu0 %241 }
 0x331   :  { %v244_v58 = vcvt.f32.s32 %v242_v57 }
 0x333   :  { %v245_v62 = vshll.u32 %v244_v58, 16  ;;  %v324_v58 = vand.u32 1, %v322_v45 }
 0x334   :  { %v240_v60 = vpop.xlane.xlu0 %239  ;;  %v254_v61 = vpop.xlane.xlu1 %253 }
 0x335   :  { %v243_v63 = vcvt.f32.s32 %v240_v60  ;;  %v256_v0 = vcvt.f32.s32 %v254_v61 }
 0x337   :  { %v246_v1 = vadd.s32 %v245_v62, %v243_v63  ;;  %v257_v7 = vshll.u32 %v256_v0, 16 }
 0x338   :  { %v252_v4 = vpop.xlane.xlu1 %251 }
 0x339   :  { %v259_v5 = vsub.s32 %v246_v1, %v227_v38  ;;  %v271_v6 = vsub.s32 %v227_v38, %v246_v1  ;;  %v255_v8 = vcvt.f32.s32 %v252_v4 }
 0x33b   :  { %vm261_vm10 = vcmp.ge.s32.totalorder %v259_v5, 0  ;;  %v258_v15 = vadd.s32 %v257_v7, %v255_v8 }
 0x33c   :  { %v265_v16 = vsel %vm261_vm10, %v233_v39, %v263_v9  ;;  %v269_v17 = vsel %vm261_vm10, %v223_v37, %v267_v10  ;;  %v273_v18 = vsel %vm261_vm10, %v227_v38, %v271_v6  ;;  %v321_v37 = vshra.s32 %v1626_v11, 25 }
 0x33d   :  { %v279_v19 = vand.u32 %v277_v2, %v265_v16  ;;  %v260_v21 = vsub.s32 %v258_v15, %v228_v48  ;;  %v272_v22 = vsub.s32 %v228_v48, %v258_v15 }
 0x33e   :  { %v323_v44 = vand.u32 1, %v321_v37 }
 0x33f   :  { %vm262_vm11 = vcmp.ge.s32.totalorder %v260_v21, 0  ;;  %v282_v24 = vshrl.u32 %v279_v19, 16  ;;  %v281_v30 = vand.u32 65535, %v279_v19  ;;  %v309_v51 = vsub.s32 %v265_v16, %v279_v19 }
 0x340   :  { %v266_v25 = vsel %vm262_vm11, %v234_v49, %v264_v23  ;;  %v270_v26 = vsel %vm262_vm11, %v224_v47, %v268_v13  ;;  %v274_v27 = vsel %vm262_vm11, %v228_v48, %v272_v22  ;;  %v313_v52 = vadd.s32 %v279_v19, %v269_v17 }
 0x341   :  { %v280_v28 = vand.u32 %v278_v20, %v266_v25  ;;  %v284_v29 = vcvt.s32.f32 %v282_v24  ;;  %v283_v32 = vcvt.s32.f32 %v281_v30  ;;  %v368_v24 = vshra.s32 %v1628_v12, 24 }
 0x343   :  { %287 = vadd.xlane.f32.xlu0 %v284_v29  ;;  %v294_v31 = vshrl.u32 %v280_v28, 16  ;;  %v293_v34 = vand.u32 65535, %v280_v28  ;;  %v310_v61 = vsub.s32 %v266_v25, %v280_v28  ;;  %v314_v62 = vadd.s32 %v280_v28, %v270_v26 }
 0x345   :  { %v296_v33 = vcvt.s32.f32 %v294_v31  ;;  %v295_v35 = vcvt.s32.f32 %v293_v34 }
 0x347   :  { %285 = vadd.xlane.f32.xlu0 %v283_v32  ;;  %299 = vadd.xlane.f32.xlu1 %v296_v33 }
 0x34b   :  { %297 = vadd.xlane.f32.xlu1 %v295_v35 }
 0x3d0   :  { %v288_v14 = vpop.xlane.xlu0 %287 }
 0x3d1   :  { %v290_v36 = vcvt.f32.s32 %v288_v14 }
 0x3d3   :  { %v291_v40 = vshll.u32 %v290_v36, 16  ;;  %v370_v36 = vand.u32 1, %v368_v24 }
 0x3d4   :  { %v286_v38 = vpop.xlane.xlu0 %285  ;;  %v300_v39 = vpop.xlane.xlu1 %299 }
 0x3d5   :  { %v289_v41 = vcvt.f32.s32 %v286_v38  ;;  %v302_v42 = vcvt.f32.s32 %v300_v39 }
 0x3d7   :  { %v292_v43 = vadd.s32 %v291_v40, %v289_v41  ;;  %v303_v49 = vshll.u32 %v302_v42, 16 }
 0x3d8   :  { %v298_v46 = vpop.xlane.xlu1 %297 }
 0x3d9   :  { %v305_v47 = vsub.s32 %v292_v43, %v273_v18  ;;  %v317_v48 = vsub.s32 %v273_v18, %v292_v43  ;;  %v301_v50 = vcvt.f32.s32 %v298_v46 }
 0x3db   :  { %vm307_vm12 = vcmp.ge.s32.totalorder %v305_v47, 0  ;;  %v304_v53 = vadd.s32 %v303_v49, %v301_v50 }
 0x3dc   :  { %v311_v54 = vsel %vm307_vm12, %v279_v19, %v309_v51  ;;  %v315_v55 = vsel %vm307_vm12, %v269_v17, %v313_v52  ;;  %v319_v56 = vsel %vm307_vm12, %v273_v18, %v317_v48  ;;  %v367_v17 = vshra.s32 %v1626_v11, 24 }
 0x3dd   :  { %v325_v57 = vand.u32 %v323_v44, %v311_v54  ;;  %v306_v59 = vsub.s32 %v304_v53, %v274_v27  ;;  %v318_v60 = vsub.s32 %v274_v27, %v304_v53 }
 0x3de   :  { %v369_v13 = vand.u32 1, %v367_v17 }
 0x3df   :  { %vm308_vm13 = vcmp.ge.s32.totalorder %v306_v59, 0  ;;  %v328_v63 = vshrl.u32 %v325_v57, 16  ;;  %v327_v5 = vand.u32 65535, %v325_v57  ;;  %v355_v30 = vsub.s32 %v311_v54, %v325_v57 }
 0x3e0   :  { %v312_v0 = vsel %vm308_vm13, %v280_v28, %v310_v61  ;;  %v316_v1 = vsel %vm308_vm13, %v270_v26, %v314_v62  ;;  %v320_v2 = vsel %vm308_vm13, %v274_v27, %v318_v60  ;;  %v359_v31 = vadd.s32 %v325_v57, %v315_v55 }
 0x3e1   :  { %v326_v3 = vand.u32 %v324_v58, %v312_v0  ;;  %v330_v4 = vcvt.s32.f32 %v328_v63  ;;  %v329_v7 = vcvt.s32.f32 %v327_v5  ;;  %v414_v63 = vshra.s32 %v1628_v12, 23 }
 0x3e3   :  { %333 = vadd.xlane.f32.xlu0 %v330_v4  ;;  %v340_v6 = vshrl.u32 %v326_v3, 16  ;;  %v339_v9 = vand.u32 65535, %v326_v3  ;;  %v356_v39 = vsub.s32 %v312_v0, %v326_v3  ;;  %v360_v40 = vadd.s32 %v326_v3, %v316_v1 }
 0x3e5   :  { %v342_v8 = vcvt.s32.f32 %v340_v6  ;;  %v341_v10 = vcvt.s32.f32 %v339_v9 }
 0x3e7   :  { %331 = vadd.xlane.f32.xlu0 %v329_v7  ;;  %345 = vadd.xlane.f32.xlu1 %v342_v8 }
 0x3eb   :  { %343 = vadd.xlane.f32.xlu1 %v341_v10 }
 0x470   :  { %v334_v15 = vpop.xlane.xlu0 %333 }
 0x471   :  { %v336_v16 = vcvt.f32.s32 %v334_v15 }
 0x473   :  { %v337_v20 = vshll.u32 %v336_v16, 16  ;;  %v416_v16 = vand.u32 1, %v414_v63 }
 0x474   :  { %v332_v18 = vpop.xlane.xlu0 %331  ;;  %v346_v19 = vpop.xlane.xlu1 %345 }
 0x475   :  { %v335_v21 = vcvt.f32.s32 %v332_v18  ;;  %v348_v22 = vcvt.f32.s32 %v346_v19 }
 0x477   :  { %v338_v23 = vadd.s32 %v337_v20, %v335_v21  ;;  %v349_v28 = vshll.u32 %v348_v22, 16 }
 0x478   :  { %v344_v25 = vpop.xlane.xlu1 %343 }
 0x479   :  { %v351_v26 = vsub.s32 %v338_v23, %v319_v56  ;;  %v363_v27 = vsub.s32 %v319_v56, %v338_v23  ;;  %v347_v29 = vcvt.f32.s32 %v344_v25 }
 0x47b   :  { %vm353_vm14 = vcmp.ge.s32.totalorder %v351_v26, 0  ;;  %v350_v32 = vadd.s32 %v349_v28, %v347_v29 }
 0x47c   :  { %v357_v33 = vsel %vm353_vm14, %v325_v57, %v355_v30  ;;  %v361_v34 = vsel %vm353_vm14, %v315_v55, %v359_v31  ;;  %v365_v35 = vsel %vm353_vm14, %v319_v56, %v363_v27  ;;  %v413_v55 = vshra.s32 %v1626_v11, 23 }
 0x47d   :  { %v371_v14 = vand.u32 %v369_v13, %v357_v33  ;;  %v352_v37 = vsub.s32 %v350_v32, %v320_v2  ;;  %v364_v38 = vsub.s32 %v320_v2, %v350_v32 }
 0x47e   :  { %v415_v62 = vand.u32 1, %v413_v55 }
 0x47f   :  { %vm354_vm15 = vcmp.ge.s32.totalorder %v352_v37, 0  ;;  %v374_v41 = vshrl.u32 %v371_v14, 16  ;;  %v373_v47 = vand.u32 65535, %v371_v14  ;;  %v401_v5 = vsub.s32 %v357_v33, %v371_v14 }
 0x480   :  { %v358_v42 = vsel %vm354_vm15, %v326_v3, %v356_v39  ;;  %v362_v43 = vsel %vm354_vm15, %v316_v1, %v360_v40  ;;  %v366_v44 = vsel %vm354_vm15, %v320_v2, %v364_v38  ;;  %v405_v6 = vadd.s32 %v371_v14, %v361_v34 }
 0x481   :  { %v372_v45 = vand.u32 %v370_v36, %v358_v42  ;;  %v376_v46 = vcvt.s32.f32 %v374_v41  ;;  %v375_v49 = vcvt.s32.f32 %v373_v47  ;;  %v460_v41 = vshra.s32 %v1628_v12, 22 }
 0x483   :  { %379 = vadd.xlane.f32.xlu0 %v376_v46  ;;  %v386_v48 = vshrl.u32 %v372_v45, 16  ;;  %v385_v51 = vand.u32 65535, %v372_v45  ;;  %v402_v19 = vsub.s32 %v358_v42, %v372_v45  ;;  %v406_v20 = vadd.s32 %v372_v45, %v362_v43 }
 0x485   :  { %v388_v50 = vcvt.s32.f32 %v386_v48  ;;  %v387_v52 = vcvt.s32.f32 %v385_v51 }
 0x487   :  { %377 = vadd.xlane.f32.xlu0 %v375_v49  ;;  %391 = vadd.xlane.f32.xlu1 %v388_v50 }
 0x48b   :  { %389 = vadd.xlane.f32.xlu1 %v387_v52 }
 0x510   :  { %v380_v53 = vpop.xlane.xlu0 %379 }
 0x511   :  { %v382_v54 = vcvt.f32.s32 %v380_v53 }
 0x513   :  { %v383_v58 = vshll.u32 %v382_v54, 16  ;;  %v462_v54 = vand.u32 1, %v460_v41 }
 0x514   :  { %v378_v56 = vpop.xlane.xlu0 %377  ;;  %v392_v57 = vpop.xlane.xlu1 %391 }
 0x515   :  { %v381_v59 = vcvt.f32.s32 %v378_v56  ;;  %v394_v60 = vcvt.f32.s32 %v392_v57 }
 0x517   :  { %v384_v61 = vadd.s32 %v383_v58, %v381_v59  ;;  %v395_v3 = vshll.u32 %v394_v60, 16 }
 0x518   :  { %v390_v0 = vpop.xlane.xlu1 %389 }
 0x519   :  { %v397_v1 = vsub.s32 %v384_v61, %v365_v35  ;;  %v409_v2 = vsub.s32 %v365_v35, %v384_v61  ;;  %v393_v4 = vcvt.f32.s32 %v390_v0 }
 0x51b   :  { %vm399_vm0 = vcmp.ge.s32.totalorder %v397_v1, 0  ;;  %v396_v7 = vadd.s32 %v395_v3, %v393_v4 }
 0x51c   :  { %v403_v8 = vsel %vm399_vm0, %v371_v14, %v401_v5  ;;  %v407_v9 = vsel %vm399_vm0, %v361_v34, %v405_v6  ;;  %v411_v10 = vsel %vm399_vm0, %v365_v35, %v409_v2  ;;  %v459_v34 = vshra.s32 %v1626_v11, 22 }
 0x51d   :  { %v417_v15 = vand.u32 %v415_v62, %v403_v8  ;;  %v398_v17 = vsub.s32 %v396_v7, %v366_v44  ;;  %v410_v18 = vsub.s32 %v366_v44, %v396_v7 }
 0x51e   :  { %v461_v40 = vand.u32 1, %v459_v34 }
 0x51f   :  { %vm400_vm1 = vcmp.ge.s32.totalorder %v398_v17, 0  ;;  %v420_v21 = vshrl.u32 %v417_v15, 16  ;;  %v419_v26 = vand.u32 65535, %v417_v15  ;;  %v447_v47 = vsub.s32 %v403_v8, %v417_v15 }
 0x520   :  { %v404_v22 = vsel %vm400_vm1, %v372_v45, %v402_v19  ;;  %v408_v23 = vsel %vm400_vm1, %v362_v43, %v406_v20  ;;  %v412_v13 = vsel %vm400_vm1, %v366_v44, %v410_v18  ;;  %v451_v48 = vadd.s32 %v417_v15, %v407_v9 }
 0x521   :  { %v418_v24 = vand.u32 %v416_v16, %v404_v22  ;;  %v422_v25 = vcvt.s32.f32 %v420_v21  ;;  %v421_v28 = vcvt.s32.f32 %v419_v26  ;;  %v506_v21 = vshra.s32 %v1628_v12, 21 }
 0x523   :  { %425 = vadd.xlane.f32.xlu0 %v422_v25  ;;  %v432_v27 = vshrl.u32 %v418_v24, 16  ;;  %v431_v30 = vand.u32 65535, %v418_v24  ;;  %v448_v57 = vsub.s32 %v404_v22, %v418_v24  ;;  %v452_v58 = vadd.s32 %v418_v24, %v408_v23 }
 0x525   :  { %v434_v29 = vcvt.s32.f32 %v432_v27  ;;  %v433_v31 = vcvt.s32.f32 %v431_v30 }
 0x527   :  { %423 = vadd.xlane.f32.xlu0 %v421_v28  ;;  %437 = vadd.xlane.f32.xlu1 %v434_v29 }
 0x52b   :  { %435 = vadd.xlane.f32.xlu1 %v433_v31 }
 0x5b0   :  { %v426_v32 = vpop.xlane.xlu0 %425 }
 0x5b1   :  { %v428_v33 = vcvt.f32.s32 %v426_v32 }
 0x5b3   :  { %v429_v36 = vshll.u32 %v428_v33, 16  ;;  %v508_v33 = vand.u32 1, %v506_v21 }
 0x5b4   :  { %v424_v35 = vpop.xlane.xlu0 %423  ;;  %v438_v14 = vpop.xlane.xlu1 %437 }
 0x5b5   :  { %v427_v37 = vcvt.f32.s32 %v424_v35  ;;  %v440_v38 = vcvt.f32.s32 %v438_v14 }
 0x5b7   :  { %v430_v39 = vadd.s32 %v429_v36, %v427_v37  ;;  %v441_v45 = vshll.u32 %v440_v38, 16 }
 0x5b8   :  { %v436_v42 = vpop.xlane.xlu1 %435 }
 0x5b9   :  { %v443_v43 = vsub.s32 %v430_v39, %v411_v10  ;;  %v455_v44 = vsub.s32 %v411_v10, %v430_v39  ;;  %v439_v46 = vcvt.f32.s32 %v436_v42 }
 0x5bb   :  { %vm445_vm2 = vcmp.ge.s32.totalorder %v443_v43, 0  ;;  %v442_v49 = vadd.s32 %v441_v45, %v439_v46 }
 0x5bc   :  { %v449_v50 = vsel %vm445_vm2, %v417_v15, %v447_v47  ;;  %v453_v51 = vsel %vm445_vm2, %v407_v9, %v451_v48  ;;  %v457_v52 = vsel %vm445_vm2, %v411_v10, %v455_v44  ;;  %v505_v9 = vshra.s32 %v1626_v11, 21 }
 0x5bd   :  { %v463_v53 = vand.u32 %v461_v40, %v449_v50  ;;  %v444_v55 = vsub.s32 %v442_v49, %v412_v13  ;;  %v456_v56 = vsub.s32 %v412_v13, %v442_v49 }
 0x5be   :  { %v507_v20 = vand.u32 1, %v505_v9 }
 0x5bf   :  { %vm446_vm3 = vcmp.ge.s32.totalorder %v444_v55, 0  ;;  %v466_v59 = vshrl.u32 %v463_v53, 16  ;;  %v465_v1 = vand.u32 65535, %v463_v53  ;;  %v493_v26 = vsub.s32 %v449_v50, %v463_v53 }
 0x5c0   :  { %v450_v60 = vsel %vm446_vm3, %v418_v24, %v448_v57  ;;  %v454_v61 = vsel %vm446_vm3, %v408_v23, %v452_v58  ;;  %v458_v62 = vsel %vm446_vm3, %v412_v13, %v456_v56  ;;  %v497_v27 = vadd.s32 %v463_v53, %v453_v51 }
 0x5c1   :  { %v464_v63 = vand.u32 %v462_v54, %v450_v60  ;;  %v468_v0 = vcvt.s32.f32 %v466_v59  ;;  %v467_v3 = vcvt.s32.f32 %v465_v1  ;;  %v552_v59 = vshra.s32 %v1628_v12, 20 }
 0x5c3   :  { %471 = vadd.xlane.f32.xlu0 %v468_v0  ;;  %v478_v2 = vshrl.u32 %v464_v63, 16  ;;  %v477_v5 = vand.u32 65535, %v464_v63  ;;  %v494_v14 = vsub.s32 %v450_v60, %v464_v63  ;;  %v498_v36 = vadd.s32 %v464_v63, %v454_v61 }
 0x5c5   :  { %v480_v4 = vcvt.s32.f32 %v478_v2  ;;  %v479_v6 = vcvt.s32.f32 %v477_v5 }
 0x5c7   :  { %469 = vadd.xlane.f32.xlu0 %v467_v3  ;;  %483 = vadd.xlane.f32.xlu1 %v480_v4 }
 0x5cb   :  { %481 = vadd.xlane.f32.xlu1 %v479_v6 }
 0x650   :  { %v472_v7 = vpop.xlane.xlu0 %471 }
 0x651   :  { %v474_v8 = vcvt.f32.s32 %v472_v7 }
 0x653   :  { %v475_v16 = vshll.u32 %v474_v8, 16  ;;  %v554_v8 = vand.u32 1, %v552_v59 }
 0x654   :  { %v470_v10 = vpop.xlane.xlu0 %469  ;;  %v484_v15 = vpop.xlane.xlu1 %483 }
 0x655   :  { %v473_v17 = vcvt.f32.s32 %v470_v10  ;;  %v486_v18 = vcvt.f32.s32 %v484_v15 }
 0x657   :  { %v476_v19 = vadd.s32 %v475_v16, %v473_v17  ;;  %v487_v24 = vshll.u32 %v486_v18, 16 }
 0x658   :  { %v482_v22 = vpop.xlane.xlu1 %481 }
 0x659   :  { %v489_v23 = vsub.s32 %v476_v19, %v457_v52  ;;  %v501_v13 = vsub.s32 %v457_v52, %v476_v19  ;;  %v485_v25 = vcvt.f32.s32 %v482_v22 }
 0x65b   :  { %vm491_vm4 = vcmp.ge.s32.totalorder %v489_v23, 0  ;;  %v488_v28 = vadd.s32 %v487_v24, %v485_v25 }
 0x65c   :  { %v495_v29 = vsel %vm491_vm4, %v463_v53, %v493_v26  ;;  %v499_v30 = vsel %vm491_vm4, %v453_v51, %v497_v27  ;;  %v503_v31 = vsel %vm491_vm4, %v457_v52, %v501_v13  ;;  %v551_v51 = vshra.s32 %v1626_v11, 20 }
 0x65d   :  { %v509_v32 = vand.u32 %v507_v20, %v495_v29  ;;  %v490_v34 = vsub.s32 %v488_v28, %v458_v62  ;;  %v502_v35 = vsub.s32 %v458_v62, %v488_v28 }
 0x65e   :  { %v553_v58 = vand.u32 1, %v551_v51 }
 0x65f   :  { %vm492_vm5 = vcmp.ge.s32.totalorder %v490_v34, 0  ;;  %v512_v37 = vshrl.u32 %v509_v32, 16  ;;  %v511_v43 = vand.u32 65535, %v509_v32  ;;  %v539_v1 = vsub.s32 %v495_v29, %v509_v32 }
 0x660   :  { %v496_v38 = vsel %vm492_vm5, %v464_v63, %v494_v14  ;;  %v500_v39 = vsel %vm492_vm5, %v454_v61, %v498_v36  ;;  %v504_v40 = vsel %vm492_vm5, %v458_v62, %v502_v35  ;;  %v543_v2 = vadd.s32 %v509_v32, %v499_v30 }
 0x661   :  { %v510_v41 = vand.u32 %v508_v33, %v496_v38  ;;  %v514_v42 = vcvt.s32.f32 %v512_v37  ;;  %v513_v45 = vcvt.s32.f32 %v511_v43  ;;  %v598_v37 = vshra.s32 %v1628_v12, 19 }
 0x663   :  { %517 = vadd.xlane.f32.xlu0 %v514_v42  ;;  %v524_v44 = vshrl.u32 %v510_v41, 16  ;;  %v523_v47 = vand.u32 65535, %v510_v41  ;;  %v540_v15 = vsub.s32 %v496_v38, %v510_v41  ;;  %v544_v16 = vadd.s32 %v510_v41, %v500_v39 }
 0x665   :  { %v526_v46 = vcvt.s32.f32 %v524_v44  ;;  %v525_v48 = vcvt.s32.f32 %v523_v47 }
 0x667   :  { %515 = vadd.xlane.f32.xlu0 %v513_v45  ;;  %529 = vadd.xlane.f32.xlu1 %v526_v46 }
 0x66b   :  { %527 = vadd.xlane.f32.xlu1 %v525_v48 }
 0x6f0   :  { %v518_v49 = vpop.xlane.xlu0 %517 }
 0x6f1   :  { %v520_v50 = vcvt.f32.s32 %v518_v49 }
 0x6f3   :  { %v521_v54 = vshll.u32 %v520_v50, 16  ;;  %v600_v50 = vand.u32 1, %v598_v37 }
 0x6f4   :  { %v516_v52 = vpop.xlane.xlu0 %515  ;;  %v530_v53 = vpop.xlane.xlu1 %529 }
 0x6f5   :  { %v519_v55 = vcvt.f32.s32 %v516_v52  ;;  %v532_v56 = vcvt.f32.s32 %v530_v53 }
 0x6f7   :  { %v522_v57 = vadd.s32 %v521_v54, %v519_v55  ;;  %v533_v63 = vshll.u32 %v532_v56, 16 }
 0x6f8   :  { %v528_v60 = vpop.xlane.xlu1 %527 }
 0x6f9   :  { %v535_v61 = vsub.s32 %v522_v57, %v503_v31  ;;  %v547_v62 = vsub.s32 %v503_v31, %v522_v57  ;;  %v531_v0 = vcvt.f32.s32 %v528_v60 }
 0x6fb   :  { %vm537_vm6 = vcmp.ge.s32.totalorder %v535_v61, 0  ;;  %v534_v3 = vadd.s32 %v533_v63, %v531_v0 }
 0x6fc   :  { %v541_v4 = vsel %vm537_vm6, %v509_v32, %v539_v1  ;;  %v545_v5 = vsel %vm537_vm6, %v499_v30, %v543_v2  ;;  %v549_v6 = vsel %vm537_vm6, %v503_v31, %v547_v62  ;;  %v597_v30 = vshra.s32 %v1626_v11, 19 }
 0x6fd   :  { %v555_v7 = vand.u32 %v553_v58, %v541_v4  ;;  %v536_v9 = vsub.s32 %v534_v3, %v504_v40  ;;  %v548_v10 = vsub.s32 %v504_v40, %v534_v3 }
 0x6fe   :  { %v599_v36 = vand.u32 1, %v597_v30 }
 0x6ff   :  { %vm538_vm7 = vcmp.ge.s32.totalorder %v536_v9, 0  ;;  %v558_v17 = vshrl.u32 %v555_v7, 16  ;;  %v557_v23 = vand.u32 65535, %v555_v7  ;;  %v585_v43 = vsub.s32 %v541_v4, %v555_v7 }
 0x700   :  { %v542_v18 = vsel %vm538_vm7, %v510_v41, %v540_v15  ;;  %v546_v19 = vsel %vm538_vm7, %v500_v39, %v544_v16  ;;  %v550_v20 = vsel %vm538_vm7, %v504_v40, %v548_v10  ;;  %v589_v44 = vadd.s32 %v555_v7, %v545_v5 }
 0x701   :  { %v556_v21 = vand.u32 %v554_v8, %v542_v18  ;;  %v560_v22 = vcvt.s32.f32 %v558_v17  ;;  %v559_v24 = vcvt.s32.f32 %v557_v23  ;;  %v644_v17 = vshra.s32 %v1628_v12, 18 }
 0x703   :  { %563 = vadd.xlane.f32.xlu0 %v560_v22  ;;  %v570_v13 = vshrl.u32 %v556_v21, 16  ;;  %v569_v26 = vand.u32 65535, %v556_v21  ;;  %v586_v53 = vsub.s32 %v542_v18, %v556_v21  ;;  %v590_v54 = vadd.s32 %v556_v21, %v546_v19 }
 0x705   :  { %v572_v25 = vcvt.s32.f32 %v570_v13  ;;  %v571_v27 = vcvt.s32.f32 %v569_v26 }
 0x707   :  { %561 = vadd.xlane.f32.xlu0 %v559_v24  ;;  %575 = vadd.xlane.f32.xlu1 %v572_v25 }
 0x70b   :  { %573 = vadd.xlane.f32.xlu1 %v571_v27 }
 0x790   :  { %v564_v28 = vpop.xlane.xlu0 %563 }
 0x791   :  { %v566_v29 = vcvt.f32.s32 %v564_v28 }
 0x793   :  { %v567_v33 = vshll.u32 %v566_v29, 16  ;;  %v646_v29 = vand.u32 1, %v644_v17 }
 0x794   :  { %v562_v31 = vpop.xlane.xlu0 %561  ;;  %v576_v32 = vpop.xlane.xlu1 %575 }
 0x795   :  { %v565_v34 = vcvt.f32.s32 %v562_v31  ;;  %v578_v35 = vcvt.f32.s32 %v576_v32 }
 0x797   :  { %v568_v14 = vadd.s32 %v567_v33, %v565_v34  ;;  %v579_v41 = vshll.u32 %v578_v35, 16 }
 0x798   :  { %v574_v38 = vpop.xlane.xlu1 %573 }
 0x799   :  { %v581_v39 = vsub.s32 %v568_v14, %v549_v6  ;;  %v593_v40 = vsub.s32 %v549_v6, %v568_v14  ;;  %v577_v42 = vcvt.f32.s32 %v574_v38 }
 0x79b   :  { %vm583_vm8 = vcmp.ge.s32.totalorder %v581_v39, 0  ;;  %v580_v45 = vadd.s32 %v579_v41, %v577_v42 }
 0x79c   :  { %v587_v46 = vsel %vm583_vm8, %v555_v7, %v585_v43  ;;  %v591_v47 = vsel %vm583_vm8, %v545_v5, %v589_v44  ;;  %v595_v48 = vsel %vm583_vm8, %v549_v6, %v593_v40  ;;  %v643_v5 = vshra.s32 %v1626_v11, 18 }
 0x79d   :  { %v601_v49 = vand.u32 %v599_v36, %v587_v46  ;;  %v582_v51 = vsub.s32 %v580_v45, %v550_v20  ;;  %v594_v52 = vsub.s32 %v550_v20, %v580_v45 }
 0x79e   :  { %v645_v16 = vand.u32 1, %v643_v5 }
 0x79f   :  { %vm584_vm9 = vcmp.ge.s32.totalorder %v582_v51, 0  ;;  %v604_v55 = vshrl.u32 %v601_v49, 16  ;;  %v603_v61 = vand.u32 65535, %v601_v49  ;;  %v631_v23 = vsub.s32 %v587_v46, %v601_v49 }
 0x7a0   :  { %v588_v56 = vsel %vm584_vm9, %v556_v21, %v586_v53  ;;  %v592_v57 = vsel %vm584_vm9, %v546_v19, %v590_v54  ;;  %v596_v58 = vsel %vm584_vm9, %v550_v20, %v594_v52  ;;  %v635_v13 = vadd.s32 %v601_v49, %v591_v47 }
 0x7a1   :  { %v602_v59 = vand.u32 %v600_v50, %v588_v56  ;;  %v606_v60 = vcvt.s32.f32 %v604_v55  ;;  %v605_v63 = vcvt.s32.f32 %v603_v61  ;;  %v690_v55 = vshra.s32 %v1628_v12, 17 }
 0x7a3   :  { %609 = vadd.xlane.f32.xlu0 %v606_v60  ;;  %v616_v62 = vshrl.u32 %v602_v59, 16  ;;  %v615_v1 = vand.u32 65535, %v602_v59  ;;  %v632_v32 = vsub.s32 %v588_v56, %v602_v59  ;;  %v636_v33 = vadd.s32 %v602_v59, %v592_v57 }
 0x7a5   :  { %v618_v0 = vcvt.s32.f32 %v616_v62  ;;  %v617_v2 = vcvt.s32.f32 %v615_v1 }
 0x7a7   :  { %607 = vadd.xlane.f32.xlu0 %v605_v63  ;;  %621 = vadd.xlane.f32.xlu1 %v618_v0 }
 0x7ab   :  { %619 = vadd.xlane.f32.xlu1 %v617_v2 }
 0x830   :  { %v610_v3 = vpop.xlane.xlu0 %609 }
 0x831   :  { %v612_v4 = vcvt.f32.s32 %v610_v3 }
 0x833   :  { %v613_v8 = vshll.u32 %v612_v4, 16  ;;  %v692_v4 = vand.u32 1, %v690_v55 }
 0x834   :  { %v608_v6 = vpop.xlane.xlu0 %607  ;;  %v622_v7 = vpop.xlane.xlu1 %621 }
 0x835   :  { %v611_v9 = vcvt.f32.s32 %v608_v6  ;;  %v624_v10 = vcvt.f32.s32 %v622_v7 }
 0x837   :  { %v614_v15 = vadd.s32 %v613_v8, %v611_v9  ;;  %v625_v21 = vshll.u32 %v624_v10, 16 }
 0x838   :  { %v620_v18 = vpop.xlane.xlu1 %619 }
 0x839   :  { %v627_v19 = vsub.s32 %v614_v15, %v595_v48  ;;  %v639_v20 = vsub.s32 %v595_v48, %v614_v15  ;;  %v623_v22 = vcvt.f32.s32 %v620_v18 }
 0x83b   :  { %vm629_vm10 = vcmp.ge.s32.totalorder %v627_v19, 0  ;;  %v626_v24 = vadd.s32 %v625_v21, %v623_v22 }
 0x83c   :  { %v633_v25 = vsel %vm629_vm10, %v601_v49, %v631_v23  ;;  %v637_v26 = vsel %vm629_vm10, %v591_v47, %v635_v13  ;;  %v641_v27 = vsel %vm629_vm10, %v595_v48, %v639_v20  ;;  %v689_v47 = vshra.s32 %v1626_v11, 17 }
 0x83d   :  { %v647_v28 = vand.u32 %v645_v16, %v633_v25  ;;  %v628_v30 = vsub.s32 %v626_v24, %v596_v58  ;;  %v640_v31 = vsub.s32 %v596_v58, %v626_v24 }
 0x83e   :  { %v691_v54 = vand.u32 1, %v689_v47 }
 0x83f   :  { %vm630_vm11 = vcmp.ge.s32.totalorder %v628_v30, 0  ;;  %v650_v34 = vshrl.u32 %v647_v28, 16  ;;  %v649_v39 = vand.u32 65535, %v647_v28  ;;  %v677_v61 = vsub.s32 %v633_v25, %v647_v28 }
 0x840   :  { %v634_v35 = vsel %vm630_vm11, %v602_v59, %v632_v32  ;;  %v638_v14 = vsel %vm630_vm11, %v592_v57, %v636_v33  ;;  %v642_v36 = vsel %vm630_vm11, %v596_v58, %v640_v31  ;;  %v681_v62 = vadd.s32 %v647_v28, %v637_v26 }
 0x841   :  { %v648_v37 = vand.u32 %v646_v29, %v634_v35  ;;  %v652_v38 = vcvt.s32.f32 %v650_v34  ;;  %v651_v41 = vcvt.s32.f32 %v649_v39  ;;  %v736_v34 = vshra.s32 %v1628_v12, 16 }
 0x843   :  { %655 = vadd.xlane.f32.xlu0 %v652_v38  ;;  %v662_v40 = vshrl.u32 %v648_v37, 16  ;;  %v661_v43 = vand.u32 65535, %v648_v37  ;;  %v678_v7 = vsub.s32 %v634_v35, %v648_v37  ;;  %v682_v8 = vadd.s32 %v648_v37, %v638_v14 }
 0x845   :  { %v664_v42 = vcvt.s32.f32 %v662_v40  ;;  %v663_v44 = vcvt.s32.f32 %v661_v43 }
 0x847   :  { %653 = vadd.xlane.f32.xlu0 %v651_v41  ;;  %667 = vadd.xlane.f32.xlu1 %v664_v42 }
 0x84b   :  { %665 = vadd.xlane.f32.xlu1 %v663_v44 }
 0x8d0   :  { %v656_v45 = vpop.xlane.xlu0 %655 }
 0x8d1   :  { %v658_v46 = vcvt.f32.s32 %v656_v45 }
 0x8d3   :  { %v659_v50 = vshll.u32 %v658_v46, 16  ;;  %v738_v46 = vand.u32 1, %v736_v34 }
 0x8d4   :  { %v654_v48 = vpop.xlane.xlu0 %653  ;;  %v668_v49 = vpop.xlane.xlu1 %667 }
 0x8d5   :  { %v657_v51 = vcvt.f32.s32 %v654_v48  ;;  %v670_v52 = vcvt.f32.s32 %v668_v49 }
 0x8d7   :  { %v660_v53 = vadd.s32 %v659_v50, %v657_v51  ;;  %v671_v59 = vshll.u32 %v670_v52, 16 }
 0x8d8   :  { %v666_v56 = vpop.xlane.xlu1 %665 }
 0x8d9   :  { %v673_v57 = vsub.s32 %v660_v53, %v641_v27  ;;  %v685_v58 = vsub.s32 %v641_v27, %v660_v53  ;;  %v669_v60 = vcvt.f32.s32 %v666_v56 }
 0x8db   :  { %vm675_vm12 = vcmp.ge.s32.totalorder %v673_v57, 0  ;;  %v672_v63 = vadd.s32 %v671_v59, %v669_v60 }
 0x8dc   :  { %v679_v0 = vsel %vm675_vm12, %v647_v28, %v677_v61  ;;  %v683_v1 = vsel %vm675_vm12, %v637_v26, %v681_v62  ;;  %v687_v2 = vsel %vm675_vm12, %v641_v27, %v685_v58  ;;  %v735_v26 = vshra.s32 %v1626_v11, 16 }
 0x8dd   :  { %v693_v3 = vand.u32 %v691_v54, %v679_v0  ;;  %v674_v5 = vsub.s32 %v672_v63, %v642_v36  ;;  %v686_v6 = vsub.s32 %v642_v36, %v672_v63 }
 0x8de   :  { %v737_v33 = vand.u32 1, %v735_v26 }
 0x8df   :  { %vm676_vm13 = vcmp.ge.s32.totalorder %v674_v5, 0  ;;  %v696_v9 = vshrl.u32 %v693_v3, 16  ;;  %v695_v19 = vand.u32 65535, %v693_v3  ;;  %v723_v39 = vsub.s32 %v679_v0, %v693_v3 }
 0x8e0   :  { %v680_v10 = vsel %vm676_vm13, %v648_v37, %v678_v7  ;;  %v684_v15 = vsel %vm676_vm13, %v638_v14, %v682_v8  ;;  %v688_v16 = vsel %vm676_vm13, %v642_v36, %v686_v6  ;;  %v727_v40 = vadd.s32 %v693_v3, %v683_v1 }
 0x8e1   :  { %v694_v17 = vand.u32 %v692_v4, %v680_v10  ;;  %v698_v18 = vcvt.s32.f32 %v696_v9  ;;  %v697_v21 = vcvt.s32.f32 %v695_v19  ;;  %v782_v9 = vshra.s32 %v1628_v12, 15 }
 0x8e3   :  { %701 = vadd.xlane.f32.xlu0 %v698_v18  ;;  %v708_v20 = vshrl.u32 %v694_v17, 16  ;;  %v707_v23 = vand.u32 65535, %v694_v17  ;;  %v724_v49 = vsub.s32 %v680_v10, %v694_v17  ;;  %v728_v50 = vadd.s32 %v694_v17, %v684_v15 }
 0x8e5   :  { %v710_v22 = vcvt.s32.f32 %v708_v20  ;;  %v709_v13 = vcvt.s32.f32 %v707_v23 }
 0x8e7   :  { %699 = vadd.xlane.f32.xlu0 %v697_v21  ;;  %713 = vadd.xlane.f32.xlu1 %v710_v22 }
 0x8eb   :  { %711 = vadd.xlane.f32.xlu1 %v709_v13 }
 0x970   :  { %v702_v24 = vpop.xlane.xlu0 %701 }
 0x971   :  { %v704_v25 = vcvt.f32.s32 %v702_v24 }
 0x973   :  { %v705_v29 = vshll.u32 %v704_v25, 16  ;;  %v784_v25 = vand.u32 1, %v782_v9 }
 0x974   :  { %v700_v27 = vpop.xlane.xlu0 %699  ;;  %v714_v28 = vpop.xlane.xlu1 %713 }
 0x975   :  { %v703_v30 = vcvt.f32.s32 %v700_v27  ;;  %v716_v31 = vcvt.f32.s32 %v714_v28 }
 0x977   :  { %v706_v32 = vadd.s32 %v705_v29, %v703_v30  ;;  %v717_v37 = vshll.u32 %v716_v31, 16 }
 0x978   :  { %v712_v35 = vpop.xlane.xlu1 %711 }
 0x979   :  { %v719_v14 = vsub.s32 %v706_v32, %v687_v2  ;;  %v731_v36 = vsub.s32 %v687_v2, %v706_v32  ;;  %v715_v38 = vcvt.f32.s32 %v712_v35 }
 0x97b   :  { %vm721_vm14 = vcmp.ge.s32.totalorder %v719_v14, 0  ;;  %v718_v41 = vadd.s32 %v717_v37, %v715_v38 }
 0x97c   :  { %v725_v42 = vsel %vm721_vm14, %v693_v3, %v723_v39  ;;  %v729_v43 = vsel %vm721_vm14, %v683_v1, %v727_v40  ;;  %v733_v44 = vsel %vm721_vm14, %v687_v2, %v731_v36  ;;  %v781_v1 = vshra.s32 %v1626_v11, 15 }
 0x97d   :  { %v739_v45 = vand.u32 %v737_v33, %v725_v42  ;;  %v720_v47 = vsub.s32 %v718_v41, %v688_v16  ;;  %v732_v48 = vsub.s32 %v688_v16, %v718_v41 }
 0x97e   :  { %v783_v8 = vand.u32 1, %v781_v1 }
 0x97f   :  { %vm722_vm15 = vcmp.ge.s32.totalorder %v720_v47, 0  ;;  %v742_v51 = vshrl.u32 %v739_v45, 16  ;;  %v741_v57 = vand.u32 65535, %v739_v45  ;;  %v769_v19 = vsub.s32 %v725_v42, %v739_v45 }
 0x980   :  { %v726_v52 = vsel %vm722_vm15, %v694_v17, %v724_v49  ;;  %v730_v53 = vsel %vm722_vm15, %v684_v15, %v728_v50  ;;  %v734_v54 = vsel %vm722_vm15, %v688_v16, %v732_v48  ;;  %v773_v20 = vadd.s32 %v739_v45, %v729_v43 }
 0x981   :  { %v740_v55 = vand.u32 %v738_v46, %v726_v52  ;;  %v744_v56 = vcvt.s32.f32 %v742_v51  ;;  %v743_v59 = vcvt.s32.f32 %v741_v57  ;;  %v828_v51 = vshra.s32 %v1628_v12, 14 }
 0x983   :  { %747 = vadd.xlane.f32.xlu0 %v744_v56  ;;  %v754_v58 = vshrl.u32 %v740_v55, 16  ;;  %v753_v61 = vand.u32 65535, %v740_v55  ;;  %v770_v28 = vsub.s32 %v726_v52, %v740_v55  ;;  %v774_v29 = vadd.s32 %v740_v55, %v730_v53 }
 0x985   :  { %v756_v60 = vcvt.s32.f32 %v754_v58  ;;  %v755_v62 = vcvt.s32.f32 %v753_v61 }
 0x987   :  { %745 = vadd.xlane.f32.xlu0 %v743_v59  ;;  %759 = vadd.xlane.f32.xlu1 %v756_v60 }
 0x98b   :  { %757 = vadd.xlane.f32.xlu1 %v755_v62 }
 0xa10   :  { %v748_v63 = vpop.xlane.xlu0 %747 }
 0xa11   :  { %v750_v0 = vcvt.f32.s32 %v748_v63 }
 0xa13   :  { %v751_v4 = vshll.u32 %v750_v0, 16  ;;  %v830_v0 = vand.u32 1, %v828_v51 }
 0xa14   :  { %v746_v2 = vpop.xlane.xlu0 %745  ;;  %v760_v3 = vpop.xlane.xlu1 %759 }
 0xa15   :  { %v749_v5 = vcvt.f32.s32 %v746_v2  ;;  %v762_v6 = vcvt.f32.s32 %v760_v3 }
 0xa17   :  { %v752_v7 = vadd.s32 %v751_v4, %v749_v5  ;;  %v763_v17 = vshll.u32 %v762_v6, 16 }
 0xa18   :  { %v758_v10 = vpop.xlane.xlu1 %757 }
 0xa19   :  { %v765_v15 = vsub.s32 %v752_v7, %v733_v44  ;;  %v777_v16 = vsub.s32 %v733_v44, %v752_v7  ;;  %v761_v18 = vcvt.f32.s32 %v758_v10 }
 0xa1b   :  { %vm767_vm0 = vcmp.ge.s32.totalorder %v765_v15, 0  ;;  %v764_v21 = vadd.s32 %v763_v17, %v761_v18 }
 0xa1c   :  { %v771_v22 = vsel %vm767_vm0, %v739_v45, %v769_v19  ;;  %v775_v23 = vsel %vm767_vm0, %v729_v43, %v773_v20  ;;  %v779_v13 = vsel %vm767_vm0, %v733_v44, %v777_v16  ;;  %v827_v43 = vshra.s32 %v1626_v11, 14 }
 0xa1d   :  { %v785_v24 = vand.u32 %v783_v8, %v771_v22  ;;  %v766_v26 = vsub.s32 %v764_v21, %v734_v54  ;;  %v778_v27 = vsub.s32 %v734_v54, %v764_v21 }
 0xa1e   :  { %v829_v50 = vand.u32 1, %v827_v43 }
 0xa1f   :  { %vm768_vm1 = vcmp.ge.s32.totalorder %v766_v26, 0  ;;  %v788_v30 = vshrl.u32 %v785_v24, 16  ;;  %v787_v14 = vand.u32 65535, %v785_v24  ;;  %v815_v57 = vsub.s32 %v771_v22, %v785_v24 }
 0xa20   :  { %v772_v31 = vsel %vm768_vm1, %v740_v55, %v770_v28  ;;  %v776_v32 = vsel %vm768_vm1, %v730_v53, %v774_v29  ;;  %v780_v33 = vsel %vm768_vm1, %v734_v54, %v778_v27  ;;  %v819_v58 = vadd.s32 %v785_v24, %v775_v23 }
 0xa21   :  { %v786_v34 = vand.u32 %v784_v25, %v772_v31  ;;  %v790_v35 = vcvt.s32.f32 %v788_v30  ;;  %v789_v37 = vcvt.s32.f32 %v787_v14  ;;  %v874_v30 = vshra.s32 %v1628_v12, 13 }
 0xa23   :  { %793 = vadd.xlane.f32.xlu0 %v790_v35  ;;  %v800_v36 = vshrl.u32 %v786_v34, 16  ;;  %v799_v39 = vand.u32 65535, %v786_v34  ;;  %v816_v3 = vsub.s32 %v772_v31, %v786_v34  ;;  %v820_v4 = vadd.s32 %v786_v34, %v776_v32 }
 0xa25   :  { %v802_v38 = vcvt.s32.f32 %v800_v36  ;;  %v801_v40 = vcvt.s32.f32 %v799_v39 }
 0xa27   :  { %791 = vadd.xlane.f32.xlu0 %v789_v37  ;;  %805 = vadd.xlane.f32.xlu1 %v802_v38 }
 0xa2b   :  { %803 = vadd.xlane.f32.xlu1 %v801_v40 }
 0xab0   :  { %v794_v41 = vpop.xlane.xlu0 %793 }
 0xab1   :  { %v796_v42 = vcvt.f32.s32 %v794_v41 }
 0xab3   :  { %v797_v46 = vshll.u32 %v796_v42, 16  ;;  %v876_v42 = vand.u32 1, %v874_v30 }
 0xab4   :  { %v792_v44 = vpop.xlane.xlu0 %791  ;;  %v806_v45 = vpop.xlane.xlu1 %805 }
 0xab5   :  { %v795_v47 = vcvt.f32.s32 %v792_v44  ;;  %v808_v48 = vcvt.f32.s32 %v806_v45 }
 0xab7   :  { %v798_v49 = vadd.s32 %v797_v46, %v795_v47  ;;  %v809_v55 = vshll.u32 %v808_v48, 16 }
 0xab8   :  { %v804_v52 = vpop.xlane.xlu1 %803 }
 0xab9   :  { %v811_v53 = vsub.s32 %v798_v49, %v779_v13  ;;  %v823_v54 = vsub.s32 %v779_v13, %v798_v49  ;;  %v807_v56 = vcvt.f32.s32 %v804_v52 }
 0xabb   :  { %vm813_vm2 = vcmp.ge.s32.totalorder %v811_v53, 0  ;;  %v810_v59 = vadd.s32 %v809_v55, %v807_v56 }
 0xabc   :  { %v817_v60 = vsel %vm813_vm2, %v785_v24, %v815_v57  ;;  %v821_v61 = vsel %vm813_vm2, %v775_v23, %v819_v58  ;;  %v825_v62 = vsel %vm813_vm2, %v779_v13, %v823_v54  ;;  %v873_v23 = vshra.s32 %v1626_v11, 13 }
 0xabd   :  { %v831_v63 = vand.u32 %v829_v50, %v817_v60  ;;  %v812_v1 = vsub.s32 %v810_v59, %v780_v33  ;;  %v824_v2 = vsub.s32 %v780_v33, %v810_v59 }
 0xabe   :  { %v875_v29 = vand.u32 1, %v873_v23 }
 0xabf   :  { %vm814_vm3 = vcmp.ge.s32.totalorder %v812_v1, 0  ;;  %v834_v5 = vshrl.u32 %v831_v63, 16  ;;  %v833_v15 = vand.u32 65535, %v831_v63  ;;  %v861_v14 = vsub.s32 %v817_v60, %v831_v63 }
 0xac0   :  { %v818_v6 = vsel %vm814_vm3, %v786_v34, %v816_v3  ;;  %v822_v7 = vsel %vm814_vm3, %v776_v32, %v820_v4  ;;  %v826_v8 = vsel %vm814_vm3, %v780_v33, %v824_v2  ;;  %v865_v36 = vadd.s32 %v831_v63, %v821_v61 }
 0xac1   :  { %v832_v9 = vand.u32 %v830_v0, %v818_v6  ;;  %v836_v10 = vcvt.s32.f32 %v834_v5  ;;  %v835_v17 = vcvt.s32.f32 %v833_v15  ;;  %v920_v5 = vshra.s32 %v1628_v12, 12 }
 0xac3   :  { %839 = vadd.xlane.f32.xlu0 %v836_v10  ;;  %v846_v16 = vshrl.u32 %v832_v9, 16  ;;  %v845_v19 = vand.u32 65535, %v832_v9  ;;  %v862_v45 = vsub.s32 %v818_v6, %v832_v9  ;;  %v866_v46 = vadd.s32 %v832_v9, %v822_v7 }
 0xac5   :  { %v848_v18 = vcvt.s32.f32 %v846_v16  ;;  %v847_v20 = vcvt.s32.f32 %v845_v19 }
 0xac7   :  { %837 = vadd.xlane.f32.xlu0 %v835_v17  ;;  %851 = vadd.xlane.f32.xlu1 %v848_v18 }
 0xacb   :  { %849 = vadd.xlane.f32.xlu1 %v847_v20 }
 0xb50   :  { %v840_v21 = vpop.xlane.xlu0 %839 }
 0xb51   :  { %v842_v22 = vcvt.f32.s32 %v840_v21 }
 0xb53   :  { %v843_v25 = vshll.u32 %v842_v22, 16  ;;  %v922_v22 = vand.u32 1, %v920_v5 }
 0xb54   :  { %v838_v13 = vpop.xlane.xlu0 %837  ;;  %v852_v24 = vpop.xlane.xlu1 %851 }
 0xb55   :  { %v841_v26 = vcvt.f32.s32 %v838_v13  ;;  %v854_v27 = vcvt.f32.s32 %v852_v24 }
 0xb57   :  { %v844_v28 = vadd.s32 %v843_v25, %v841_v26  ;;  %v855_v34 = vshll.u32 %v854_v27, 16 }
 0xb58   :  { %v850_v31 = vpop.xlane.xlu1 %849 }
 0xb59   :  { %v857_v32 = vsub.s32 %v844_v28, %v825_v62  ;;  %v869_v33 = vsub.s32 %v825_v62, %v844_v28  ;;  %v853_v35 = vcvt.f32.s32 %v850_v31 }
 0xb5b   :  { %vm859_vm4 = vcmp.ge.s32.totalorder %v857_v32, 0  ;;  %v856_v37 = vadd.s32 %v855_v34, %v853_v35 }
 0xb5c   :  { %v863_v38 = vsel %vm859_vm4, %v831_v63, %v861_v14  ;;  %v867_v39 = vsel %vm859_vm4, %v821_v61, %v865_v36  ;;  %v871_v40 = vsel %vm859_vm4, %v825_v62, %v869_v33  ;;  %v919_v61 = vshra.s32 %v1626_v11, 12 }
 0xb5d   :  { %v877_v41 = vand.u32 %v875_v29, %v863_v38  ;;  %v858_v43 = vsub.s32 %v856_v37, %v826_v8  ;;  %v870_v44 = vsub.s32 %v826_v8, %v856_v37 }
 0xb5e   :  { %v921_v4 = vand.u32 1, %v919_v61 }
 0xb5f   :  { %vm860_vm5 = vcmp.ge.s32.totalorder %v858_v43, 0  ;;  %v880_v47 = vshrl.u32 %v877_v41, 16  ;;  %v879_v53 = vand.u32 65535, %v877_v41  ;;  %v907_v15 = vsub.s32 %v863_v38, %v877_v41 }
 0xb60   :  { %v864_v48 = vsel %vm860_vm5, %v832_v9, %v862_v45  ;;  %v868_v49 = vsel %vm860_vm5, %v822_v7, %v866_v46  ;;  %v872_v50 = vsel %vm860_vm5, %v826_v8, %v870_v44  ;;  %v911_v16 = vadd.s32 %v877_v41, %v867_v39 }
 0xb61   :  { %v878_v51 = vand.u32 %v876_v42, %v864_v48  ;;  %v882_v52 = vcvt.s32.f32 %v880_v47  ;;  %v881_v55 = vcvt.s32.f32 %v879_v53  ;;  %v966_v47 = vshra.s32 %v1628_v12, 11 }
 0xb63   :  { %885 = vadd.xlane.f32.xlu0 %v882_v52  ;;  %v892_v54 = vshrl.u32 %v878_v51, 16  ;;  %v891_v57 = vand.u32 65535, %v878_v51  ;;  %v908_v24 = vsub.s32 %v864_v48, %v878_v51  ;;  %v912_v25 = vadd.s32 %v878_v51, %v868_v49 }
 0xb65   :  { %v894_v56 = vcvt.s32.f32 %v892_v54  ;;  %v893_v58 = vcvt.s32.f32 %v891_v57 }
 0xb67   :  { %883 = vadd.xlane.f32.xlu0 %v881_v55  ;;  %897 = vadd.xlane.f32.xlu1 %v894_v56 }
 0xb6b   :  { %895 = vadd.xlane.f32.xlu1 %v893_v58 }
 0xbf0   :  { %v886_v59 = vpop.xlane.xlu0 %885 }
 0xbf1   :  { %v888_v60 = vcvt.f32.s32 %v886_v59 }
 0xbf3   :  { %v889_v0 = vshll.u32 %v888_v60, 16  ;;  %v968_v60 = vand.u32 1, %v966_v47 }
 0xbf4   :  { %v884_v62 = vpop.xlane.xlu0 %883  ;;  %v898_v63 = vpop.xlane.xlu1 %897 }
 0xbf5   :  { %v887_v1 = vcvt.f32.s32 %v884_v62  ;;  %v900_v2 = vcvt.f32.s32 %v898_v63 }
 0xbf7   :  { %v890_v3 = vadd.s32 %v889_v0, %v887_v1  ;;  %v901_v9 = vshll.u32 %v900_v2, 16 }
 0xbf8   :  { %v896_v6 = vpop.xlane.xlu1 %895 }
 0xbf9   :  { %v903_v7 = vsub.s32 %v890_v3, %v871_v40  ;;  %v915_v8 = vsub.s32 %v871_v40, %v890_v3  ;;  %v899_v10 = vcvt.f32.s32 %v896_v6 }
 0xbfb   :  { %vm905_vm6 = vcmp.ge.s32.totalorder %v903_v7, 0  ;;  %v902_v17 = vadd.s32 %v901_v9, %v899_v10 }
 0xbfc   :  { %v909_v18 = vsel %vm905_vm6, %v877_v41, %v907_v15  ;;  %v913_v19 = vsel %vm905_vm6, %v867_v39, %v911_v16  ;;  %v917_v20 = vsel %vm905_vm6, %v871_v40, %v915_v8  ;;  %v965_v39 = vshra.s32 %v1626_v11, 11 }
 0xbfd   :  { %v923_v21 = vand.u32 %v921_v4, %v909_v18  ;;  %v904_v23 = vsub.s32 %v902_v17, %v872_v50  ;;  %v916_v13 = vsub.s32 %v872_v50, %v902_v17 }
 0xbfe   :  { %v967_v46 = vand.u32 1, %v965_v39 }
 0xbff   :  { %vm906_vm7 = vcmp.ge.s32.totalorder %v904_v23, 0  ;;  %v926_v26 = vshrl.u32 %v923_v21, 16  ;;  %v925_v32 = vand.u32 65535, %v923_v21  ;;  %v953_v53 = vsub.s32 %v909_v18, %v923_v21 }
 0xc00   :  { %v910_v27 = vsel %vm906_vm7, %v878_v51, %v908_v24  ;;  %v914_v28 = vsel %vm906_vm7, %v868_v49, %v912_v25  ;;  %v918_v29 = vsel %vm906_vm7, %v872_v50, %v916_v13  ;;  %v957_v54 = vadd.s32 %v923_v21, %v913_v19 }
 0xc01   :  { %v924_v30 = vand.u32 %v922_v22, %v910_v27  ;;  %v928_v31 = vcvt.s32.f32 %v926_v26  ;;  %v927_v34 = vcvt.s32.f32 %v925_v32  ;;  %v1012_v26 = vshra.s32 %v1628_v12, 10 }
 0xc03   :  { %931 = vadd.xlane.f32.xlu0 %v928_v31  ;;  %v938_v33 = vshrl.u32 %v924_v30, 16  ;;  %v937_v14 = vand.u32 65535, %v924_v30  ;;  %v954_v63 = vsub.s32 %v910_v27, %v924_v30  ;;  %v958_v0 = vadd.s32 %v924_v30, %v914_v28 }
 0xc05   :  { %v940_v35 = vcvt.s32.f32 %v938_v33  ;;  %v939_v36 = vcvt.s32.f32 %v937_v14 }
 0xc07   :  { %929 = vadd.xlane.f32.xlu0 %v927_v34  ;;  %943 = vadd.xlane.f32.xlu1 %v940_v35 }
 0xc0b   :  { %941 = vadd.xlane.f32.xlu1 %v939_v36 }
 0xc90   :  { %v932_v37 = vpop.xlane.xlu0 %931 }
 0xc91   :  { %v934_v38 = vcvt.f32.s32 %v932_v37 }
 0xc93   :  { %v935_v42 = vshll.u32 %v934_v38, 16  ;;  %v1014_v38 = vand.u32 1, %v1012_v26 }
 0xc94   :  { %v930_v40 = vpop.xlane.xlu0 %929  ;;  %v944_v41 = vpop.xlane.xlu1 %943 }
 0xc95   :  { %v933_v43 = vcvt.f32.s32 %v930_v40  ;;  %v946_v44 = vcvt.f32.s32 %v944_v41 }
 0xc97   :  { %v936_v45 = vadd.s32 %v935_v42, %v933_v43  ;;  %v947_v51 = vshll.u32 %v946_v44, 16 }
 0xc98   :  { %v942_v48 = vpop.xlane.xlu1 %941 }
 0xc99   :  { %v949_v49 = vsub.s32 %v936_v45, %v917_v20  ;;  %v961_v50 = vsub.s32 %v917_v20, %v936_v45  ;;  %v945_v52 = vcvt.f32.s32 %v942_v48 }
 0xc9b   :  { %vm951_vm8 = vcmp.ge.s32.totalorder %v949_v49, 0  ;;  %v948_v55 = vadd.s32 %v947_v51, %v945_v52 }
 0xc9c   :  { %v955_v56 = vsel %vm951_vm8, %v923_v21, %v953_v53  ;;  %v959_v57 = vsel %vm951_vm8, %v913_v19, %v957_v54  ;;  %v963_v58 = vsel %vm951_vm8, %v917_v20, %v961_v50  ;;  %v1011_v19 = vshra.s32 %v1626_v11, 10 }
 0xc9d   :  { %v969_v59 = vand.u32 %v967_v46, %v955_v56  ;;  %v950_v61 = vsub.s32 %v948_v55, %v918_v29  ;;  %v962_v62 = vsub.s32 %v918_v29, %v948_v55 }
 0xc9e   :  { %v1013_v25 = vand.u32 1, %v1011_v19 }
 0xc9f   :  { %vm952_vm9 = vcmp.ge.s32.totalorder %v950_v61, 0  ;;  %v972_v1 = vshrl.u32 %v969_v59, 16  ;;  %v971_v7 = vand.u32 65535, %v969_v59  ;;  %v999_v32 = vsub.s32 %v955_v56, %v969_v59 }
 0xca0   :  { %v956_v2 = vsel %vm952_vm9, %v924_v30, %v954_v63  ;;  %v960_v3 = vsel %vm952_vm9, %v914_v28, %v958_v0  ;;  %v964_v4 = vsel %vm952_vm9, %v918_v29, %v962_v62  ;;  %v1003_v33 = vadd.s32 %v969_v59, %v959_v57 }
 0xca1   :  { %v970_v5 = vand.u32 %v968_v60, %v956_v2  ;;  %v974_v6 = vcvt.s32.f32 %v972_v1  ;;  %v973_v9 = vcvt.s32.f32 %v971_v7  ;;  %v1058_v1 = vshra.s32 %v1628_v12, 9 }
 0xca3   :  { %977 = vadd.xlane.f32.xlu0 %v974_v6  ;;  %v984_v8 = vshrl.u32 %v970_v5, 16  ;;  %v983_v15 = vand.u32 65535, %v970_v5  ;;  %v1000_v41 = vsub.s32 %v956_v2, %v970_v5  ;;  %v1004_v42 = vadd.s32 %v970_v5, %v960_v3 }
 0xca5   :  { %v986_v10 = vcvt.s32.f32 %v984_v8  ;;  %v985_v16 = vcvt.s32.f32 %v983_v15 }
 0xca7   :  { %975 = vadd.xlane.f32.xlu0 %v973_v9  ;;  %989 = vadd.xlane.f32.xlu1 %v986_v10 }
 0xcab   :  { %987 = vadd.xlane.f32.xlu1 %v985_v16 }
 0xd30   :  { %v978_v17 = vpop.xlane.xlu0 %977 }
 0xd31   :  { %v980_v18 = vcvt.f32.s32 %v978_v17 }
 0xd33   :  { %v981_v22 = vshll.u32 %v980_v18, 16  ;;  %v1060_v18 = vand.u32 1, %v1058_v1 }
 0xd34   :  { %v976_v20 = vpop.xlane.xlu0 %975  ;;  %v990_v21 = vpop.xlane.xlu1 %989 }
 0xd35   :  { %v979_v23 = vcvt.f32.s32 %v976_v20  ;;  %v992_v13 = vcvt.f32.s32 %v990_v21 }
 0xd37   :  { %v982_v24 = vadd.s32 %v981_v22, %v979_v23  ;;  %v993_v30 = vshll.u32 %v992_v13, 16 }
 0xd38   :  { %v988_v27 = vpop.xlane.xlu1 %987 }
 0xd39   :  { %v995_v28 = vsub.s32 %v982_v24, %v963_v58  ;;  %v1007_v29 = vsub.s32 %v963_v58, %v982_v24  ;;  %v991_v31 = vcvt.f32.s32 %v988_v27 }
 0xd3b   :  { %vm997_vm10 = vcmp.ge.s32.totalorder %v995_v28, 0  ;;  %v994_v34 = vadd.s32 %v993_v30, %v991_v31 }
 0xd3c   :  { %v1001_v35 = vsel %vm997_vm10, %v969_v59, %v999_v32  ;;  %v1005_v14 = vsel %vm997_vm10, %v959_v57, %v1003_v33  ;;  %v1009_v36 = vsel %vm997_vm10, %v963_v58, %v1007_v29  ;;  %v1057_v57 = vshra.s32 %v1626_v11, 9 }
 0xd3d   :  { %v1015_v37 = vand.u32 %v1013_v25, %v1001_v35  ;;  %v996_v39 = vsub.s32 %v994_v34, %v964_v4  ;;  %v1008_v40 = vsub.s32 %v964_v4, %v994_v34 }
 0xd3e   :  { %v1059_v0 = vand.u32 1, %v1057_v57 }
 0xd3f   :  { %vm998_vm11 = vcmp.ge.s32.totalorder %v996_v39, 0  ;;  %v1018_v43 = vshrl.u32 %v1015_v37, 16  ;;  %v1017_v49 = vand.u32 65535, %v1015_v37  ;;  %v1045_v7 = vsub.s32 %v1001_v35, %v1015_v37 }
 0xd40   :  { %v1002_v44 = vsel %vm998_vm11, %v970_v5, %v1000_v41  ;;  %v1006_v45 = vsel %vm998_vm11, %v960_v3, %v1004_v42  ;;  %v1010_v46 = vsel %vm998_vm11, %v964_v4, %v1008_v40  ;;  %v1049_v8 = vadd.s32 %v1015_v37, %v1005_v14 }
 0xd41   :  { %v1016_v47 = vand.u32 %v1014_v38, %v1002_v44  ;;  %v1020_v48 = vcvt.s32.f32 %v1018_v43  ;;  %v1019_v51 = vcvt.s32.f32 %v1017_v49  ;;  %v1104_v43 = vshra.s32 %v1628_v12, 8 }
 0xd43   :  { %1023 = vadd.xlane.f32.xlu0 %v1020_v48  ;;  %v1030_v50 = vshrl.u32 %v1016_v47, 16  ;;  %v1029_v53 = vand.u32 65535, %v1016_v47  ;;  %v1046_v21 = vsub.s32 %v1002_v44, %v1016_v47  ;;  %v1050_v22 = vadd.s32 %v1016_v47, %v1006_v45 }
 0xd45   :  { %v1032_v52 = vcvt.s32.f32 %v1030_v50  ;;  %v1031_v54 = vcvt.s32.f32 %v1029_v53 }
 0xd47   :  { %1021 = vadd.xlane.f32.xlu0 %v1019_v51  ;;  %1035 = vadd.xlane.f32.xlu1 %v1032_v52 }
 0xd4b   :  { %1033 = vadd.xlane.f32.xlu1 %v1031_v54 }
 0xdd0   :  { %v1024_v55 = vpop.xlane.xlu0 %1023 }
 0xdd1   :  { %v1026_v56 = vcvt.f32.s32 %v1024_v55 }
 0xdd3   :  { %v1027_v60 = vshll.u32 %v1026_v56, 16  ;;  %v1106_v56 = vand.u32 1, %v1104_v43 }
 0xdd4   :  { %v1022_v58 = vpop.xlane.xlu0 %1021  ;;  %v1036_v59 = vpop.xlane.xlu1 %1035 }
 0xdd5   :  { %v1025_v61 = vcvt.f32.s32 %v1022_v58  ;;  %v1038_v62 = vcvt.f32.s32 %v1036_v59 }
 0xdd7   :  { %v1028_v63 = vadd.s32 %v1027_v60, %v1025_v61  ;;  %v1039_v5 = vshll.u32 %v1038_v62, 16 }
 0xdd8   :  { %v1034_v2 = vpop.xlane.xlu1 %1033 }
 0xdd9   :  { %v1041_v3 = vsub.s32 %v1028_v63, %v1009_v36  ;;  %v1053_v4 = vsub.s32 %v1009_v36, %v1028_v63  ;;  %v1037_v6 = vcvt.f32.s32 %v1034_v2 }
 0xddb   :  { %vm1043_vm12 = vcmp.ge.s32.totalorder %v1041_v3, 0  ;;  %v1040_v9 = vadd.s32 %v1039_v5, %v1037_v6 }
 0xddc   :  { %v1047_v10 = vsel %vm1043_vm12, %v1015_v37, %v1045_v7  ;;  %v1051_v15 = vsel %vm1043_vm12, %v1005_v14, %v1049_v8  ;;  %v1055_v16 = vsel %vm1043_vm12, %v1009_v36, %v1053_v4  ;;  %v1103_v14 = vshra.s32 %v1626_v11, 8 }
 0xddd   :  { %v1061_v17 = vand.u32 %v1059_v0, %v1047_v10  ;;  %v1042_v19 = vsub.s32 %v1040_v9, %v1010_v46  ;;  %v1054_v20 = vsub.s32 %v1010_v46, %v1040_v9 }
 0xdde   :  { %v1105_v42 = vand.u32 1, %v1103_v14 }
 0xddf   :  { %vm1044_vm13 = vcmp.ge.s32.totalorder %v1042_v19, 0  ;;  %v1064_v23 = vshrl.u32 %v1061_v17, 16  ;;  %v1063_v28 = vand.u32 65535, %v1061_v17  ;;  %v1091_v49 = vsub.s32 %v1047_v10, %v1061_v17 }
 0xde0   :  { %v1048_v13 = vsel %vm1044_vm13, %v1016_v47, %v1046_v21  ;;  %v1052_v24 = vsel %vm1044_vm13, %v1006_v45, %v1050_v22  ;;  %v1056_v25 = vsel %vm1044_vm13, %v1010_v46, %v1054_v20  ;;  %v1095_v50 = vadd.s32 %v1061_v17, %v1051_v15 }
 0xde1   :  { %v1062_v26 = vand.u32 %v1060_v18, %v1048_v13  ;;  %v1066_v27 = vcvt.s32.f32 %v1064_v23  ;;  %v1065_v30 = vcvt.s32.f32 %v1063_v28  ;;  %v1150_v23 = vshra.s32 %v1628_v12, 7 }
 0xde3   :  { %1069 = vadd.xlane.f32.xlu0 %v1066_v27  ;;  %v1076_v29 = vshrl.u32 %v1062_v26, 16  ;;  %v1075_v32 = vand.u32 65535, %v1062_v26  ;;  %v1092_v59 = vsub.s32 %v1048_v13, %v1062_v26  ;;  %v1096_v60 = vadd.s32 %v1062_v26, %v1052_v24 }
 0xde5   :  { %v1078_v31 = vcvt.s32.f32 %v1076_v29  ;;  %v1077_v33 = vcvt.s32.f32 %v1075_v32 }
 0xde7   :  { %1067 = vadd.xlane.f32.xlu0 %v1065_v30  ;;  %1081 = vadd.xlane.f32.xlu1 %v1078_v31 }
 0xdeb   :  { %1079 = vadd.xlane.f32.xlu1 %v1077_v33 }
 0xe70   :  { %v1070_v34 = vpop.xlane.xlu0 %1069 }
 0xe71   :  { %v1072_v35 = vcvt.f32.s32 %v1070_v34 }
 0xe73   :  { %v1073_v38 = vshll.u32 %v1072_v35, 16  ;;  %v1152_v35 = vand.u32 1, %v1150_v23 }
 0xe74   :  { %v1068_v36 = vpop.xlane.xlu0 %1067  ;;  %v1082_v37 = vpop.xlane.xlu1 %1081 }
 0xe75   :  { %v1071_v39 = vcvt.f32.s32 %v1068_v36  ;;  %v1084_v40 = vcvt.f32.s32 %v1082_v37 }
 0xe77   :  { %v1074_v41 = vadd.s32 %v1073_v38, %v1071_v39  ;;  %v1085_v47 = vshll.u32 %v1084_v40, 16 }
 0xe78   :  { %v1080_v44 = vpop.xlane.xlu1 %1079 }
 0xe79   :  { %v1087_v45 = vsub.s32 %v1074_v41, %v1055_v16  ;;  %v1099_v46 = vsub.s32 %v1055_v16, %v1074_v41  ;;  %v1083_v48 = vcvt.f32.s32 %v1080_v44 }
 0xe7b   :  { %vm1089_vm14 = vcmp.ge.s32.totalorder %v1087_v45, 0  ;;  %v1086_v51 = vadd.s32 %v1085_v47, %v1083_v48 }
 0xe7c   :  { %v1093_v52 = vsel %vm1089_vm14, %v1061_v17, %v1091_v49  ;;  %v1097_v53 = vsel %vm1089_vm14, %v1051_v15, %v1095_v50  ;;  %v1101_v54 = vsel %vm1089_vm14, %v1055_v16, %v1099_v46  ;;  %v1149_v15 = vshra.s32 %v1626_v11, 7 }
 0xe7d   :  { %v1107_v55 = vand.u32 %v1105_v42, %v1093_v52  ;;  %v1088_v57 = vsub.s32 %v1086_v51, %v1056_v25  ;;  %v1100_v58 = vsub.s32 %v1056_v25, %v1086_v51 }
 0xe7e   :  { %v1151_v22 = vand.u32 1, %v1149_v15 }
 0xe7f   :  { %vm1090_vm15 = vcmp.ge.s32.totalorder %v1088_v57, 0  ;;  %v1110_v61 = vshrl.u32 %v1107_v55, 16  ;;  %v1109_v3 = vand.u32 65535, %v1107_v55  ;;  %v1137_v28 = vsub.s32 %v1093_v52, %v1107_v55 }
 0xe80   :  { %v1094_v62 = vsel %vm1090_vm15, %v1062_v26, %v1092_v59  ;;  %v1098_v63 = vsel %vm1090_vm15, %v1052_v24, %v1096_v60  ;;  %v1102_v0 = vsel %vm1090_vm15, %v1056_v25, %v1100_v58  ;;  %v1141_v29 = vadd.s32 %v1107_v55, %v1097_v53 }
 0xe81   :  { %v1108_v1 = vand.u32 %v1106_v56, %v1094_v62  ;;  %v1112_v2 = vcvt.s32.f32 %v1110_v61  ;;  %v1111_v5 = vcvt.s32.f32 %v1109_v3  ;;  %v1196_v61 = vshra.s32 %v1628_v12, 6 }
 0xe83   :  { %1115 = vadd.xlane.f32.xlu0 %v1112_v2  ;;  %v1122_v4 = vshrl.u32 %v1108_v1, 16  ;;  %v1121_v7 = vand.u32 65535, %v1108_v1  ;;  %v1138_v37 = vsub.s32 %v1094_v62, %v1108_v1  ;;  %v1142_v38 = vadd.s32 %v1108_v1, %v1098_v63 }
 0xe85   :  { %v1124_v6 = vcvt.s32.f32 %v1122_v4  ;;  %v1123_v8 = vcvt.s32.f32 %v1121_v7 }
 0xe87   :  { %1113 = vadd.xlane.f32.xlu0 %v1111_v5  ;;  %1127 = vadd.xlane.f32.xlu1 %v1124_v6 }
 0xe8b   :  { %1125 = vadd.xlane.f32.xlu1 %v1123_v8 }
 0xf10   :  { %v1116_v9 = vpop.xlane.xlu0 %1115 }
 0xf11   :  { %v1118_v10 = vcvt.f32.s32 %v1116_v9 }
 0xf13   :  { %v1119_v18 = vshll.u32 %v1118_v10, 16  ;;  %v1198_v10 = vand.u32 1, %v1196_v61 }
 0xf14   :  { %v1114_v16 = vpop.xlane.xlu0 %1113  ;;  %v1128_v17 = vpop.xlane.xlu1 %1127 }
 0xf15   :  { %v1117_v19 = vcvt.f32.s32 %v1114_v16  ;;  %v1130_v20 = vcvt.f32.s32 %v1128_v17 }
 0xf17   :  { %v1120_v21 = vadd.s32 %v1119_v18, %v1117_v19  ;;  %v1131_v26 = vshll.u32 %v1130_v20, 16 }
 0xf18   :  { %v1126_v13 = vpop.xlane.xlu1 %1125 }
 0xf19   :  { %v1133_v24 = vsub.s32 %v1120_v21, %v1101_v54  ;;  %v1145_v25 = vsub.s32 %v1101_v54, %v1120_v21  ;;  %v1129_v27 = vcvt.f32.s32 %v1126_v13 }
 0xf1b   :  { %vm1135_vm0 = vcmp.ge.s32.totalorder %v1133_v24, 0  ;;  %v1132_v30 = vadd.s32 %v1131_v26, %v1129_v27 }
 0xf1c   :  { %v1139_v31 = vsel %vm1135_vm0, %v1107_v55, %v1137_v28  ;;  %v1143_v32 = vsel %vm1135_vm0, %v1097_v53, %v1141_v29  ;;  %v1147_v33 = vsel %vm1135_vm0, %v1101_v54, %v1145_v25  ;;  %v1195_v53 = vshra.s32 %v1626_v11, 6 }
 0xf1d   :  { %v1153_v34 = vand.u32 %v1151_v22, %v1139_v31  ;;  %v1134_v14 = vsub.s32 %v1132_v30, %v1102_v0  ;;  %v1146_v36 = vsub.s32 %v1102_v0, %v1132_v30 }
 0xf1e   :  { %v1197_v60 = vand.u32 1, %v1195_v53 }
 0xf1f   :  { %vm1136_vm1 = vcmp.ge.s32.totalorder %v1134_v14, 0  ;;  %v1156_v39 = vshrl.u32 %v1153_v34, 16  ;;  %v1155_v45 = vand.u32 65535, %v1153_v34  ;;  %v1183_v3 = vsub.s32 %v1139_v31, %v1153_v34 }
 0xf20   :  { %v1140_v40 = vsel %vm1136_vm1, %v1108_v1, %v1138_v37  ;;  %v1144_v41 = vsel %vm1136_vm1, %v1098_v63, %v1142_v38  ;;  %v1148_v42 = vsel %vm1136_vm1, %v1102_v0, %v1146_v36  ;;  %v1187_v4 = vadd.s32 %v1153_v34, %v1143_v32 }
 0xf21   :  { %v1154_v43 = vand.u32 %v1152_v35, %v1140_v40  ;;  %v1158_v44 = vcvt.s32.f32 %v1156_v39  ;;  %v1157_v47 = vcvt.s32.f32 %v1155_v45  ;;  %v1242_v39 = vshra.s32 %v1628_v12, 5 }
 0xf23   :  { %1161 = vadd.xlane.f32.xlu0 %v1158_v44  ;;  %v1168_v46 = vshrl.u32 %v1154_v43, 16  ;;  %v1167_v49 = vand.u32 65535, %v1154_v43  ;;  %v1184_v17 = vsub.s32 %v1140_v40, %v1154_v43  ;;  %v1188_v18 = vadd.s32 %v1154_v43, %v1144_v41 }
 0xf25   :  { %v1170_v48 = vcvt.s32.f32 %v1168_v46  ;;  %v1169_v50 = vcvt.s32.f32 %v1167_v49 }
 0xf27   :  { %1159 = vadd.xlane.f32.xlu0 %v1157_v47  ;;  %1173 = vadd.xlane.f32.xlu1 %v1170_v48 }
 0xf2b   :  { %1171 = vadd.xlane.f32.xlu1 %v1169_v50 }
 0xfb0   :  { %v1162_v51 = vpop.xlane.xlu0 %1161 }
 0xfb1   :  { %v1164_v52 = vcvt.f32.s32 %v1162_v51 }
 0xfb3   :  { %v1165_v56 = vshll.u32 %v1164_v52, 16  ;;  %v1244_v52 = vand.u32 1, %v1242_v39 }
 0xfb4   :  { %v1160_v54 = vpop.xlane.xlu0 %1159  ;;  %v1174_v55 = vpop.xlane.xlu1 %1173 }
 0xfb5   :  { %v1163_v57 = vcvt.f32.s32 %v1160_v54  ;;  %v1176_v58 = vcvt.f32.s32 %v1174_v55 }
 0xfb7   :  { %v1166_v59 = vadd.s32 %v1165_v56, %v1163_v57  ;;  %v1177_v1 = vshll.u32 %v1176_v58, 16 }
 0xfb8   :  { %v1172_v62 = vpop.xlane.xlu1 %1171 }
 0xfb9   :  { %v1179_v63 = vsub.s32 %v1166_v59, %v1147_v33  ;;  %v1191_v0 = vsub.s32 %v1147_v33, %v1166_v59  ;;  %v1175_v2 = vcvt.f32.s32 %v1172_v62 }
 0xfbb   :  { %vm1181_vm2 = vcmp.ge.s32.totalorder %v1179_v63, 0  ;;  %v1178_v5 = vadd.s32 %v1177_v1, %v1175_v2 }
 0xfbc   :  { %v1185_v6 = vsel %vm1181_vm2, %v1153_v34, %v1183_v3  ;;  %v1189_v7 = vsel %vm1181_vm2, %v1143_v32, %v1187_v4  ;;  %v1193_v8 = vsel %vm1181_vm2, %v1147_v33, %v1191_v0  ;;  %v1241_v32 = vshra.s32 %v1626_v11, 5 }
 0xfbd   :  { %v1199_v9 = vand.u32 %v1197_v60, %v1185_v6  ;;  %v1180_v15 = vsub.s32 %v1178_v5, %v1148_v42  ;;  %v1192_v16 = vsub.s32 %v1148_v42, %v1178_v5 }
 0xfbe   :  { %v1243_v38 = vand.u32 1, %v1241_v32 }
 0xfbf   :  { %vm1182_vm3 = vcmp.ge.s32.totalorder %v1180_v15, 0  ;;  %v1202_v19 = vshrl.u32 %v1199_v9, 16  ;;  %v1201_v24 = vand.u32 65535, %v1199_v9  ;;  %v1229_v45 = vsub.s32 %v1185_v6, %v1199_v9 }
 0xfc0   :  { %v1186_v20 = vsel %vm1182_vm3, %v1154_v43, %v1184_v17  ;;  %v1190_v21 = vsel %vm1182_vm3, %v1144_v41, %v1188_v18  ;;  %v1194_v22 = vsel %vm1182_vm3, %v1148_v42, %v1192_v16  ;;  %v1233_v46 = vadd.s32 %v1199_v9, %v1189_v7 }
 0xfc1   :  { %v1200_v23 = vand.u32 %v1198_v10, %v1186_v20  ;;  %v1204_v13 = vcvt.s32.f32 %v1202_v19  ;;  %v1203_v26 = vcvt.s32.f32 %v1201_v24  ;;  %v1288_v19 = vshra.s32 %v1628_v12, 4 }
 0xfc3   :  { %1207 = vadd.xlane.f32.xlu0 %v1204_v13  ;;  %v1214_v25 = vshrl.u32 %v1200_v23, 16  ;;  %v1213_v28 = vand.u32 65535, %v1200_v23  ;;  %v1230_v55 = vsub.s32 %v1186_v20, %v1200_v23  ;;  %v1234_v56 = vadd.s32 %v1200_v23, %v1190_v21 }
 0xfc5   :  { %v1216_v27 = vcvt.s32.f32 %v1214_v25  ;;  %v1215_v29 = vcvt.s32.f32 %v1213_v28 }
 0xfc7   :  { %1205 = vadd.xlane.f32.xlu0 %v1203_v26  ;;  %1219 = vadd.xlane.f32.xlu1 %v1216_v27 }
 0xfcb   :  { %1217 = vadd.xlane.f32.xlu1 %v1215_v29 }
0x1050   :  { %v1208_v30 = vpop.xlane.xlu0 %1207 }
0x1051   :  { %v1210_v31 = vcvt.f32.s32 %v1208_v30 }
0x1053   :  { %v1211_v35 = vshll.u32 %v1210_v31, 16  ;;  %v1290_v31 = vand.u32 1, %v1288_v19 }
0x1054   :  { %v1206_v33 = vpop.xlane.xlu0 %1205  ;;  %v1220_v34 = vpop.xlane.xlu1 %1219 }
0x1055   :  { %v1209_v14 = vcvt.f32.s32 %v1206_v33  ;;  %v1222_v36 = vcvt.f32.s32 %v1220_v34 }
0x1057   :  { %v1212_v37 = vadd.s32 %v1211_v35, %v1209_v14  ;;  %v1223_v43 = vshll.u32 %v1222_v36, 16 }
0x1058   :  { %v1218_v40 = vpop.xlane.xlu1 %1217 }
0x1059   :  { %v1225_v41 = vsub.s32 %v1212_v37, %v1193_v8  ;;  %v1237_v42 = vsub.s32 %v1193_v8, %v1212_v37  ;;  %v1221_v44 = vcvt.f32.s32 %v1218_v40 }
0x105b   :  { %vm1227_vm4 = vcmp.ge.s32.totalorder %v1225_v41, 0  ;;  %v1224_v47 = vadd.s32 %v1223_v43, %v1221_v44 }
0x105c   :  { %v1231_v48 = vsel %vm1227_vm4, %v1199_v9, %v1229_v45  ;;  %v1235_v49 = vsel %vm1227_vm4, %v1189_v7, %v1233_v46  ;;  %v1239_v50 = vsel %vm1227_vm4, %v1193_v8, %v1237_v42  ;;  %v1287_v7 = vshra.s32 %v1626_v11, 4 }
0x105d   :  { %v1245_v51 = vand.u32 %v1243_v38, %v1231_v48  ;;  %v1226_v53 = vsub.s32 %v1224_v47, %v1194_v22  ;;  %v1238_v54 = vsub.s32 %v1194_v22, %v1224_v47 }
0x105e   :  { %v1289_v18 = vand.u32 1, %v1287_v7 }
0x105f   :  { %vm1228_vm5 = vcmp.ge.s32.totalorder %v1226_v53, 0  ;;  %v1248_v57 = vshrl.u32 %v1245_v51, 16  ;;  %v1247_v63 = vand.u32 65535, %v1245_v51  ;;  %v1275_v24 = vsub.s32 %v1231_v48, %v1245_v51 }
0x1060   :  { %v1232_v58 = vsel %vm1228_vm5, %v1200_v23, %v1230_v55  ;;  %v1236_v59 = vsel %vm1228_vm5, %v1190_v21, %v1234_v56  ;;  %v1240_v60 = vsel %vm1228_vm5, %v1194_v22, %v1238_v54  ;;  %v1279_v25 = vadd.s32 %v1245_v51, %v1235_v49 }
0x1061   :  { %v1246_v61 = vand.u32 %v1244_v52, %v1232_v58  ;;  %v1250_v62 = vcvt.s32.f32 %v1248_v57  ;;  %v1249_v1 = vcvt.s32.f32 %v1247_v63  ;;  %v1334_v57 = vshra.s32 %v1628_v12, 3 }
0x1063   :  { %1253 = vadd.xlane.f32.xlu0 %v1250_v62  ;;  %v1260_v0 = vshrl.u32 %v1246_v61, 16  ;;  %v1259_v3 = vand.u32 65535, %v1246_v61  ;;  %v1276_v34 = vsub.s32 %v1232_v58, %v1246_v61  ;;  %v1280_v35 = vadd.s32 %v1246_v61, %v1236_v59 }
0x1065   :  { %v1262_v2 = vcvt.s32.f32 %v1260_v0  ;;  %v1261_v4 = vcvt.s32.f32 %v1259_v3 }
0x1067   :  { %1251 = vadd.xlane.f32.xlu0 %v1249_v1  ;;  %1265 = vadd.xlane.f32.xlu1 %v1262_v2 }
0x106b   :  { %1263 = vadd.xlane.f32.xlu1 %v1261_v4 }
0x10f0   :  { %v1254_v5 = vpop.xlane.xlu0 %1253 }
0x10f1   :  { %v1256_v6 = vcvt.f32.s32 %v1254_v5 }
0x10f3   :  { %v1257_v10 = vshll.u32 %v1256_v6, 16  ;;  %v1336_v6 = vand.u32 1, %v1334_v57 }
0x10f4   :  { %v1252_v8 = vpop.xlane.xlu0 %1251  ;;  %v1266_v9 = vpop.xlane.xlu1 %1265 }
0x10f5   :  { %v1255_v15 = vcvt.f32.s32 %v1252_v8  ;;  %v1268_v16 = vcvt.f32.s32 %v1266_v9 }
0x10f7   :  { %v1258_v17 = vadd.s32 %v1257_v10, %v1255_v15  ;;  %v1269_v23 = vshll.u32 %v1268_v16, 16 }
0x10f8   :  { %v1264_v20 = vpop.xlane.xlu1 %1263 }
0x10f9   :  { %v1271_v21 = vsub.s32 %v1258_v17, %v1239_v50  ;;  %v1283_v22 = vsub.s32 %v1239_v50, %v1258_v17  ;;  %v1267_v13 = vcvt.f32.s32 %v1264_v20 }
0x10fb   :  { %vm1273_vm6 = vcmp.ge.s32.totalorder %v1271_v21, 0  ;;  %v1270_v26 = vadd.s32 %v1269_v23, %v1267_v13 }
0x10fc   :  { %v1277_v27 = vsel %vm1273_vm6, %v1245_v51, %v1275_v24  ;;  %v1281_v28 = vsel %vm1273_vm6, %v1235_v49, %v1279_v25  ;;  %v1285_v29 = vsel %vm1273_vm6, %v1239_v50, %v1283_v22  ;;  %v1333_v49 = vshra.s32 %v1626_v11, 3 }
0x10fd   :  { %v1291_v30 = vand.u32 %v1289_v18, %v1277_v27  ;;  %v1272_v32 = vsub.s32 %v1270_v26, %v1240_v60  ;;  %v1284_v33 = vsub.s32 %v1240_v60, %v1270_v26 }
0x10fe   :  { %v1335_v56 = vand.u32 1, %v1333_v49 }
0x10ff   :  { %vm1274_vm7 = vcmp.ge.s32.totalorder %v1272_v32, 0  ;;  %v1294_v14 = vshrl.u32 %v1291_v30, 16  ;;  %v1293_v41 = vand.u32 65535, %v1291_v30  ;;  %v1321_v63 = vsub.s32 %v1277_v27, %v1291_v30 }
0x1100   :  { %v1278_v36 = vsel %vm1274_vm7, %v1246_v61, %v1276_v34  ;;  %v1282_v37 = vsel %vm1274_vm7, %v1236_v59, %v1280_v35  ;;  %v1286_v38 = vsel %vm1274_vm7, %v1240_v60, %v1284_v33  ;;  %v1325_v0 = vadd.s32 %v1291_v30, %v1281_v28 }
0x1101   :  { %v1292_v39 = vand.u32 %v1290_v31, %v1278_v36  ;;  %v1296_v40 = vcvt.s32.f32 %v1294_v14  ;;  %v1295_v43 = vcvt.s32.f32 %v1293_v41  ;;  %v1380_v14 = vshra.s32 %v1628_v12, 2 }
0x1103   :  { %1299 = vadd.xlane.f32.xlu0 %v1296_v40  ;;  %v1306_v42 = vshrl.u32 %v1292_v39, 16  ;;  %v1305_v45 = vand.u32 65535, %v1292_v39  ;;  %v1322_v9 = vsub.s32 %v1278_v36, %v1292_v39  ;;  %v1326_v10 = vadd.s32 %v1292_v39, %v1282_v37 }
0x1105   :  { %v1308_v44 = vcvt.s32.f32 %v1306_v42  ;;  %v1307_v46 = vcvt.s32.f32 %v1305_v45 }
0x1107   :  { %1297 = vadd.xlane.f32.xlu0 %v1295_v43  ;;  %1311 = vadd.xlane.f32.xlu1 %v1308_v44 }
0x110b   :  { %1309 = vadd.xlane.f32.xlu1 %v1307_v46 }
0x1190   :  { %v1300_v47 = vpop.xlane.xlu0 %1299 }
0x1191   :  { %v1302_v48 = vcvt.f32.s32 %v1300_v47 }
0x1193   :  { %v1303_v52 = vshll.u32 %v1302_v48, 16  ;;  %v1382_v48 = vand.u32 1, %v1380_v14 }
0x1194   :  { %v1298_v50 = vpop.xlane.xlu0 %1297  ;;  %v1312_v51 = vpop.xlane.xlu1 %1311 }
0x1195   :  { %v1301_v53 = vcvt.f32.s32 %v1298_v50  ;;  %v1314_v54 = vcvt.f32.s32 %v1312_v51 }
0x1197   :  { %v1304_v55 = vadd.s32 %v1303_v52, %v1301_v53  ;;  %v1315_v61 = vshll.u32 %v1314_v54, 16 }
0x1198   :  { %v1310_v58 = vpop.xlane.xlu1 %1309 }
0x1199   :  { %v1317_v59 = vsub.s32 %v1304_v55, %v1285_v29  ;;  %v1329_v60 = vsub.s32 %v1285_v29, %v1304_v55  ;;  %v1313_v62 = vcvt.f32.s32 %v1310_v58 }
0x119b   :  { %vm1319_vm8 = vcmp.ge.s32.totalorder %v1317_v59, 0  ;;  %v1316_v1 = vadd.s32 %v1315_v61, %v1313_v62 }
0x119c   :  { %v1323_v2 = vsel %vm1319_vm8, %v1291_v30, %v1321_v63  ;;  %v1327_v3 = vsel %vm1319_vm8, %v1281_v28, %v1325_v0  ;;  %v1331_v4 = vsel %vm1319_vm8, %v1285_v29, %v1329_v60  ;;  %v1379_v28 = vshra.s32 %v1626_v11, 2 }
0x119d   :  { %v1337_v5 = vand.u32 %v1335_v56, %v1323_v2  ;;  %v1318_v7 = vsub.s32 %v1316_v1, %v1286_v38  ;;  %v1330_v8 = vsub.s32 %v1286_v38, %v1316_v1 }
0x119e   :  { %v1381_v35 = vand.u32 1, %v1379_v28 }
0x119f   :  { %vm1320_vm9 = vcmp.ge.s32.totalorder %v1318_v7, 0  ;;  %v1340_v15 = vshrl.u32 %v1337_v5, 16  ;;  %v1339_v21 = vand.u32 65535, %v1337_v5  ;;  %v1367_v41 = vsub.s32 %v1323_v2, %v1337_v5 }
0x11a0   :  { %v1324_v16 = vsel %vm1320_vm9, %v1292_v39, %v1322_v9  ;;  %v1328_v17 = vsel %vm1320_vm9, %v1282_v37, %v1326_v10  ;;  %v1332_v18 = vsel %vm1320_vm9, %v1286_v38, %v1330_v8  ;;  %v1371_v42 = vadd.s32 %v1337_v5, %v1327_v3 }
0x11a1   :  { %v1338_v19 = vand.u32 %v1336_v6, %v1324_v16  ;;  %v1342_v20 = vcvt.s32.f32 %v1340_v15  ;;  %v1341_v23 = vcvt.s32.f32 %v1339_v21  ;;  %v1426_v15 = vshra.s32 %v1628_v12, 1 }
0x11a3   :  { %1345 = vadd.xlane.f32.xlu0 %v1342_v20  ;;  %v1352_v22 = vshrl.u32 %v1338_v19, 16  ;;  %v1351_v24 = vand.u32 65535, %v1338_v19  ;;  %v1368_v51 = vsub.s32 %v1324_v16, %v1338_v19  ;;  %v1372_v52 = vadd.s32 %v1338_v19, %v1328_v17 }
0x11a5   :  { %v1354_v13 = vcvt.s32.f32 %v1352_v22  ;;  %v1353_v25 = vcvt.s32.f32 %v1351_v24 }
0x11a7   :  { %1343 = vadd.xlane.f32.xlu0 %v1341_v23  ;;  %1357 = vadd.xlane.f32.xlu1 %v1354_v13 }
0x11ab   :  { %1355 = vadd.xlane.f32.xlu1 %v1353_v25 }
0x1230   :  { %v1346_v26 = vpop.xlane.xlu0 %1345 }
0x1231   :  { %v1348_v27 = vcvt.f32.s32 %v1346_v26 }
0x1233   :  { %v1349_v31 = vshll.u32 %v1348_v27, 16  ;;  %v1428_v27 = vand.u32 1, %v1426_v15 }
0x1234   :  { %v1344_v29 = vpop.xlane.xlu0 %1343  ;;  %v1358_v30 = vpop.xlane.xlu1 %1357 }
0x1235   :  { %v1347_v32 = vcvt.f32.s32 %v1344_v29  ;;  %v1360_v33 = vcvt.f32.s32 %v1358_v30 }
0x1237   :  { %v1350_v34 = vadd.s32 %v1349_v31, %v1347_v32  ;;  %v1361_v39 = vshll.u32 %v1360_v33, 16 }
0x1238   :  { %v1356_v36 = vpop.xlane.xlu1 %1355 }
0x1239   :  { %v1363_v37 = vsub.s32 %v1350_v34, %v1331_v4  ;;  %v1375_v38 = vsub.s32 %v1331_v4, %v1350_v34  ;;  %v1359_v40 = vcvt.f32.s32 %v1356_v36 }
0x123b   :  { %vm1365_vm10 = vcmp.ge.s32.totalorder %v1363_v37, 0  ;;  %v1362_v43 = vadd.s32 %v1361_v39, %v1359_v40 }
0x123c   :  { %v1369_v44 = vsel %vm1365_vm10, %v1337_v5, %v1367_v41  ;;  %v1373_v45 = vsel %vm1365_vm10, %v1327_v3, %v1371_v42  ;;  %v1377_v46 = vsel %vm1365_vm10, %v1331_v4, %v1375_v38  ;;  %v1425_v3 = vshra.s32 %v1626_v11, 1 }
0x123d   :  { %v1383_v47 = vand.u32 %v1381_v35, %v1369_v44  ;;  %v1364_v49 = vsub.s32 %v1362_v43, %v1332_v18  ;;  %v1376_v50 = vsub.s32 %v1332_v18, %v1362_v43 }
0x123e   :  { %v1427_v10 = vand.u32 1, %v1425_v3 }
0x123f   :  { %vm1366_vm11 = vcmp.ge.s32.totalorder %v1364_v49, 0  ;;  %v1386_v53 = vshrl.u32 %v1383_v47, 16  ;;  %v1385_v59 = vand.u32 65535, %v1383_v47  ;;  %v1413_v21 = vsub.s32 %v1369_v44, %v1383_v47 }
0x1240   :  { %v1370_v54 = vsel %vm1366_vm11, %v1338_v19, %v1368_v51  ;;  %v1374_v55 = vsel %vm1366_vm11, %v1328_v17, %v1372_v52  ;;  %v1378_v56 = vsel %vm1366_vm11, %v1332_v18, %v1376_v50  ;;  %v1417_v22 = vadd.s32 %v1383_v47, %v1373_v45 }
0x1241   :  { %v1384_v57 = vand.u32 %v1382_v48, %v1370_v54  ;;  %v1388_v58 = vcvt.s32.f32 %v1386_v53  ;;  %v1387_v61 = vcvt.s32.f32 %v1385_v59  ;;  %v1471_v51 = vand.u32 1, %v1626_v11 }
0x1243   :  { %1391 = vadd.xlane.f32.xlu0 %v1388_v58  ;;  %v1398_v60 = vshrl.u32 %v1384_v57, 16  ;;  %v1397_v63 = vand.u32 65535, %v1384_v57  ;;  %v1414_v30 = vsub.s32 %v1370_v54, %v1384_v57  ;;  %v1418_v31 = vadd.s32 %v1384_v57, %v1374_v55 }
0x1245   :  { %v1400_v62 = vcvt.s32.f32 %v1398_v60  ;;  %v1399_v0 = vcvt.s32.f32 %v1397_v63 }
0x1247   :  { %1389 = vadd.xlane.f32.xlu0 %v1387_v61  ;;  %1403 = vadd.xlane.f32.xlu1 %v1400_v62 }
0x124b   :  { %1401 = vadd.xlane.f32.xlu1 %v1399_v0  ;;  %v1472_v0 = vand.u32 1, %v1628_v12 }
0x12d0   :  { %v1392_v1 = vpop.xlane.xlu0 %1391 }
0x12d1   :  { %v1394_v2 = vcvt.f32.s32 %v1392_v1 }
0x12d3   :  { %v1395_v6 = vshll.u32 %v1394_v2, 16 }
0x12d4   :  { %v1390_v4 = vpop.xlane.xlu0 %1389  ;;  %v1404_v5 = vpop.xlane.xlu1 %1403 }
0x12d5   :  { %v1393_v7 = vcvt.f32.s32 %v1390_v4  ;;  %v1406_v8 = vcvt.f32.s32 %v1404_v5 }
0x12d7   :  { %v1396_v9 = vadd.s32 %v1395_v6, %v1393_v7  ;;  %v1407_v19 = vshll.u32 %v1406_v8, 16 }
0x12d8   :  { %v1402_v16 = vpop.xlane.xlu1 %1401 }
0x12d9   :  { %v1409_v17 = vsub.s32 %v1396_v9, %v1377_v46  ;;  %v1421_v18 = vsub.s32 %v1377_v46, %v1396_v9  ;;  %v1405_v20 = vcvt.f32.s32 %v1402_v16 }
0x12db   :  { %vm1411_vm12 = vcmp.ge.s32.totalorder %v1409_v17, 0  ;;  %v1408_v23 = vadd.s32 %v1407_v19, %v1405_v20 }
0x12dc   :  { %v1415_v13 = vsel %vm1411_vm12, %v1383_v47, %v1413_v21  ;;  %v1419_v24 = vsel %vm1411_vm12, %v1373_v45, %v1417_v22  ;;  %v1423_v25 = vsel %vm1411_vm12, %v1377_v46, %v1421_v18 }
0x12dd   :  { %v1429_v26 = vand.u32 %v1427_v10, %v1415_v13  ;;  %v1410_v28 = vsub.s32 %v1408_v23, %v1378_v56  ;;  %v1422_v29 = vsub.s32 %v1378_v56, %v1408_v23 }
0x12df   :  { %vm1412_vm13 = vcmp.ge.s32.totalorder %v1410_v28, 0  ;;  %v1432_v32 = vshrl.u32 %v1429_v26, 16  ;;  %v1431_v37 = vand.u32 65535, %v1429_v26  ;;  %v1463_v58 = vadd.s32 %v1429_v26, %v1419_v24 }
0x12e0   :  { %v1416_v33 = vsel %vm1412_vm13, %v1384_v57, %v1414_v30  ;;  %v1420_v34 = vsel %vm1412_vm13, %v1374_v55, %v1418_v31  ;;  %v1424_v35 = vsel %vm1412_vm13, %v1378_v56, %v1422_v29  ;;  %v1459_v57 = vsub.s32 %v1415_v13, %v1429_v26 }
0x12e1   :  { %v1430_v14 = vand.u32 %v1428_v27, %v1416_v33  ;;  %v1434_v36 = vcvt.s32.f32 %v1432_v32  ;;  %v1433_v39 = vcvt.s32.f32 %v1431_v37  ;;  %v1540_v37 = vld [vmem:[#allocation2 + $0x8] sm:$0xff] }
0x12e3   :  { %1437 = vadd.xlane.f32.xlu0 %v1434_v36  ;;  %v1444_v38 = vshrl.u32 %v1430_v14, 16  ;;  %v1443_v41 = vand.u32 65535, %v1430_v14  ;;  %v1460_v3 = vsub.s32 %v1416_v33, %v1430_v14  ;;  %v1464_v4 = vadd.s32 %v1430_v14, %v1420_v34 }
0x12e5   :  { %v1446_v40 = vcvt.s32.f32 %v1444_v38  ;;  %v1445_v42 = vcvt.s32.f32 %v1443_v41 }
0x12e7   :  { %1435 = vadd.xlane.f32.xlu0 %v1433_v39  ;;  %1449 = vadd.xlane.f32.xlu1 %v1446_v40 }
0x12eb   :  { %1447 = vadd.xlane.f32.xlu1 %v1445_v42 }
0x1370   :  { %v1438_v43 = vpop.xlane.xlu0 %1437 }
0x1371   :  { %v1440_v44 = vcvt.f32.s32 %v1438_v43 }
0x1373   :  { %v1441_v47 = vshll.u32 %v1440_v44, 16 }
0x1374   :  { %v1436_v45 = vpop.xlane.xlu0 %1435  ;;  %v1450_v46 = vpop.xlane.xlu1 %1449 }
0x1375   :  { %v1439_v48 = vcvt.f32.s32 %v1436_v45  ;;  %v1452_v49 = vcvt.f32.s32 %v1450_v46 }
0x1377   :  { %v1442_v50 = vadd.s32 %v1441_v47, %v1439_v48  ;;  %v1453_v55 = vshll.u32 %v1452_v49, 16 }
0x1378   :  { %v1448_v52 = vpop.xlane.xlu1 %1447 }
0x1379   :  { %v1455_v53 = vsub.s32 %v1442_v50, %v1423_v25  ;;  %v1467_v54 = vsub.s32 %v1423_v25, %v1442_v50  ;;  %v1451_v56 = vcvt.f32.s32 %v1448_v52 }
0x137b   :  { %vm1457_vm14 = vcmp.ge.s32.totalorder %v1455_v53, 0  ;;  %v1454_v59 = vadd.s32 %v1453_v55, %v1451_v56 }
0x137c   :  { %v1461_v60 = vsel %vm1457_vm14, %v1429_v26, %v1459_v57  ;;  %v1465_v61 = vsel %vm1457_vm14, %v1419_v24, %v1463_v58  ;;  %v1469_v62 = vsel %vm1457_vm14, %v1423_v25, %v1467_v54 }
0x137d   :  { %v1473_v63 = vand.u32 %v1471_v51, %v1461_v60  ;;  %v1456_v1 = vsub.s32 %v1454_v59, %v1424_v35  ;;  %v1468_v2 = vsub.s32 %v1424_v35, %v1454_v59 }
0x137f   :  { %v1503_v11 = vadd.s32 %v1473_v63, %v1465_v61  ;;  %vm1458_vm15 = vcmp.ge.s32.totalorder %v1456_v1, 0  ;;  %v1476_v5 = vshrl.u32 %v1473_v63, 16  ;;  %v1475_v15 = vand.u32 65535, %v1473_v63 }
0x1380   :  { %v1462_v6 = vsel %vm1458_vm15, %v1430_v14, %v1460_v3  ;;  %v1466_v7 = vsel %vm1458_vm15, %v1420_v34, %v1464_v4  ;;  %v1470_v8 = vsel %vm1458_vm15, %v1424_v35, %v1468_v2  ;;  %v1539_v35 = vld [vmem:[#allocation2] sm:$0xff] }
0x1381   :  { %v1474_v9 = vand.u32 %v1472_v0, %v1462_v6  ;;  %v1478_v10 = vcvt.s32.f32 %v1476_v5  ;;  %v1477_v18 = vcvt.s32.f32 %v1475_v15 }
0x1383   :  { %v1504_v16 = vadd.s32 %v1474_v9, %v1466_v7  ;;  %1481 = vadd.xlane.f32.xlu0 %v1478_v10  ;;  %v1488_v17 = vshrl.u32 %v1474_v9, 16  ;;  %v1487_v20 = vand.u32 65535, %v1474_v9 }
0x1385   :  { %v1490_v19 = vcvt.s32.f32 %v1488_v17  ;;  %v1489_v12 = vcvt.s32.f32 %v1487_v20 }
0x1387   :  { %1479 = vadd.xlane.f32.xlu0 %v1477_v18  ;;  %1493 = vadd.xlane.f32.xlu1 %v1490_v19 }
0x138b   :  { %1491 = vadd.xlane.f32.xlu1 %v1489_v12 }
0x1410   :  { %v1482_v21 = vpop.xlane.xlu0 %1481 }
0x1411   :  { %v1484_v22 = vcvt.f32.s32 %v1482_v21 }
0x1413   :  { %v1485_v24 = vshll.u32 %v1484_v22, 16 }
0x1414   :  { %v1480_v23 = vpop.xlane.xlu0 %1479  ;;  %v1494_v13 = vpop.xlane.xlu1 %1493 }
0x1415   :  { %v1483_v25 = vcvt.f32.s32 %v1480_v23  ;;  %v1496_v26 = vcvt.f32.s32 %v1494_v13 }
0x1417   :  { %v1486_v27 = vadd.s32 %v1485_v24, %v1483_v25  ;;  %v1497_v30 = vshll.u32 %v1496_v26, 16 }
0x1418   :  { %v1492_v28 = vpop.xlane.xlu1 %1491 }
0x1419   :  { %v1499_v29 = vsub.s32 %v1486_v27, %v1469_v62  ;;  %v1495_v31 = vcvt.f32.s32 %v1492_v28 }
0x141b   :  { %vm1501_vm0 = vcmp.ge.s32.totalorder %v1499_v29, 0  ;;  %v1498_v32 = vadd.s32 %v1497_v30, %v1495_v31 }
0x141c   :  { %v1505_v33 = vsel %vm1501_vm0, %v1465_v61, %v1503_v11 }
0x141d   :  { %v1500_v34 = vsub.s32 %v1498_v32, %v1470_v8  ;;  %vm1507_vm1 = vcmp.ne.s32.totalorder %v1505_v33, 0 }
0x141e   :  { %v1509_v14 = vsel %vm1507_vm1, %v1539_v35, 0.0 }
0x141f   :  { %vm1502_vm2 = vcmp.ge.s32.totalorder %v1500_v34, 0  ;;  %1511 = vst [vmem:[#allocation5] sm:$0xff] %v1509_v14 }
0x1420   :  { %v1506_v36 = vsel %vm1502_vm2, %v1466_v7, %v1504_v16 }
0x1421   :  { %vm1508_vm3 = vcmp.ne.s32.totalorder %v1506_v36, 0 }
0x1422   :  { %v1510_v38 = vsel %vm1508_vm3, %v1540_v37, 0.0 }
0x1423   :  { %1512 = vst [vmem:[#allocation5 + $0x8] sm:$0xff] %v1510_v38 }
0x1424   :  { %1574 = shalt.err (!%p1571_p12)
}
0x1425   :  { %s1575_s28 = scalar_lea.hbm %s1731_s2, 256 }
0x1426   :  { %p1576_p13 = scmp.ne.s32.totalorder %s1731_s2, %s1575_s28  ;;  %p1579_p0 = scmp.lt.u32.totalorder %s1575_s28, %s1731_s2 }
0x1428   :  { %p1581_p1 = pnand %p1579_p0, %p1576_p13 }
0x142a   :  { %1584 = shalt.err (!%p1581_p1)
}
0x142b   :  { %1524 = dma.vmem_to_hbm [thread:$0]  %s1519_s1, 256, %s1731_s2, [#allocation4], %s1590_s19, %s1590_s19, %s1591_s20  }
0x142c   :  { %1587 = dma.done.wait [#allocation4], 256  }
0x142d   :  { %1588 = vsyncadd [#allocation4], 4294967040 }
0x142e   :  { %1528 = vsyncpa [#allocation3], 1 }
0x142f   :  { %1529 = vsyncpa [#allocation4], 1 }

</bundles_post_ra>
